<compile_context>
chip_gen: v5e
topology: v5e:2x2
jax: 0.10.0
libtpu: 0.0.40
codegen_flags: <defaults>
</compile_context>

<pallas_src>
import functools

import numpy as np
import jax
import jax.numpy as jnp
from jax import lax
from jax.experimental import pallas as pl
from jax.experimental.pallas import tpu as pltpu

KH, KW = 3, 5            # conv kernel (freq, frame)
SH, SW = 2, 2            # stride
PH, PW = 1, 2            # padding
NTAP = KH * KW
LN_EPS = 1e-5
LRELU_SLOPE = 0.3
OUT_LANES = 128          # lane-dense output width for the single logit

_PARAM_ORDER = ("w1", "g1", "b1", "ind1",
                "s2", "w2", "g2", "b2", "ind2",
                "s3", "w3", "g3", "b3", "ind3",
                "wl", "bl")


def _out_size(size, k, stride, pad):
    return (size + 2 * pad - k) // stride + 1


def _round_up(x, m):
    return ((x + m - 1) // m) * m


# ----------------------------------------------------------------------------------
# Fused kernel: conv1 -> LN -> LReLU -> conv2 -> LN -> LReLU -> conv3 -> LN -> LReLU
#               -> flatten -> Linear.  One batch tile per grid step, all rank-2.
# ----------------------------------------------------------------------------------
def _make_disc_kernel(B, m1, c1, m2, rpt2, c2, m3, rpt3, c3):
    R2, R3 = B * rpt2, B * rpt3

    def ln_lrelu(y, ind, g, b, rpt, c, real_elems):
        # y: (B*rpt, c) f32 conv output; rows past the real spatial extent are exactly
        # zero (zero rows in the gather matrix), so summing whole padded segments and
        # dividing by the real element count is exact.  g/b are pre-tiled to (B*rpt, c)
        # with zero padding rows, so padded rows stay exactly zero after the affine.
        cc = jnp.concatenate([y, y * y], axis=-1)                       # (B*rpt, 2c)
        stats = jnp.dot(ind, cc, preferred_element_type=jnp.float32)    # (B, 2c), MXU
        inv_n = 1.0 / float(real_elems)
        mean = jnp.sum(stats[:, :c], axis=-1, keepdims=True) * inv_n    # (B, 1)
        ex2 = jnp.sum(stats[:, c:], axis=-1, keepdims=True) * inv_n
        inv_std = lax.rsqrt(ex2 - mean * mean + LN_EPS)                 # (B, 1)
        ms = jnp.concatenate([mean, inv_std], axis=-1)                  # (B, 2)
        rows = jnp.concatenate(
            [jnp.broadcast_to(ms[s:s + 1, :], (rpt, 2)) for s in range(B)],
            axis=0)                                                     # (B*rpt, 2)
        y = (y - rows[:, :1]) * rows[:, 1:2]
        y = y * g + b
        return jnp.where(y >= 0.0, y, LRELU_SLOPE * y)

    def kernel(x_ref, w1_ref, g1_ref, b1_ref, ind1_ref,
               s2_ref, w2_ref, g2_ref, b2_ref, ind2_ref,
               s3_ref, w3_ref, g3_ref, b3_ref, ind3_ref,
               wl_ref, bl_ref, o_ref, im2_2_ref, im2_3_ref):

        # ---- layer 1: im2col (built in the wrapper) matmul, bf16 x bf16 -> f32 -------
        y = jnp.dot(x_ref[0], w1_ref[...], preferred_element_type=jnp.float32)
        y = ln_lrelu(y, ind1_ref[...], g1_ref[...], b1_ref[...], m1, c1, m1 * c1)
        # TODO(synk): nn.Dropout(0.7) is identity in eval mode; training-mode stochastic
        # masking is not implemented here.

        # ---- layer 2: gather matmul -> lane relayout -> ONE K=NTAP*c1 matmul ----------
        z = jnp.dot(s2_ref[...], y.astype(jnp.bfloat16),
                    preferred_element_type=jnp.float32)                 # (NTAP*R2, c1)
        zb = z.astype(jnp.bfloat16)          # exact: entries are gathered bf16 values
        for t in range(NTAP):                # 15 static lane-offset stores (vst only)
            im2_2_ref[:, t * c1:(t + 1) * c1] = zb[t * R2:(t + 1) * R2, :]
        y = jnp.dot(im2_2_ref[...], w2_ref[...], preferred_element_type=jnp.float32)
        y = ln_lrelu(y, ind2_ref[...], g2_ref[...], b2_ref[...], rpt2, c2, m2 * c2)

        # ---- layer 3 ------------------------------------------------------------------
        z = jnp.dot(s3_ref[...], y.astype(jnp.bfloat16),
                    preferred_element_type=jnp.float32)                 # (NTAP*R3, c2)
        zb = z.astype(jnp.bfloat16)
        for t in range(NTAP):
            im2_3_ref[:, t * c2:(t + 1) * c2] = zb[t * R3:(t + 1) * R3, :]
        y = jnp.dot(im2_3_ref[...], w3_ref[...], preferred_element_type=jnp.float32)
        y = ln_lrelu(y, ind3_ref[...], g3_ref[...], b3_ref[...], rpt3, c3, m3 * c3)

        # ---- flatten (PyTorch (C,H,W) order folded into wl) + Linear(->1), f32 --------
        per_chan = jnp.dot(ind3_ref[...], y * wl_ref[...],
                           preferred_element_type=jnp.float32)          # (B, c3)
        logits = jnp.sum(per_chan, axis=-1, keepdims=True)              # (B, 1)
        o_ref[0] = logits + bl_ref[...]                                 # lane-dense store

    return kernel


def _full_spec(shape):
    nd = len(shape)
    return pl.BlockSpec(shape, lambda i, _nd=nd: (0,) * _nd)


# ----------------------------------------------------------------------------------
# Glue: layer-1 im2col (XLA side), gather / indicator matrix builders (host side)
# ----------------------------------------------------------------------------------
def _im2col_stride2(x_nhwc):
    n, h, w, c = x_nhwc.shape
    hout = _out_size(h, KH, SH, PH)
    wout = _out_size(w, KW, SW, PW)
    xp = jnp.pad(x_nhwc, ((0, 0), (PH, PH), (PW, PW), (0, 0)))
    cols = []
    for kh in range(KH):
        for kw in range(KW):
            cols.append(xp[:, kh:kh + SH * hout:SH, kw:kw + SW * wout:SW, :])
    lhs = jnp.concatenate(cols, axis=-1)            # (N, Hout, Wout, KH*KW*C)
    return lhs.reshape(n, hout * wout, KH * KW * c)


def _make_gather(hin, win, src_seg, hout, wout, dst_seg, batch):
    """0/1 matrix (KH*KW*batch*dst_seg, batch*src_seg).  Z = S @ Y gathers the stride-2
    conv patches, rows ordered (tap, sample, output position).  Out-of-range (spatially
    padded) taps and row-padding are zero rows.  Exact 0/1 -> bf16 is lossless."""
    s = np.zeros((NTAP * batch * dst_seg, batch * src_seg), np.float32)
    for kh in range(KH):
        for kw in range(KW):
            t = kh * KW + kw
            for b in range(batch):
                for oh in range(hout):
                    for ow in range(wout):
                        r = SH * oh + kh - PH
                        c = SW * ow + kw - PW
                        if 0 <= r < hin and 0 <= c < win:
                            row = (t * batch + b) * dst_seg + oh * wout + ow
                            s[row, b * src_seg + r * win + c] = 1.0
    return jnp.asarray(s, jnp.bfloat16)


def _make_indicator(batch, seg):
    """(batch, batch*seg) 0/1 matrix whose matmul computes per-sample segment sums."""
    return jnp.asarray(np.kron(np.eye(batch, dtype=np.float32),
                               np.ones((1, seg), np.float32)))


# ----------------------------------------------------------------------------------
# Parameter preparation: PyTorch layouts -> kernel layouts (run once, outside jit).
# ----------------------------------------------------------------------------------
def prepare_kernel_params(p, batch_tile):
    kp = {}
    B = int(batch_tile)

    c1, cin = int(p["w1"].shape[0]), int(p["w1"].shape[1])
    _, h1, w1_ = (int(d) for d in p["g1"].shape)
    m1 = h1 * w1_
    k1 = NTAP * cin
    k1p = _round_up(k1, 8)                                              # 60 -> 64
    w1m = p["w1"].transpose(2, 3, 1, 0).reshape(k1, c1)                 # rows: (kh,kw,cin)
    kp["w1"] = jnp.pad(w1m, ((0, k1p - k1), (0, 0))).astype(jnp.bfloat16)
    g1 = p["g1"].transpose(1, 2, 0).reshape(m1, c1).astype(jnp.float32)
    b1 = p["b1"].transpose(1, 2, 0).reshape(m1, c1).astype(jnp.float32)
    kp["g1"] = jnp.tile(g1, (B, 1))
    kp["b1"] = jnp.tile(b1, (B, 1))
    kp["ind1"] = _make_indicator(B, m1)

    c2 = int(p["w2"].shape[0])
    _, h2, w2_ = (int(d) for d in p["g2"].shape)
    m2 = h2 * w2_
    rpt2 = _round_up(max(m2, 8), 8)
    kp["s2"] = _make_gather(h1, w1_, m1, h2, w2_, rpt2, B)
    kp["w2"] = (p["w2"].transpose(2, 3, 1, 0)
                .reshape(NTAP * c1, c2).astype(jnp.bfloat16))           # K = 960
    g2 = jnp.pad(p["g2"].transpose(1, 2, 0).reshape(m2, c2), ((0, rpt2 - m2), (0, 0)))
    b2 = jnp.pad(p["b2"].transpose(1, 2, 0).reshape(m2, c2), ((0, rpt2 - m2), (0, 0)))
    kp["g2"] = jnp.tile(g2.astype(jnp.float32), (B, 1))
    kp["b2"] = jnp.tile(b2.astype(jnp.float32), (B, 1))
    kp["ind2"] = _make_indicator(B, rpt2)

    c3 = int(p["w3"].shape[0])
    _, h3, w3_ = (int(d) for d in p["g3"].shape)
    m3 = h3 * w3_
    rpt3 = _round_up(max(m3, 8), 8)
    kp["s3"] = _make_gather(h2, w2_, rpt2, h3, w3_, rpt3, B)
    kp["w3"] = (p["w3"].transpose(2, 3, 1, 0)
                .reshape(NTAP * c2, c3).astype(jnp.bfloat16))           # K = 1920
    g3 = jnp.pad(p["g3"].transpose(1, 2, 0).reshape(m3, c3), ((0, rpt3 - m3), (0, 0)))
    b3 = jnp.pad(p["b3"].transpose(1, 2, 0).reshape(m3, c3), ((0, rpt3 - m3), (0, 0)))
    kp["g3"] = jnp.tile(g3.astype(jnp.float32), (B, 1))
    kp["b3"] = jnp.tile(b3.astype(jnp.float32), (B, 1))
    kp["ind3"] = _make_indicator(B, rpt3)

    # Linear(128*H3*W3 -> 1): fold the PyTorch flatten order (C,H,W) into the weight so the
    # kernel contracts directly against its (rows=spatial, lanes=channels) layout; padded
    # rows are zero so junk in padded activation rows can never leak into the logit.
    wl = p["lw"].reshape(c3, h3, w3_).transpose(1, 2, 0).reshape(m3, c3)
    wl = jnp.pad(wl, ((0, rpt3 - m3), (0, 0))).astype(jnp.float32)
    kp["wl"] = jnp.tile(wl, (B, 1))
    kp["bl"] = jnp.broadcast_to(p["lb"].reshape(1, 1), (1, OUT_LANES)).astype(jnp.float32)

    meta = (B, m1, c1, m2, rpt2, c2, m3, rpt3, c3)
    return kp, meta


# ----------------------------------------------------------------------------------
# Forward pass: one fused pallas_call, grid = (N // batch_tile,)
# ----------------------------------------------------------------------------------
@functools.partial(jax.jit, static_argnums=(2,))
def discriminator_forward(x_nchw, kp, meta):
    B, m1, c1, m2, rpt2, c2, m3, rpt3, c3 = meta
    k1p = kp["w1"].shape[0]

    x = x_nchw.astype(jnp.float32)
    n = x.shape[0]
    n_pad = (-n) % B
    if n_pad:
        x = jnp.pad(x, ((0, n_pad), (0, 0), (0, 0), (0, 0)))
    steps = (n + n_pad) // B

    # Layer-1 im2col stays on the XLA side: pure data movement on a ~32 KB tensor
    # (pad + 15 slices + concat fuse); the kernel never sees a K=4 / lane-4 operand.
    lhs1 = _im2col_stride2(x.transpose(0, 2, 3, 1))                     # (n', m1, KH*KW*Cin)
    lhs1 = jnp.pad(lhs1, ((0, 0), (0, 0), (0, k1p - lhs1.shape[2])))
    lhs1 = lhs1.reshape(steps, B * m1, k1p).astype(jnp.bfloat16)

    kernel = _make_disc_kernel(B, m1, c1, m2, rpt2, c2, m3, rpt3, c3)

    in_specs = [pl.BlockSpec((1, B * m1, k1p), lambda i: (i, 0, 0))]
    in_specs += [_full_spec(tuple(kp[name].shape)) for name in _PARAM_ORDER]

    def mm_flops(m, k, nn):
        return 2 * m * k * nn

    flops_step = (mm_flops(B * m1, k1p, c1) + mm_flops(B, B * m1, 2 * c1)
                  + mm_flops(NTAP * B * rpt2, B * m1, c1)
                  + mm_flops(B * rpt2, NTAP * c1, c2) + mm_flops(B, B * rpt2, 2 * c2)
                  + mm_flops(NTAP * B * rpt3, B * rpt2, c2)
                  + mm_flops(B * rpt3, NTAP * c2, c3) + mm_flops(B, B * rpt3, 2 * c3)
                  + mm_flops(B, B * rpt3, c3))
    bytes_in = (lhs1.size * lhs1.dtype.itemsize
                + sum(int(kp[nm].size) * kp[nm].dtype.itemsize for nm in _PARAM_ORDER))
    cost = pl.CostEstimate(flops=steps * flops_step,
                           transcendentals=steps * 3 * B,
                           bytes_accessed=bytes_in + steps * B * OUT_LANES * 4)

    out = pl.pallas_call(
        kernel,
        out_shape=jax.ShapeDtypeStruct((steps, B, OUT_LANES), jnp.float32),
        grid_spec=pltpu.PrefetchScalarGridSpec(
            num_scalar_prefetch=0,
            grid=(steps,),
            in_specs=in_specs,
            out_specs=pl.BlockSpec((1, B, OUT_LANES), lambda i: (i, 0, 0)),
            scratch_shapes=[pltpu.VMEM((B * rpt2, NTAP * c1), jnp.bfloat16),
                            pltpu.VMEM((B * rpt3, NTAP * c2), jnp.bfloat16)]),
        compiler_params=pltpu.CompilerParams(
            dimension_semantics=("parallel",)),
        cost_estimate=cost,
    )(lhs1, *[kp[name] for name in _PARAM_ORDER])
    return out.reshape(steps * B, OUT_LANES)[:n, :1]                    # (N, 1)


# ----------------------------------------------------------------------------------
# Parameter init in the original PyTorch layouts + pure-JAX reference
# ----------------------------------------------------------------------------------
def init_discriminator_params(key, frame_rate, channel_count, freq_bins):
    f1, r1 = _out_size(freq_bins, KH, SH, PH), _out_size(frame_rate, KW, SW, PW)
    f2, r2 = _out_size(f1, KH, SH, PH), _out_size(r1, KW, SW, PW)
    f3, r3 = _out_size(f2, KH, SH, PH), _out_size(r2, KW, SW, PW)
    ks = jax.random.split(key, 10)

    def conv_w(k, cout, cin):
        return jax.random.normal(k, (cout, cin, KH, KW), jnp.float32) * 0.05

    return {
        "w1": conv_w(ks[0], 64, channel_count),
        "g1": 1.0 + 0.1 * jax.random.normal(ks[1], (64, f1, r1), jnp.float32),
        "b1": 0.1 * jax.random.normal(ks[2], (64, f1, r1), jnp.float32),
        "w2": conv_w(ks[3], 128, 64),
        "g2": 1.0 + 0.1 * jax.random.normal(ks[4], (128, f2, r2), jnp.float32),
        "b2": 0.1 * jax.random.normal(ks[5], (128, f2, r2), jnp.float32),
        "w3": conv_w(ks[6], 128, 128),
        "g3": 1.0 + 0.1 * jax.random.normal(ks[7], (128, f3, r3), jnp.float32),
        "b3": 0.1 * jax.random.normal(ks[8], (128, f3, r3), jnp.float32),
        "lw": jax.random.normal(ks[9], (1, 128 * f3 * r3), jnp.float32) * 0.05,
        "lb": jnp.array([0.1], jnp.float32),
    }


def reference_forward(x, p):
    dn = ("NCHW", "OIHW", "NCHW")

    def conv(x, w):
        return lax.conv_general_dilated(x, w, (SH, SW), [(PH, PH), (PW, PW)],
                                        dimension_numbers=dn,
                                        precision=lax.Precision.HIGHEST)

    def ln_lrelu(x, g, b):
        mean = jnp.mean(x, axis=(1, 2, 3), keepdims=True)
        var = jnp.mean((x - mean) ** 2, axis=(1, 2, 3), keepdims=True)
        y = (x - mean) * lax.rsqrt(var + LN_EPS)
        y = y * g[None] + b[None]
        return jnp.where(y >= 0.0, y, LRELU_SLOPE * y)

    y = ln_lrelu(conv(x, p["w1"]), p["g1"], p["b1"])
    y = ln_lrelu(conv(y, p["w2"]), p["g2"], p["b2"])
    y = ln_lrelu(conv(y, p["w3"]), p["g3"], p["b3"])
    y = y.reshape(y.shape[0], -1)
    return jnp.dot(y, p["lw"].T, precision=lax.Precision.HIGHEST) + p["lb"]


if __name__ == "__main__":
    frame_rate = 16     # W
    freq_bins = 16      # H
    channel_count = 4   # C
    batch = 2

    key = jax.random.PRNGKey(0)
    kx, kparams_key = jax.random.split(key)
    x = jax.random.normal(kx, (batch, channel_count, freq_bins, frame_rate), jnp.float32)

    params = init_discriminator_params(kparams_key, frame_rate, channel_count, freq_bins)
    # batch_tile == batch: the whole batch is folded into one grid step (grid=(1,)).
    # Use batch_tile=1 to benchmark the one-sample-per-TensorCore variant on v7x.
    kparams, meta = prepare_kernel_params(params, batch_tile=batch)

    out = jax.block_until_ready(discriminator_forward(x, kparams, meta))       # (2, 1)

    ref = jax.block_until_ready(reference_forward(x, params))
    # bf16 MXU operands (adopted per the perf review) vs. an f32 HIGHEST reference:
    # per-element bf16 error (~4e-3) through three conv+LN stages lands the logits within
    # a few percent; accumulation stays f32, so the tolerance below has ample margin.
    np.testing.assert_allclose(np.asarray(out), np.asarray(ref), rtol=5e-2, atol=1e-1)

    print("KERNEL_OK")
</pallas_src>

<mosaic_0001>
module attributes {stable_mosaic.version = 11 : i64} {
  func.func @kernel(%arg0: i32, %arg1: memref<1x128x64xbf16, #tpu.memory_space<vmem>>, %arg2: memref<64x64xbf16, #tpu.memory_space<vmem>>, %arg3: memref<128x64xf32, #tpu.memory_space<vmem>>, %arg4: memref<128x64xf32, #tpu.memory_space<vmem>>, %arg5: memref<2x128xf32, #tpu.memory_space<vmem>>, %arg6: memref<480x128xbf16, #tpu.memory_space<vmem>>, %arg7: memref<960x128xbf16, #tpu.memory_space<vmem>>, %arg8: memref<32x128xf32, #tpu.memory_space<vmem>>, %arg9: memref<32x128xf32, #tpu.memory_space<vmem>>, %arg10: memref<2x32xf32, #tpu.memory_space<vmem>>, %arg11: memref<240x32xbf16, #tpu.memory_space<vmem>>, %arg12: memref<1920x128xbf16, #tpu.memory_space<vmem>>, %arg13: memref<16x128xf32, #tpu.memory_space<vmem>>, %arg14: memref<16x128xf32, #tpu.memory_space<vmem>>, %arg15: memref<2x16xf32, #tpu.memory_space<vmem>>, %arg16: memref<16x128xf32, #tpu.memory_space<vmem>>, %arg17: memref<1x128xf32, #tpu.memory_space<vmem>>, %arg18: memref<1x2x128xf32, #tpu.memory_space<vmem>>, %arg19: memref<32x960xbf16, #tpu.memory_space<vmem>>, %arg20: memref<16x1920xbf16, #tpu.memory_space<vmem>>) attributes {dimension_semantics = [#tpu.dimension_semantics<parallel>], iteration_bounds = array<i64: 1>, scalar_prefetch = 0 : i64, scratch_operands = 2 : i64, tpu.core_type = #tpu.core_type<tc>, window_params = [{transform_indices = @transform_0, window_bounds = array<i64: 1, 128, 64>}, {pipeline_mode = #tpu.pipeline_mode<synchronous>, transform_indices = @transform_1, window_bounds = array<i64: 64, 64>}, {pipeline_mode = #tpu.pipeline_mode<synchronous>, transform_indices = @transform_2, window_bounds = array<i64: 128, 64>}, {pipeline_mode = #tpu.pipeline_mode<synchronous>, transform_indices = @transform_3, window_bounds = array<i64: 128, 64>}, {pipeline_mode = #tpu.pipeline_mode<synchronous>, transform_indices = @transform_4, window_bounds = array<i64: 2, 128>}, {pipeline_mode = #tpu.pipeline_mode<synchronous>, transform_indices = @transform_5, window_bounds = array<i64: 480, 128>}, {pipeline_mode = #tpu.pipeline_mode<synchronous>, transform_indices = @transform_6, window_bounds = array<i64: 960, 128>}, {pipeline_mode = #tpu.pipeline_mode<synchronous>, transform_indices = @transform_7, window_bounds = array<i64: 32, 128>}, {pipeline_mode = #tpu.pipeline_mode<synchronous>, transform_indices = @transform_8, window_bounds = array<i64: 32, 128>}, {pipeline_mode = #tpu.pipeline_mode<synchronous>, transform_indices = @transform_9, window_bounds = array<i64: 2, 32>}, {pipeline_mode = #tpu.pipeline_mode<synchronous>, transform_indices = @transform_10, window_bounds = array<i64: 240, 32>}, {pipeline_mode = #tpu.pipeline_mode<synchronous>, transform_indices = @transform_11, window_bounds = array<i64: 1920, 128>}, {pipeline_mode = #tpu.pipeline_mode<synchronous>, transform_indices = @transform_12, window_bounds = array<i64: 16, 128>}, {pipeline_mode = #tpu.pipeline_mode<synchronous>, transform_indices = @transform_13, window_bounds = array<i64: 16, 128>}, {pipeline_mode = #tpu.pipeline_mode<synchronous>, transform_indices = @transform_14, window_bounds = array<i64: 2, 16>}, {pipeline_mode = #tpu.pipeline_mode<synchronous>, transform_indices = @transform_15, window_bounds = array<i64: 16, 128>}, {pipeline_mode = #tpu.pipeline_mode<synchronous>, transform_indices = @transform_16, window_bounds = array<i64: 1, 128>}, {transform_indices = @transform_17, window_bounds = array<i64: 1, 2, 128>}]} {
    %c0 = arith.constant 0 : index
    %c0_0 = arith.constant 0 : index
    %c0_1 = arith.constant 0 : index
    %0 = vector.load %arg1[%c0, %c0_0, %c0_1] : memref<1x128x64xbf16, #tpu.memory_space<vmem>>, vector<1x128x64xbf16>
    %1 = vector.shape_cast %0 : vector<1x128x64xbf16> to vector<128x64xbf16>
    %c0_2 = arith.constant 0 : index
    %c0_3 = arith.constant 0 : index
    %2 = vector.load %arg2[%c0_2, %c0_3] : memref<64x64xbf16, #tpu.memory_space<vmem>>, vector<64x64xbf16>
    %cst = arith.constant dense<0.000000e+00> : vector<128x64xf32>
    %3 = tpu.matmul %1, %2, %cst {dimension_numbers = #tpu.dot_dimension_numbers<[1], [0], [0], [1], [0, 0, 1, 1], [], []>} : vector<128x64xbf16>, vector<64x64xbf16>, vector<128x64xf32> -> vector<128x64xf32>
    %c0_4 = arith.constant 0 : index
    %c0_5 = arith.constant 0 : index
    %4 = vector.load %arg5[%c0_4, %c0_5] : memref<2x128xf32, #tpu.memory_space<vmem>>, vector<2x128xf32>
    %c0_6 = arith.constant 0 : index
    %c0_7 = arith.constant 0 : index
    %5 = vector.load %arg3[%c0_6, %c0_7] : memref<128x64xf32, #tpu.memory_space<vmem>>, vector<128x64xf32>
    %c0_8 = arith.constant 0 : index
    %c0_9 = arith.constant 0 : index
    %6 = vector.load %arg4[%c0_8, %c0_9] : memref<128x64xf32, #tpu.memory_space<vmem>>, vector<128x64xf32>
    %7 = arith.mulf %3, %3 : vector<128x64xf32>
    %8 = tpu.concatenate %3, %7 in 1 : vector<128x64xf32>, vector<128x64xf32> -> vector<128x128xf32>
    %cst_10 = arith.constant dense<0.000000e+00> : vector<2x128xf32>
    %9 = tpu.matmul %4, %8, %cst_10 {dimension_numbers = #tpu.dot_dimension_numbers<[1], [0], [0], [1], [0, 0, 1, 1], [], []>} : vector<2x128xf32>, vector<128x128xf32>, vector<2x128xf32> -> vector<2x128xf32>
    %10 = vector.extract_strided_slice %9 {offsets = [0, 0], sizes = [2, 64], strides = [1, 1]} : vector<2x128xf32> to vector<2x64xf32>
    %cst_11 = arith.constant dense<0.000000e+00> : vector<2xf32>
    %11 = vector.multi_reduction <add>, %10, %cst_11 [1] : vector<2x64xf32> to vector<2xf32>
    %12 = vector.shape_cast %11 : vector<2xf32> to vector<2x1xf32>
    %cst_12 = arith.constant 2.44140625E-4 : f32
    %13 = vector.broadcast %cst_12 : f32 to vector<2x1xf32>
    %14 = arith.mulf %12, %13 : vector<2x1xf32>
    %15 = vector.extract_strided_slice %9 {offsets = [0, 64], sizes = [2, 64], strides = [1, 1]} : vector<2x128xf32> to vector<2x64xf32>
    %cst_13 = arith.constant dense<0.000000e+00> : vector<2xf32>
    %16 = vector.multi_reduction <add>, %15, %cst_13 [1] : vector<2x64xf32> to vector<2xf32>
    %17 = vector.shape_cast %16 : vector<2xf32> to vector<2x1xf32>
    %cst_14 = arith.constant 2.44140625E-4 : f32
    %18 = vector.broadcast %cst_14 : f32 to vector<2x1xf32>
    %19 = arith.mulf %17, %18 : vector<2x1xf32>
    %20 = arith.mulf %14, %14 : vector<2x1xf32>
    %21 = arith.subf %19, %20 : vector<2x1xf32>
    %cst_15 = arith.constant 9.99999974E-6 : f32
    %22 = vector.broadcast %cst_15 : f32 to vector<2x1xf32>
    %23 = arith.addf %21, %22 : vector<2x1xf32>
    %24 = math.rsqrt %23 : vector<2x1xf32>
    %25 = tpu.concatenate %14, %24 in 1 : vector<2x1xf32>, vector<2x1xf32> -> vector<2x2xf32>
    %26 = vector.extract_strided_slice %25 {offsets = [0, 0], sizes = [1, 2], strides = [1, 1]} : vector<2x2xf32> to vector<1x2xf32>
    %27 = vector.shape_cast %26 : vector<1x2xf32> to vector<1x2xf32>
    %28 = vector.broadcast %27 : vector<1x2xf32> to vector<64x2xf32>
    %29 = vector.extract_strided_slice %25 {offsets = [1, 0], sizes = [1, 2], strides = [1, 1]} : vector<2x2xf32> to vector<1x2xf32>
    %30 = vector.shape_cast %29 : vector<1x2xf32> to vector<1x2xf32>
    %31 = vector.broadcast %30 : vector<1x2xf32> to vector<64x2xf32>
    %32 = tpu.concatenate %28, %31 in 0 : vector<64x2xf32>, vector<64x2xf32> -> vector<128x2xf32>
    %33 = vector.extract_strided_slice %32 {offsets = [0, 0], sizes = [128, 1], strides = [1, 1]} : vector<128x2xf32> to vector<128x1xf32>
    %34 = vector.broadcast %33 : vector<128x1xf32> to vector<128x64xf32>
    %35 = arith.subf %3, %34 : vector<128x64xf32>
    %36 = vector.extract_strided_slice %32 {offsets = [0, 1], sizes = [128, 1], strides = [1, 1]} : vector<128x2xf32> to vector<128x1xf32>
    %37 = vector.broadcast %36 : vector<128x1xf32> to vector<128x64xf32>
    %38 = arith.mulf %35, %37 : vector<128x64xf32>
    %39 = arith.mulf %38, %5 : vector<128x64xf32>
    %40 = arith.addf %39, %6 : vector<128x64xf32>
    %cst_16 = arith.constant 0.000000e+00 : f32
    %41 = vector.broadcast %cst_16 : f32 to vector<128x64xf32>
    %42 = arith.cmpf oge, %40, %41 : vector<128x64xf32>
    %cst_17 = arith.constant 3.000000e-01 : f32
    %43 = vector.broadcast %cst_17 : f32 to vector<128x64xf32>
    %44 = arith.mulf %43, %40 : vector<128x64xf32>
    %45 = arith.select %42, %40, %44 : vector<128x64xi1>, vector<128x64xf32>
    %c0_18 = arith.constant 0 : index
    %c0_19 = arith.constant 0 : index
    %46 = vector.load %arg6[%c0_18, %c0_19] : memref<480x128xbf16, #tpu.memory_space<vmem>>, vector<480x128xbf16>
    %47 = arith.truncf %45 : vector<128x64xf32> to vector<128x64xbf16>
    %cst_20 = arith.constant dense<0.000000e+00> : vector<480x64xf32>
    %48 = tpu.matmul %46, %47, %cst_20 {dimension_numbers = #tpu.dot_dimension_numbers<[1], [0], [0], [1], [0, 0, 1, 1], [], []>} : vector<480x128xbf16>, vector<128x64xbf16>, vector<480x64xf32> -> vector<480x64xf32>
    %49 = arith.truncf %48 : vector<480x64xf32> to vector<480x64xbf16>
    %50 = vector.extract_strided_slice %49 {offsets = [0, 0], sizes = [32, 64], strides = [1, 1]} : vector<480x64xbf16> to vector<32x64xbf16>
    %c0_21 = arith.constant 0 : index
    %c0_22 = arith.constant 0 : index
    %51 = vector.load %arg19[%c0_21, %c0_22] : memref<32x960xbf16, #tpu.memory_space<vmem>>, vector<32x64xbf16>
    tpu.vector_store %arg19[%c0_21, %c0_22], %50 {strides = array<i32>} : memref<32x960xbf16, #tpu.memory_space<vmem>>, vector<32x64xbf16>,
    %52 = vector.extract_strided_slice %49 {offsets = [32, 0], sizes = [32, 64], strides = [1, 1]} : vector<480x64xbf16> to vector<32x64xbf16>
    %c0_23 = arith.constant 0 : index
    %c64 = arith.constant 64 : index
    %53 = vector.load %arg19[%c0_23, %c64] : memref<32x960xbf16, #tpu.memory_space<vmem>>, vector<32x64xbf16>
    tpu.vector_store %arg19[%c0_23, %c64], %52 {strides = array<i32>} : memref<32x960xbf16, #tpu.memory_space<vmem>>, vector<32x64xbf16>,
    %54 = vector.extract_strided_slice %49 {offsets = [64, 0], sizes = [32, 64], strides = [1, 1]} : vector<480x64xbf16> to vector<32x64xbf16>
    %c0_24 = arith.constant 0 : index
    %c128 = arith.constant 128 : index
    %55 = vector.load %arg19[%c0_24, %c128] : memref<32x960xbf16, #tpu.memory_space<vmem>>, vector<32x64xbf16>
    tpu.vector_store %arg19[%c0_24, %c128], %54 {strides = array<i32>} : memref<32x960xbf16, #tpu.memory_space<vmem>>, vector<32x64xbf16>,
    %56 = vector.extract_strided_slice %49 {offsets = [96, 0], sizes = [32, 64], strides = [1, 1]} : vector<480x64xbf16> to vector<32x64xbf16>
    %c0_25 = arith.constant 0 : index
    %c192 = arith.constant 192 : index
    %57 = vector.load %arg19[%c0_25, %c192] : memref<32x960xbf16, #tpu.memory_space<vmem>>, vector<32x64xbf16>
    tpu.vector_store %arg19[%c0_25, %c192], %56 {strides = array<i32>} : memref<32x960xbf16, #tpu.memory_space<vmem>>, vector<32x64xbf16>,
    %58 = vector.extract_strided_slice %49 {offsets = [128, 0], sizes = [32, 64], strides = [1, 1]} : vector<480x64xbf16> to vector<32x64xbf16>
    %c0_26 = arith.constant 0 : index
    %c256 = arith.constant 256 : index
    %59 = vector.load %arg19[%c0_26, %c256] : memref<32x960xbf16, #tpu.memory_space<vmem>>, vector<32x64xbf16>
    tpu.vector_store %arg19[%c0_26, %c256], %58 {strides = array<i32>} : memref<32x960xbf16, #tpu.memory_space<vmem>>, vector<32x64xbf16>,
    %60 = vector.extract_strided_slice %49 {offsets = [160, 0], sizes = [32, 64], strides = [1, 1]} : vector<480x64xbf16> to vector<32x64xbf16>
    %c0_27 = arith.constant 0 : index
    %c320 = arith.constant 320 : index
    %61 = vector.load %arg19[%c0_27, %c320] : memref<32x960xbf16, #tpu.memory_space<vmem>>, vector<32x64xbf16>
    tpu.vector_store %arg19[%c0_27, %c320], %60 {strides = array<i32>} : memref<32x960xbf16, #tpu.memory_space<vmem>>, vector<32x64xbf16>,
    %62 = vector.extract_strided_slice %49 {offsets = [192, 0], sizes = [32, 64], strides = [1, 1]} : vector<480x64xbf16> to vector<32x64xbf16>
    %c0_28 = arith.constant 0 : index
    %c384 = arith.constant 384 : index
    %63 = vector.load %arg19[%c0_28, %c384] : memref<32x960xbf16, #tpu.memory_space<vmem>>, vector<32x64xbf16>
    tpu.vector_store %arg19[%c0_28, %c384], %62 {strides = array<i32>} : memref<32x960xbf16, #tpu.memory_space<vmem>>, vector<32x64xbf16>,
    %64 = vector.extract_strided_slice %49 {offsets = [224, 0], sizes = [32, 64], strides = [1, 1]} : vector<480x64xbf16> to vector<32x64xbf16>
    %c0_29 = arith.constant 0 : index
    %c448 = arith.constant 448 : index
    %65 = vector.load %arg19[%c0_29, %c448] : memref<32x960xbf16, #tpu.memory_space<vmem>>, vector<32x64xbf16>
    tpu.vector_store %arg19[%c0_29, %c448], %64 {strides = array<i32>} : memref<32x960xbf16, #tpu.memory_space<vmem>>, vector<32x64xbf16>,
    %66 = vector.extract_strided_slice %49 {offsets = [256, 0], sizes = [32, 64], strides = [1, 1]} : vector<480x64xbf16> to vector<32x64xbf16>
    %c0_30 = arith.constant 0 : index
    %c512 = arith.constant 512 : index
    %67 = vector.load %arg19[%c0_30, %c512] : memref<32x960xbf16, #tpu.memory_space<vmem>>, vector<32x64xbf16>
    tpu.vector_store %arg19[%c0_30, %c512], %66 {strides = array<i32>} : memref<32x960xbf16, #tpu.memory_space<vmem>>, vector<32x64xbf16>,
    %68 = vector.extract_strided_slice %49 {offsets = [288, 0], sizes = [32, 64], strides = [1, 1]} : vector<480x64xbf16> to vector<32x64xbf16>
    %c0_31 = arith.constant 0 : index
    %c576 = arith.constant 576 : index
    %69 = vector.load %arg19[%c0_31, %c576] : memref<32x960xbf16, #tpu.memory_space<vmem>>, vector<32x64xbf16>
    tpu.vector_store %arg19[%c0_31, %c576], %68 {strides = array<i32>} : memref<32x960xbf16, #tpu.memory_space<vmem>>, vector<32x64xbf16>,
    %70 = vector.extract_strided_slice %49 {offsets = [320, 0], sizes = [32, 64], strides = [1, 1]} : vector<480x64xbf16> to vector<32x64xbf16>
    %c0_32 = arith.constant 0 : index
    %c640 = arith.constant 640 : index
    %71 = vector.load %arg19[%c0_32, %c640] : memref<32x960xbf16, #tpu.memory_space<vmem>>, vector<32x64xbf16>
    tpu.vector_store %arg19[%c0_32, %c640], %70 {strides = array<i32>} : memref<32x960xbf16, #tpu.memory_space<vmem>>, vector<32x64xbf16>,
    %72 = vector.extract_strided_slice %49 {offsets = [352, 0], sizes = [32, 64], strides = [1, 1]} : vector<480x64xbf16> to vector<32x64xbf16>
    %c0_33 = arith.constant 0 : index
    %c704 = arith.constant 704 : index
    %73 = vector.load %arg19[%c0_33, %c704] : memref<32x960xbf16, #tpu.memory_space<vmem>>, vector<32x64xbf16>
    tpu.vector_store %arg19[%c0_33, %c704], %72 {strides = array<i32>} : memref<32x960xbf16, #tpu.memory_space<vmem>>, vector<32x64xbf16>,
    %74 = vector.extract_strided_slice %49 {offsets = [384, 0], sizes = [32, 64], strides = [1, 1]} : vector<480x64xbf16> to vector<32x64xbf16>
    %c0_34 = arith.constant 0 : index
    %c768 = arith.constant 768 : index
    %75 = vector.load %arg19[%c0_34, %c768] : memref<32x960xbf16, #tpu.memory_space<vmem>>, vector<32x64xbf16>
    tpu.vector_store %arg19[%c0_34, %c768], %74 {strides = array<i32>} : memref<32x960xbf16, #tpu.memory_space<vmem>>, vector<32x64xbf16>,
    %76 = vector.extract_strided_slice %49 {offsets = [416, 0], sizes = [32, 64], strides = [1, 1]} : vector<480x64xbf16> to vector<32x64xbf16>
    %c0_35 = arith.constant 0 : index
    %c832 = arith.constant 832 : index
    %77 = vector.load %arg19[%c0_35, %c832] : memref<32x960xbf16, #tpu.memory_space<vmem>>, vector<32x64xbf16>
    tpu.vector_store %arg19[%c0_35, %c832], %76 {strides = array<i32>} : memref<32x960xbf16, #tpu.memory_space<vmem>>, vector<32x64xbf16>,
    %78 = vector.extract_strided_slice %49 {offsets = [448, 0], sizes = [32, 64], strides = [1, 1]} : vector<480x64xbf16> to vector<32x64xbf16>
    %c0_36 = arith.constant 0 : index
    %c896 = arith.constant 896 : index
    %79 = vector.load %arg19[%c0_36, %c896] : memref<32x960xbf16, #tpu.memory_space<vmem>>, vector<32x64xbf16>
    tpu.vector_store %arg19[%c0_36, %c896], %78 {strides = array<i32>} : memref<32x960xbf16, #tpu.memory_space<vmem>>, vector<32x64xbf16>,
    %c0_37 = arith.constant 0 : index
    %c0_38 = arith.constant 0 : index
    %80 = vector.load %arg19[%c0_37, %c0_38] : memref<32x960xbf16, #tpu.memory_space<vmem>>, vector<32x960xbf16>
    %c0_39 = arith.constant 0 : index
    %c0_40 = arith.constant 0 : index
    %81 = vector.load %arg7[%c0_39, %c0_40] : memref<960x128xbf16, #tpu.memory_space<vmem>>, vector<960x128xbf16>
    %cst_41 = arith.constant dense<0.000000e+00> : vector<32x128xf32>
    %82 = tpu.matmul %80, %81, %cst_41 {dimension_numbers = #tpu.dot_dimension_numbers<[1], [0], [0], [1], [0, 0, 1, 1], [], []>} : vector<32x960xbf16>, vector<960x128xbf16>, vector<32x128xf32> -> vector<32x128xf32>
    %c0_42 = arith.constant 0 : index
    %c0_43 = arith.constant 0 : index
    %83 = vector.load %arg10[%c0_42, %c0_43] : memref<2x32xf32, #tpu.memory_space<vmem>>, vector<2x32xf32>
    %c0_44 = arith.constant 0 : index
    %c0_45 = arith.constant 0 : index
    %84 = vector.load %arg8[%c0_44, %c0_45] : memref<32x128xf32, #tpu.memory_space<vmem>>, vector<32x128xf32>
    %c0_46 = arith.constant 0 : index
    %c0_47 = arith.constant 0 : index
    %85 = vector.load %arg9[%c0_46, %c0_47] : memref<32x128xf32, #tpu.memory_space<vmem>>, vector<32x128xf32>
    %86 = arith.mulf %82, %82 : vector<32x128xf32>
    %87 = tpu.concatenate %82, %86 in 1 : vector<32x128xf32>, vector<32x128xf32> -> vector<32x256xf32>
    %cst_48 = arith.constant dense<0.000000e+00> : vector<2x256xf32>
    %88 = tpu.matmul %83, %87, %cst_48 {dimension_numbers = #tpu.dot_dimension_numbers<[1], [0], [0], [1], [0, 0, 1, 1], [], []>} : vector<2x32xf32>, vector<32x256xf32>, vector<2x256xf32> -> vector<2x256xf32>
    %89 = vector.extract_strided_slice %88 {offsets = [0, 0], sizes = [2, 128], strides = [1, 1]} : vector<2x256xf32> to vector<2x128xf32>
    %cst_49 = arith.constant dense<0.000000e+00> : vector<2xf32>
    %90 = vector.multi_reduction <add>, %89, %cst_49 [1] : vector<2x128xf32> to vector<2xf32>
    %91 = vector.shape_cast %90 : vector<2xf32> to vector<2x1xf32>
    %cst_50 = arith.constant 4.8828125E-4 : f32
    %92 = vector.broadcast %cst_50 : f32 to vector<2x1xf32>
    %93 = arith.mulf %91, %92 : vector<2x1xf32>
    %94 = vector.extract_strided_slice %88 {offsets = [0, 128], sizes = [2, 128], strides = [1, 1]} : vector<2x256xf32> to vector<2x128xf32>
    %cst_51 = arith.constant dense<0.000000e+00> : vector<2xf32>
    %95 = vector.multi_reduction <add>, %94, %cst_51 [1] : vector<2x128xf32> to vector<2xf32>
    %96 = vector.shape_cast %95 : vector<2xf32> to vector<2x1xf32>
    %cst_52 = arith.constant 4.8828125E-4 : f32
    %97 = vector.broadcast %cst_52 : f32 to vector<2x1xf32>
    %98 = arith.mulf %96, %97 : vector<2x1xf32>
    %99 = arith.mulf %93, %93 : vector<2x1xf32>
    %100 = arith.subf %98, %99 : vector<2x1xf32>
    %cst_53 = arith.constant 9.99999974E-6 : f32
    %101 = vector.broadcast %cst_53 : f32 to vector<2x1xf32>
    %102 = arith.addf %100, %101 : vector<2x1xf32>
    %103 = math.rsqrt %102 : vector<2x1xf32>
    %104 = tpu.concatenate %93, %103 in 1 : vector<2x1xf32>, vector<2x1xf32> -> vector<2x2xf32>
    %105 = vector.extract_strided_slice %104 {offsets = [0, 0], sizes = [1, 2], strides = [1, 1]} : vector<2x2xf32> to vector<1x2xf32>
    %106 = vector.shape_cast %105 : vector<1x2xf32> to vector<1x2xf32>
    %107 = vector.broadcast %106 : vector<1x2xf32> to vector<16x2xf32>
    %108 = vector.extract_strided_slice %104 {offsets = [1, 0], sizes = [1, 2], strides = [1, 1]} : vector<2x2xf32> to vector<1x2xf32>
    %109 = vector.shape_cast %108 : vector<1x2xf32> to vector<1x2xf32>
    %110 = vector.broadcast %109 : vector<1x2xf32> to vector<16x2xf32>
    %111 = tpu.concatenate %107, %110 in 0 : vector<16x2xf32>, vector<16x2xf32> -> vector<32x2xf32>
    %112 = vector.extract_strided_slice %111 {offsets = [0, 0], sizes = [32, 1], strides = [1, 1]} : vector<32x2xf32> to vector<32x1xf32>
    %113 = vector.broadcast %112 : vector<32x1xf32> to vector<32x128xf32>
    %114 = arith.subf %82, %113 : vector<32x128xf32>
    %115 = vector.extract_strided_slice %111 {offsets = [0, 1], sizes = [32, 1], strides = [1, 1]} : vector<32x2xf32> to vector<32x1xf32>
    %116 = vector.broadcast %115 : vector<32x1xf32> to vector<32x128xf32>
    %117 = arith.mulf %114, %116 : vector<32x128xf32>
    %118 = arith.mulf %117, %84 : vector<32x128xf32>
    %119 = arith.addf %118, %85 : vector<32x128xf32>
    %cst_54 = arith.constant 0.000000e+00 : f32
    %120 = vector.broadcast %cst_54 : f32 to vector<32x128xf32>
    %121 = arith.cmpf oge, %119, %120 : vector<32x128xf32>
    %cst_55 = arith.constant 3.000000e-01 : f32
    %122 = vector.broadcast %cst_55 : f32 to vector<32x128xf32>
    %123 = arith.mulf %122, %119 : vector<32x128xf32>
    %124 = arith.select %121, %119, %123 : vector<32x128xi1>, vector<32x128xf32>
    %c0_56 = arith.constant 0 : index
    %c0_57 = arith.constant 0 : index
    %125 = vector.load %arg11[%c0_56, %c0_57] : memref<240x32xbf16, #tpu.memory_space<vmem>>, vector<240x32xbf16>
    %126 = arith.truncf %124 : vector<32x128xf32> to vector<32x128xbf16>
    %cst_58 = arith.constant dense<0.000000e+00> : vector<240x128xf32>
    %127 = tpu.matmul %125, %126, %cst_58 {dimension_numbers = #tpu.dot_dimension_numbers<[1], [0], [0], [1], [0, 0, 1, 1], [], []>} : vector<240x32xbf16>, vector<32x128xbf16>, vector<240x128xf32> -> vector<240x128xf32>
    %128 = arith.truncf %127 : vector<240x128xf32> to vector<240x128xbf16>
    %129 = vector.extract_strided_slice %128 {offsets = [0, 0], sizes = [16, 128], strides = [1, 1]} : vector<240x128xbf16> to vector<16x128xbf16>
    %c0_59 = arith.constant 0 : index
    %c0_60 = arith.constant 0 : index
    %130 = vector.load %arg20[%c0_59, %c0_60] : memref<16x1920xbf16, #tpu.memory_space<vmem>>, vector<16x128xbf16>
    tpu.vector_store %arg20[%c0_59, %c0_60], %129 {strides = array<i32>} : memref<16x1920xbf16, #tpu.memory_space<vmem>>, vector<16x128xbf16>,
    %131 = vector.extract_strided_slice %128 {offsets = [16, 0], sizes = [16, 128], strides = [1, 1]} : vector<240x128xbf16> to vector<16x128xbf16>
    %c0_61 = arith.constant 0 : index
    %c128_62 = arith.constant 128 : index
    %132 = vector.load %arg20[%c0_61, %c128_62] : memref<16x1920xbf16, #tpu.memory_space<vmem>>, vector<16x128xbf16>
    tpu.vector_store %arg20[%c0_61, %c128_62], %131 {strides = array<i32>} : memref<16x1920xbf16, #tpu.memory_space<vmem>>, vector<16x128xbf16>,
    %133 = vector.extract_strided_slice %128 {offsets = [32, 0], sizes = [16, 128], strides = [1, 1]} : vector<240x128xbf16> to vector<16x128xbf16>
    %c0_63 = arith.constant 0 : index
    %c256_64 = arith.constant 256 : index
    %134 = vector.load %arg20[%c0_63, %c256_64] : memref<16x1920xbf16, #tpu.memory_space<vmem>>, vector<16x128xbf16>
    tpu.vector_store %arg20[%c0_63, %c256_64], %133 {strides = array<i32>} : memref<16x1920xbf16, #tpu.memory_space<vmem>>, vector<16x128xbf16>,
    %135 = vector.extract_strided_slice %128 {offsets = [48, 0], sizes = [16, 128], strides = [1, 1]} : vector<240x128xbf16> to vector<16x128xbf16>
    %c0_65 = arith.constant 0 : index
    %c384_66 = arith.constant 384 : index
    %136 = vector.load %arg20[%c0_65, %c384_66] : memref<16x1920xbf16, #tpu.memory_space<vmem>>, vector<16x128xbf16>
    tpu.vector_store %arg20[%c0_65, %c384_66], %135 {strides = array<i32>} : memref<16x1920xbf16, #tpu.memory_space<vmem>>, vector<16x128xbf16>,
    %137 = vector.extract_strided_slice %128 {offsets = [64, 0], sizes = [16, 128], strides = [1, 1]} : vector<240x128xbf16> to vector<16x128xbf16>
    %c0_67 = arith.constant 0 : index
    %c512_68 = arith.constant 512 : index
    %138 = vector.load %arg20[%c0_67, %c512_68] : memref<16x1920xbf16, #tpu.memory_space<vmem>>, vector<16x128xbf16>
    tpu.vector_store %arg20[%c0_67, %c512_68], %137 {strides = array<i32>} : memref<16x1920xbf16, #tpu.memory_space<vmem>>, vector<16x128xbf16>,
    %139 = vector.extract_strided_slice %128 {offsets = [80, 0], sizes = [16, 128], strides = [1, 1]} : vector<240x128xbf16> to vector<16x128xbf16>
    %c0_69 = arith.constant 0 : index
    %c640_70 = arith.constant 640 : index
    %140 = vector.load %arg20[%c0_69, %c640_70] : memref<16x1920xbf16, #tpu.memory_space<vmem>>, vector<16x128xbf16>
    tpu.vector_store %arg20[%c0_69, %c640_70], %139 {strides = array<i32>} : memref<16x1920xbf16, #tpu.memory_space<vmem>>, vector<16x128xbf16>,
    %141 = vector.extract_strided_slice %128 {offsets = [96, 0], sizes = [16, 128], strides = [1, 1]} : vector<240x128xbf16> to vector<16x128xbf16>
    %c0_71 = arith.constant 0 : index
    %c768_72 = arith.constant 768 : index
    %142 = vector.load %arg20[%c0_71, %c768_72] : memref<16x1920xbf16, #tpu.memory_space<vmem>>, vector<16x128xbf16>
    tpu.vector_store %arg20[%c0_71, %c768_72], %141 {strides = array<i32>} : memref<16x1920xbf16, #tpu.memory_space<vmem>>, vector<16x128xbf16>,
    %143 = vector.extract_strided_slice %128 {offsets = [112, 0], sizes = [16, 128], strides = [1, 1]} : vector<240x128xbf16> to vector<16x128xbf16>
    %c0_73 = arith.constant 0 : index
    %c896_74 = arith.constant 896 : index
    %144 = vector.load %arg20[%c0_73, %c896_74] : memref<16x1920xbf16, #tpu.memory_space<vmem>>, vector<16x128xbf16>
    tpu.vector_store %arg20[%c0_73, %c896_74], %143 {strides = array<i32>} : memref<16x1920xbf16, #tpu.memory_space<vmem>>, vector<16x128xbf16>,
    %145 = vector.extract_strided_slice %128 {offsets = [128, 0], sizes = [16, 128], strides = [1, 1]} : vector<240x128xbf16> to vector<16x128xbf16>
    %c0_75 = arith.constant 0 : index
    %c1024 = arith.constant 1024 : index
    %146 = vector.load %arg20[%c0_75, %c1024] : memref<16x1920xbf16, #tpu.memory_space<vmem>>, vector<16x128xbf16>
    tpu.vector_store %arg20[%c0_75, %c1024], %145 {strides = array<i32>} : memref<16x1920xbf16, #tpu.memory_space<vmem>>, vector<16x128xbf16>,
    %147 = vector.extract_strided_slice %128 {offsets = [144, 0], sizes = [16, 128], strides = [1, 1]} : vector<240x128xbf16> to vector<16x128xbf16>
    %c0_76 = arith.constant 0 : index
    %c1152 = arith.constant 1152 : index
    %148 = vector.load %arg20[%c0_76, %c1152] : memref<16x1920xbf16, #tpu.memory_space<vmem>>, vector<16x128xbf16>
    tpu.vector_store %arg20[%c0_76, %c1152], %147 {strides = array<i32>} : memref<16x1920xbf16, #tpu.memory_space<vmem>>, vector<16x128xbf16>,
    %149 = vector.extract_strided_slice %128 {offsets = [160, 0], sizes = [16, 128], strides = [1, 1]} : vector<240x128xbf16> to vector<16x128xbf16>
    %c0_77 = arith.constant 0 : index
    %c1280 = arith.constant 1280 : index
    %150 = vector.load %arg20[%c0_77, %c1280] : memref<16x1920xbf16, #tpu.memory_space<vmem>>, vector<16x128xbf16>
    tpu.vector_store %arg20[%c0_77, %c1280], %149 {strides = array<i32>} : memref<16x1920xbf16, #tpu.memory_space<vmem>>, vector<16x128xbf16>,
    %151 = vector.extract_strided_slice %128 {offsets = [176, 0], sizes = [16, 128], strides = [1, 1]} : vector<240x128xbf16> to vector<16x128xbf16>
    %c0_78 = arith.constant 0 : index
    %c1408 = arith.constant 1408 : index
    %152 = vector.load %arg20[%c0_78, %c1408] : memref<16x1920xbf16, #tpu.memory_space<vmem>>, vector<16x128xbf16>
    tpu.vector_store %arg20[%c0_78, %c1408], %151 {strides = array<i32>} : memref<16x1920xbf16, #tpu.memory_space<vmem>>, vector<16x128xbf16>,
    %153 = vector.extract_strided_slice %128 {offsets = [192, 0], sizes = [16, 128], strides = [1, 1]} : vector<240x128xbf16> to vector<16x128xbf16>
    %c0_79 = arith.constant 0 : index
    %c1536 = arith.constant 1536 : index
    %154 = vector.load %arg20[%c0_79, %c1536] : memref<16x1920xbf16, #tpu.memory_space<vmem>>, vector<16x128xbf16>
    tpu.vector_store %arg20[%c0_79, %c1536], %153 {strides = array<i32>} : memref<16x1920xbf16, #tpu.memory_space<vmem>>, vector<16x128xbf16>,
    %155 = vector.extract_strided_slice %128 {offsets = [208, 0], sizes = [16, 128], strides = [1, 1]} : vector<240x128xbf16> to vector<16x128xbf16>
    %c0_80 = arith.constant 0 : index
    %c1664 = arith.constant 1664 : index
    %156 = vector.load %arg20[%c0_80, %c1664] : memref<16x1920xbf16, #tpu.memory_space<vmem>>, vector<16x128xbf16>
    tpu.vector_store %arg20[%c0_80, %c1664], %155 {strides = array<i32>} : memref<16x1920xbf16, #tpu.memory_space<vmem>>, vector<16x128xbf16>,
    %157 = vector.extract_strided_slice %128 {offsets = [224, 0], sizes = [16, 128], strides = [1, 1]} : vector<240x128xbf16> to vector<16x128xbf16>
    %c0_81 = arith.constant 0 : index
    %c1792 = arith.constant 1792 : index
    %158 = vector.load %arg20[%c0_81, %c1792] : memref<16x1920xbf16, #tpu.memory_space<vmem>>, vector<16x128xbf16>
    tpu.vector_store %arg20[%c0_81, %c1792], %157 {strides = array<i32>} : memref<16x1920xbf16, #tpu.memory_space<vmem>>, vector<16x128xbf16>,
    %c0_82 = arith.constant 0 : index
    %c0_83 = arith.constant 0 : index
    %159 = vector.load %arg20[%c0_82, %c0_83] : memref<16x1920xbf16, #tpu.memory_space<vmem>>, vector<16x1920xbf16>
    %c0_84 = arith.constant 0 : index
    %c0_85 = arith.constant 0 : index
    %160 = vector.load %arg12[%c0_84, %c0_85] : memref<1920x128xbf16, #tpu.memory_space<vmem>>, vector<1920x128xbf16>
    %cst_86 = arith.constant dense<0.000000e+00> : vector<16x128xf32>
    %161 = tpu.matmul %159, %160, %cst_86 {dimension_numbers = #tpu.dot_dimension_numbers<[1], [0], [0], [1], [0, 0, 1, 1], [], []>} : vector<16x1920xbf16>, vector<1920x128xbf16>, vector<16x128xf32> -> vector<16x128xf32>
    %c0_87 = arith.constant 0 : index
    %c0_88 = arith.constant 0 : index
    %162 = vector.load %arg15[%c0_87, %c0_88] : memref<2x16xf32, #tpu.memory_space<vmem>>, vector<2x16xf32>
    %c0_89 = arith.constant 0 : index
    %c0_90 = arith.constant 0 : index
    %163 = vector.load %arg13[%c0_89, %c0_90] : memref<16x128xf32, #tpu.memory_space<vmem>>, vector<16x128xf32>
    %c0_91 = arith.constant 0 : index
    %c0_92 = arith.constant 0 : index
    %164 = vector.load %arg14[%c0_91, %c0_92] : memref<16x128xf32, #tpu.memory_space<vmem>>, vector<16x128xf32>
    %165 = arith.mulf %161, %161 : vector<16x128xf32>
    %166 = tpu.concatenate %161, %165 in 1 : vector<16x128xf32>, vector<16x128xf32> -> vector<16x256xf32>
    %cst_93 = arith.constant dense<0.000000e+00> : vector<2x256xf32>
    %167 = tpu.matmul %162, %166, %cst_93 {dimension_numbers = #tpu.dot_dimension_numbers<[1], [0], [0], [1], [0, 0, 1, 1], [], []>} : vector<2x16xf32>, vector<16x256xf32>, vector<2x256xf32> -> vector<2x256xf32>
    %168 = vector.extract_strided_slice %167 {offsets = [0, 0], sizes = [2, 128], strides = [1, 1]} : vector<2x256xf32> to vector<2x128xf32>
    %cst_94 = arith.constant dense<0.000000e+00> : vector<2xf32>
    %169 = vector.multi_reduction <add>, %168, %cst_94 [1] : vector<2x128xf32> to vector<2xf32>
    %170 = vector.shape_cast %169 : vector<2xf32> to vector<2x1xf32>
    %cst_95 = arith.constant 0.001953125 : f32
    %171 = vector.broadcast %cst_95 : f32 to vector<2x1xf32>
    %172 = arith.mulf %170, %171 : vector<2x1xf32>
    %173 = vector.extract_strided_slice %167 {offsets = [0, 128], sizes = [2, 128], strides = [1, 1]} : vector<2x256xf32> to vector<2x128xf32>
    %cst_96 = arith.constant dense<0.000000e+00> : vector<2xf32>
    %174 = vector.multi_reduction <add>, %173, %cst_96 [1] : vector<2x128xf32> to vector<2xf32>
    %175 = vector.shape_cast %174 : vector<2xf32> to vector<2x1xf32>
    %cst_97 = arith.constant 0.001953125 : f32
    %176 = vector.broadcast %cst_97 : f32 to vector<2x1xf32>
    %177 = arith.mulf %175, %176 : vector<2x1xf32>
    %178 = arith.mulf %172, %172 : vector<2x1xf32>
    %179 = arith.subf %177, %178 : vector<2x1xf32>
    %cst_98 = arith.constant 9.99999974E-6 : f32
    %180 = vector.broadcast %cst_98 : f32 to vector<2x1xf32>
    %181 = arith.addf %179, %180 : vector<2x1xf32>
    %182 = math.rsqrt %181 : vector<2x1xf32>
    %183 = tpu.concatenate %172, %182 in 1 : vector<2x1xf32>, vector<2x1xf32> -> vector<2x2xf32>
    %184 = vector.extract_strided_slice %183 {offsets = [0, 0], sizes = [1, 2], strides = [1, 1]} : vector<2x2xf32> to vector<1x2xf32>
    %185 = vector.shape_cast %184 : vector<1x2xf32> to vector<1x2xf32>
    %186 = vector.broadcast %185 : vector<1x2xf32> to vector<8x2xf32>
    %187 = vector.extract_strided_slice %183 {offsets = [1, 0], sizes = [1, 2], strides = [1, 1]} : vector<2x2xf32> to vector<1x2xf32>
    %188 = vector.shape_cast %187 : vector<1x2xf32> to vector<1x2xf32>
    %189 = vector.broadcast %188 : vector<1x2xf32> to vector<8x2xf32>
    %190 = tpu.concatenate %186, %189 in 0 : vector<8x2xf32>, vector<8x2xf32> -> vector<16x2xf32>
    %191 = vector.extract_strided_slice %190 {offsets = [0, 0], sizes = [16, 1], strides = [1, 1]} : vector<16x2xf32> to vector<16x1xf32>
    %192 = vector.broadcast %191 : vector<16x1xf32> to vector<16x128xf32>
    %193 = arith.subf %161, %192 : vector<16x128xf32>
    %194 = vector.extract_strided_slice %190 {offsets = [0, 1], sizes = [16, 1], strides = [1, 1]} : vector<16x2xf32> to vector<16x1xf32>
    %195 = vector.broadcast %194 : vector<16x1xf32> to vector<16x128xf32>
    %196 = arith.mulf %193, %195 : vector<16x128xf32>
    %197 = arith.mulf %196, %163 : vector<16x128xf32>
    %198 = arith.addf %197, %164 : vector<16x128xf32>
    %cst_99 = arith.constant 0.000000e+00 : f32
    %199 = vector.broadcast %cst_99 : f32 to vector<16x128xf32>
    %200 = arith.cmpf oge, %198, %199 : vector<16x128xf32>
    %cst_100 = arith.constant 3.000000e-01 : f32
    %201 = vector.broadcast %cst_100 : f32 to vector<16x128xf32>
    %202 = arith.mulf %201, %198 : vector<16x128xf32>
    %203 = arith.select %200, %198, %202 : vector<16x128xi1>, vector<16x128xf32>
    %c0_101 = arith.constant 0 : index
    %c0_102 = arith.constant 0 : index
    %204 = vector.load %arg15[%c0_101, %c0_102] : memref<2x16xf32, #tpu.memory_space<vmem>>, vector<2x16xf32>
    %c0_103 = arith.constant 0 : index
    %c0_104 = arith.constant 0 : index
    %205 = vector.load %arg16[%c0_103, %c0_104] : memref<16x128xf32, #tpu.memory_space<vmem>>, vector<16x128xf32>
    %206 = arith.mulf %203, %205 : vector<16x128xf32>
    %cst_105 = arith.constant dense<0.000000e+00> : vector<2x128xf32>
    %207 = tpu.matmul %204, %206, %cst_105 {dimension_numbers = #tpu.dot_dimension_numbers<[1], [0], [0], [1], [0, 0, 1, 1], [], []>} : vector<2x16xf32>, vector<16x128xf32>, vector<2x128xf32> -> vector<2x128xf32>
    %cst_106 = arith.constant dense<0.000000e+00> : vector<2xf32>
    %208 = vector.multi_reduction <add>, %207, %cst_106 [1] : vector<2x128xf32> to vector<2xf32>
    %209 = vector.shape_cast %208 : vector<2xf32> to vector<2x1xf32>
    %c0_107 = arith.constant 0 : index
    %c0_108 = arith.constant 0 : index
    %210 = vector.load %arg17[%c0_107, %c0_108] : memref<1x128xf32, #tpu.memory_space<vmem>>, vector<1x128xf32>
    %211 = vector.broadcast %209 : vector<2x1xf32> to vector<2x128xf32>
    %212 = vector.broadcast %210 : vector<1x128xf32> to vector<2x128xf32>
    %213 = arith.addf %211, %212 : vector<2x128xf32>
    %c0_109 = arith.constant 0 : index
    %c0_110 = arith.constant 0 : index
    %c0_111 = arith.constant 0 : index
    %214 = vector.load %arg18[%c0_109, %c0_110, %c0_111] : memref<1x2x128xf32, #tpu.memory_space<vmem>>, vector<1x2x128xf32>
    %215 = vector.shape_cast %214 : vector<1x2x128xf32> to vector<2x128xf32>
    %216 = vector.shape_cast %213 : vector<2x128xf32> to vector<1x2x128xf32>
    tpu.vector_store %arg18[%c0_109, %c0_110, %c0_111], %216 {strides = array<i32>} : memref<1x2x128xf32, #tpu.memory_space<vmem>>, vector<1x2x128xf32>,
    return
  }
  func.func @transform_0(%arg0: i32) -> (i32, i32, i32) {
    %c0_i32 = arith.constant 0 : i32
    %c0_i32_0 = arith.constant 0 : i32
    %c0_i32_1 = arith.constant 0 : i32
    return %arg0, %c0_i32, %c0_i32_0 : i32, i32, i32
  }
  func.func @transform_1(%arg0: i32) -> (i32, i32) {
    %c0_i32 = arith.constant 0 : i32
    %c0_i32_0 = arith.constant 0 : i32
    %c0_i32_1 = arith.constant 0 : i32
    return %c0_i32, %c0_i32_0 : i32, i32
  }
  func.func @transform_2(%arg0: i32) -> (i32, i32) {
    %c0_i32 = arith.constant 0 : i32
    %c0_i32_0 = arith.constant 0 : i32
    %c0_i32_1 = arith.constant 0 : i32
    return %c0_i32, %c0_i32_0 : i32, i32
  }
  func.func @transform_3(%arg0: i32) -> (i32, i32) {
    %c0_i32 = arith.constant 0 : i32
    %c0_i32_0 = arith.constant 0 : i32
    %c0_i32_1 = arith.constant 0 : i32
    return %c0_i32, %c0_i32_0 : i32, i32
  }
  func.func @transform_4(%arg0: i32) -> (i32, i32) {
    %c0_i32 = arith.constant 0 : i32
    %c0_i32_0 = arith.constant 0 : i32
    %c0_i32_1 = arith.constant 0 : i32
    return %c0_i32, %c0_i32_0 : i32, i32
  }
  func.func @transform_5(%arg0: i32) -> (i32, i32) {
    %c0_i32 = arith.constant 0 : i32
    %c0_i32_0 = arith.constant 0 : i32
    %c0_i32_1 = arith.constant 0 : i32
    return %c0_i32, %c0_i32_0 : i32, i32
  }
  func.func @transform_6(%arg0: i32) -> (i32, i32) {
    %c0_i32 = arith.constant 0 : i32
    %c0_i32_0 = arith.constant 0 : i32
    %c0_i32_1 = arith.constant 0 : i32
    return %c0_i32, %c0_i32_0 : i32, i32
  }
  func.func @transform_7(%arg0: i32) -> (i32, i32) {
    %c0_i32 = arith.constant 0 : i32
    %c0_i32_0 = arith.constant 0 : i32
    %c0_i32_1 = arith.constant 0 : i32
    return %c0_i32, %c0_i32_0 : i32, i32
  }
  func.func @transform_8(%arg0: i32) -> (i32, i32) {
    %c0_i32 = arith.constant 0 : i32
    %c0_i32_0 = arith.constant 0 : i32
    %c0_i32_1 = arith.constant 0 : i32
    return %c0_i32, %c0_i32_0 : i32, i32
  }
  func.func @transform_9(%arg0: i32) -> (i32, i32) {
    %c0_i32 = arith.constant 0 : i32
    %c0_i32_0 = arith.constant 0 : i32
    %c0_i32_1 = arith.constant 0 : i32
    return %c0_i32, %c0_i32_0 : i32, i32
  }
  func.func @transform_10(%arg0: i32) -> (i32, i32) {
    %c0_i32 = arith.constant 0 : i32
    %c0_i32_0 = arith.constant 0 : i32
    %c0_i32_1 = arith.constant 0 : i32
    return %c0_i32, %c0_i32_0 : i32, i32
  }
  func.func @transform_11(%arg0: i32) -> (i32, i32) {
    %c0_i32 = arith.constant 0 : i32
    %c0_i32_0 = arith.constant 0 : i32
    %c0_i32_1 = arith.constant 0 : i32
    return %c0_i32, %c0_i32_0 : i32, i32
  }
  func.func @transform_12(%arg0: i32) -> (i32, i32) {
    %c0_i32 = arith.constant 0 : i32
    %c0_i32_0 = arith.constant 0 : i32
    %c0_i32_1 = arith.constant 0 : i32
    return %c0_i32, %c0_i32_0 : i32, i32
  }
  func.func @transform_13(%arg0: i32) -> (i32, i32) {
    %c0_i32 = arith.constant 0 : i32
    %c0_i32_0 = arith.constant 0 : i32
    %c0_i32_1 = arith.constant 0 : i32
    return %c0_i32, %c0_i32_0 : i32, i32
  }
  func.func @transform_14(%arg0: i32) -> (i32, i32) {
    %c0_i32 = arith.constant 0 : i32
    %c0_i32_0 = arith.constant 0 : i32
    %c0_i32_1 = arith.constant 0 : i32
    return %c0_i32, %c0_i32_0 : i32, i32
  }
  func.func @transform_15(%arg0: i32) -> (i32, i32) {
    %c0_i32 = arith.constant 0 : i32
    %c0_i32_0 = arith.constant 0 : i32
    %c0_i32_1 = arith.constant 0 : i32
    return %c0_i32, %c0_i32_0 : i32, i32
  }
  func.func @transform_16(%arg0: i32) -> (i32, i32) {
    %c0_i32 = arith.constant 0 : i32
    %c0_i32_0 = arith.constant 0 : i32
    %c0_i32_1 = arith.constant 0 : i32
    return %c0_i32, %c0_i32_0 : i32, i32
  }
  func.func @transform_17(%arg0: i32) -> (i32, i32, i32) {
    %c0_i32 = arith.constant 0 : i32
    %c0_i32_0 = arith.constant 0 : i32
    %c0_i32_1 = arith.constant 0 : i32
    return %arg0, %c0_i32, %c0_i32_0 : i32, i32, i32
  }
}

</mosaic_0001>

<bundles_post_ra>
// kernel: discriminator_forward.1
= control target key start
LH: loop header
LB: loop body
LE: loop exit
PB: predicated region body
PF: predicated region fallthrough
CT: control target
= control target key end

     0   :  { %vm145_vm0 = vcmask 523264   ;;  %vm368_vm1 = vcmask 517120   ;;  %vm394_vm4 = vcmask 7168   ;;  %s6552_s1 = inlined_call_operand.vmem [shape: bf16[64,64], index: 1, kind: input, shape index: {}]   ;;  %s6553_s0 = inlined_call_operand.vmem [shape: bf16[1,128,64], index: 0, kind: input, shape index: {}]   ;;  %s6554_s4 = inlined_call_operand.vmem [shape: f32[2,128], index: 4, kind: input, shape index: {}]   ;;  %s6555_s2 = inlined_call_operand.vmem [shape: f32[128,64], index: 2, kind: input, shape index: {}]   ;;  %s6556_s3 = inlined_call_operand.vmem [shape: f32[128,64], index: 3, kind: input, shape index: {}]   ;;  %s6557_s5 = inlined_call_operand.vmem [shape: bf16[480,128], index: 5, kind: input, shape index: {}]   ;;  %s6558_s6 = inlined_call_operand.vmem [shape: bf16[960,128], index: 6, kind: input, shape index: {}]   ;;  %s6559_s9 = inlined_call_operand.vmem [shape: f32[2,32], index: 9, kind: input, shape index: {}]   ;;  %s6560_s7 = inlined_call_operand.vmem [shape: f32[32,128], index: 7, kind: input, shape index: {}]   ;;  %s6561_s8 = inlined_call_operand.vmem [shape: f32[32,128], index: 8, kind: input, shape index: {}]   ;;  %s6562_s10 = inlined_call_operand.vmem [shape: bf16[240,32], index: 10, kind: input, shape index: {}]   ;;  %s6563_s11 = inlined_call_operand.vmem [shape: bf16[1920,128], index: 11, kind: input, shape index: {}]   ;;  %s6564_s14 = inlined_call_operand.vmem [shape: f32[2,16], index: 14, kind: input, shape index: {}]   ;;  %s6565_s12 = inlined_call_operand.vmem [shape: f32[16,128], index: 12, kind: input, shape index: {}]   ;;  %s6566_s13 = inlined_call_operand.vmem [shape: f32[16,128], index: 13, kind: input, shape index: {}]   ;;  %s6567_s15 = inlined_call_operand.vmem [shape: f32[16,128], index: 15, kind: input, shape index: {}]   ;;  %s6568_s16 = inlined_call_operand.vmem [shape: f32[1,128], index: 16, kind: input, shape index: {}]   ;;  %s6569_s17 = inlined_call_operand.vmem [shape: f32[1,2,128], index: 17, kind: output, shape index: {}]  }
   0x1   :  { %6572 = sst [smem:[#allocation4_spill]] %s6552_s1 }
   0x2   :  { %6573 = sst [smem:[#allocation5_spill]] %s6553_s0 }
   0x3   :  { %s6574_s26 = sld [smem:[#allocation4_spill]] }
   0x4   :  { %s6575_s20 = sld [smem:[#allocation5_spill]] }
   0x9   :  { %v4844_v0 = vld [vmem:[%s6574_s26 + $0x18] sm:$0xff]  ;;  %v4843_v1 = vld [vmem:[%s6574_s26 + $0x10] sm:$0xff]  ;;  %v4842_v2 = vld [vmem:[%s6574_s26 + $0x8] sm:$0xff] }
   0xa   :  { %174 = vmatpush.bf16.msra.mxu0 %v4844_v0  ;;  %5184 = vmatpush.bf16.msra.mxu1 %v4844_v0  ;;  %v4841_v3 = vld [vmem:[%s6574_s26] sm:$0xff]  ;;  %v4839_v5 = vld [vmem:[%s6575_s20 + $0x30] sm:$0xff]  ;;  %v4834_v6 = vld [vmem:[%s6575_s20 + $0x8] sm:$0xff] }
   0xb   :  { %v4833_v4 = vld [vmem:[%s6575_s20] sm:$0xff]  ;;  %v4840_v7 = vld [vmem:[%s6575_s20 + $0x38] sm:$0xff]  ;;  %v4835_v8 = vld [vmem:[%s6575_s20 + $0x10] sm:$0xff] }
   0xc   :  { %v4836_v9 = vld [vmem:[%s6575_s20 + $0x18] sm:$0xff]  ;;  %v4837_v10 = vld [vmem:[%s6575_s20 + $0x20] sm:$0xff]  ;;  %v4838_v11 = vld [vmem:[%s6575_s20 + $0x28] sm:$0xff]  ;;  %s5255_s20 = smov 64  }
   0xe   :  { %175 = vmatpush.bf16.msra.mxu0 %v4843_v1  ;;  %5185 = vmatpush.bf16.msra.mxu1 %v4843_v1 }
  0x12   :  { %176 = vmatpush.bf16.msra.mxu0 %v4842_v2  ;;  %5186 = vmatpush.bf16.msra.mxu1 %v4842_v2 }
  0x16   :  { %177 = vmatpush.bf16.msra.mxu0 %v4841_v3  ;;  %5187 = vmatpush.bf16.msra.mxu1 %v4841_v3 }
  0x19   :  { %3779 = vmatmul.msk.bf16.vlgmr.msra.gmra.mxu0 %vm145_vm0, %v4833_v4  ;;  %3785 = vmatmul.msk.bf16.vlgmr.msra.gmra.mxu1 %vm145_vm0, %v4839_v5 }
  0x29   :  { %3780 = vmatmul.msk.bf16.gmra.mxu0 %vm145_vm0, %v4834_v6  ;;  %3786 = vmatmul.msk.bf16.gmra.mxu1 %vm145_vm0, %v4840_v7 }
  0x39   :  { %3781 = vmatmul.msk.bf16.gmra.mxu0 %vm145_vm0, %v4835_v8 }
  0x49   :  { %3782 = vmatmul.msk.bf16.gmra.mxu0 %vm145_vm0, %v4836_v9 }
  0x59   :  { %3783 = vmatmul.msk.bf16.gmra.mxu0 %vm145_vm0, %v4837_v10 }
  0x69   :  { %3784 = vmatmul.msk.bf16.gmra.mxu0 %vm145_vm0, %v4838_v11 }
  0x96   :  { %v5392_v12 = vpop.f32.mrf.mxu0  ;;  %v5394_v13 = vpop.f32.mrf.mxu1 }
  0x97   :  { %v264_v23 = vmul.f32 %v5394_v13, %v5394_v13  ;;  %v252_v50 = vmul.f32 %v5392_v12, %v5392_v12 }
  0x9e   :  { %v5396_v14 = vpop.f32.mrf.mxu0  ;;  %v5398_v15 = vpop.f32.mrf.mxu1 }
  0x9f   :  { %v265_v24 = vmul.f32 %v5398_v15, %v5398_v15  ;;  %v253_v49 = vmul.f32 %v5396_v14, %v5396_v14 }
  0xa1   :  { %v5204_v26 = vpack.i.bf16 %v264_v23, %v265_v24  ;;  %v5234_v51 = vpack.i.bf16 %v252_v50, %v253_v49  ;;  %v5256_v49 = vmov 0  }
  0xa2   :  { %5239 = vset.pattern.permute.xlu2 %v5256_v49  ;;  %5243 = vset.pattern.permute.xlu0 %v5256_v49 }
  0xa3   :  { %5246 = vset.pattern.permute.xlu1 %v5256_v49 }
  0xa6   :  { %v5400_v16 = vpop.f32.mrf.mxu0  ;;  %v5402_v17 = vpop.f32.mrf.mxu1 }
  0xa7   :  { %v266_v18 = vmul.f32 %v5402_v17, %v5402_v17  ;;  %v254_v29 = vmul.f32 %v5400_v16, %v5400_v16 }
  0xae   :  { %v5406_v19 = vpop.f32.mrf.mxu0  ;;  %v5408_v20 = vpop.f32.mrf.mxu1 }
  0xaf   :  { %v267_v21 = vmul.f32 %v5408_v20, %v5408_v20  ;;  %v255_v27 = vmul.f32 %v5406_v19, %v5406_v19 }
  0xb1   :  { %v5199_v22 = vpack.i.bf16 %v266_v18, %v267_v21  ;;  %v5229_v30 = vpack.i.bf16 %v254_v29, %v255_v27 }
  0xb3   :  { %5200 = vrot.lane.b32.xlu0 %v5199_v22, %s5255_s20 }
  0xb6   :  { %v5417_v25 = vpop.f32.mrf.mxu0 }
  0xb7   :  { %v256_v38 = vmul.f32 %v5417_v25, %v5417_v25 }
  0xbb   :  { %5205 = vrot.lane.b32.xlu0 %v5204_v26, %s5255_s20 }
  0xbe   :  { %v5422_v28 = vpop.f32.mrf.mxu0 }
  0xbf   :  { %v257_v36 = vmul.f32 %v5422_v28, %v5422_v28 }
  0xc1   :  { %v5224_v39 = vpack.i.bf16 %v256_v38, %v257_v36 }
  0xc3   :  { %5230 = vrot.lane.b32.xlu0 %v5229_v30, %s5255_s20 }
  0xc6   :  { %v5427_v31 = vpop.f32.mrf.mxu0 }
  0xc7   :  { %v258_v33 = vmul.f32 %v5427_v31, %v5427_v31 }
  0xce   :  { %v5429_v32 = vpop.f32.mrf.mxu0 }
  0xcf   :  { %v259_v34 = vmul.f32 %v5429_v32, %v5429_v32 }
  0xd1   :  { %v5219_v35 = vpack.i.bf16 %v258_v33, %v259_v34 }
  0xd3   :  { %5220 = vrot.lane.b32.xlu2 %v5219_v35, %s5255_s20 }
  0xd6   :  { %v5438_v37 = vpop.f32.mrf.mxu0 }
  0xd7   :  { %v260_v47 = vmul.f32 %v5438_v37, %v5438_v37 }
  0xdb   :  { %5225 = vrot.lane.b32.xlu2 %v5224_v39, %s5255_s20 }
  0xde   :  { %v5443_v40 = vpop.f32.mrf.mxu0 }
  0xdf   :  { %v261_v46 = vmul.f32 %v5443_v40, %v5443_v40 }
  0xe1   :  { %v5214_v48 = vpack.i.bf16 %v260_v47, %v261_v46 }
  0xe6   :  { %v5445_v41 = vpop.f32.mrf.mxu0 }
  0xe7   :  { %v262_v43 = vmul.f32 %v5445_v41, %v5445_v41 }
  0xee   :  { %v5447_v42 = vpop.f32.mrf.mxu0 }
  0xef   :  { %v263_v44 = vmul.f32 %v5447_v42, %v5447_v42 }
  0xf1   :  { %v5209_v45 = vpack.i.bf16 %v262_v43, %v263_v44  ;;  %v219_v43 = vld [vmem:[%s6554_s4] sm:$0x3] }
  0xf3   :  { %5210 = vrot.lane.b32.xlu1 %v5209_v45, %s5255_s20 }
  0xfb   :  { %5215 = vrot.lane.b32.xlu1 %v5214_v48, %s5255_s20 }
 0x103   :  { %5235 = vrot.lane.b32.xlu1 %v5234_v51, %s5255_s20 }
 0x125   :  { %v5201_v52 = vpop.permute.xlu0 %5200 }
 0x126   :  { %v5203_v53 = vunpack.i.h.bf16 %v5201_v52  ;;  %v5202_v54 = vunpack.i.l.bf16 %v5201_v52 }
 0x128   :  { %v347_v55 = vsel %vm145_vm0, %v5408_v20, %v5202_v54  ;;  %v346_v56 = vsel %vm145_vm0, %v5402_v17, %v5203_v53 }
 0x129   :  { %348 = vmatpush.msrb.mxu1 %v347_v55 }
 0x12b   :  { %349 = vmatpush.msrb.mxu1 %v346_v56 }
 0x12d   :  { %v5206_v57 = vpop.permute.xlu0 %5205  ;;  %v5221_v1 = vpop.permute.xlu2 %5220 }
 0x12e   :  { %v5208_v58 = vunpack.i.h.bf16 %v5206_v57  ;;  %v5207_v59 = vunpack.i.l.bf16 %v5206_v57  ;;  %v5222_v7 = vunpack.i.l.bf16 %v5221_v1  ;;  %v5223_v10 = vunpack.i.h.bf16 %v5221_v1 }
 0x130   :  { %v345_v60 = vsel %vm145_vm0, %v5398_v15, %v5207_v59  ;;  %v344_v61 = vsel %vm145_vm0, %v5394_v13, %v5208_v58  ;;  %v339_v21 = vsel %vm145_vm0, %v5429_v32, %v5222_v7  ;;  %v338_v24 = vsel %vm145_vm0, %v5427_v31, %v5223_v10  ;;  %v233_v10 = vld [vmem:[%s6555_s2 + $0x68] sm:$0xff] }
 0x131   :  { %350 = vmatpush.msrb.mxu1 %v345_v60 }
 0x133   :  { %351 = vmatpush.msrb.mxu1 %v344_v61 }
 0x135   :  { %v5226_v9 = vpop.permute.xlu2 %5225  ;;  %v5231_v22 = vpop.permute.xlu0 %5230 }
 0x136   :  { %v5227_v18 = vunpack.i.l.bf16 %v5226_v9  ;;  %v5228_v23 = vunpack.i.h.bf16 %v5226_v9  ;;  %v5232_v26 = vunpack.i.l.bf16 %v5231_v22  ;;  %v5233_v30 = vunpack.i.h.bf16 %v5231_v22  ;;  %v232_v9 = vld [vmem:[%s6555_s2 + $0x60] sm:$0xff]  ;;  %v250_v22 = vld [vmem:[%s6556_s3 + $0x70] sm:$0xff] }
 0x138   :  { %v337_v27 = vsel %vm145_vm0, %v5422_v28, %v5227_v18  ;;  %v336_v33 = vsel %vm145_vm0, %v5417_v25, %v5228_v23  ;;  %v335_v35 = vsel %vm145_vm0, %v5406_v19, %v5232_v26  ;;  %v334_v38 = vsel %vm145_vm0, %v5400_v16, %v5233_v30  ;;  %v251_v26 = vld [vmem:[%s6556_s3 + $0x78] sm:$0xff] }
 0x165   :  { %v5211_v62 = vpop.permute.xlu1 %5210 }
 0x166   :  { %v5213_v63 = vunpack.i.h.bf16 %v5211_v62  ;;  %v5212_v0 = vunpack.i.l.bf16 %v5211_v62 }
 0x168   :  { %v343_v2 = vsel %vm145_vm0, %v5447_v42, %v5212_v0  ;;  %v342_v3 = vsel %vm145_vm0, %v5445_v41, %v5213_v63 }
 0x169   :  { %352 = vmatpush.msrb.mxu1 %v343_v2  ;;  %v5257_v2 = vmov 1  }
 0x16b   :  { %353 = vmatpush.msrb.mxu1 %v342_v3 }
 0x16d   :  { %v5216_v4 = vpop.permute.xlu1 %5215 }
 0x16e   :  { %v5218_v5 = vunpack.i.h.bf16 %v5216_v4  ;;  %v5217_v6 = vunpack.i.l.bf16 %v5216_v4 }
 0x170   :  { %v341_v8 = vsel %vm145_vm0, %v5443_v40, %v5217_v6  ;;  %v340_v11 = vsel %vm145_vm0, %v5438_v37, %v5218_v5  ;;  %v234_v5 = vld [vmem:[%s6555_s2 + $0x70] sm:$0xff]  ;;  %v235_v6 = vld [vmem:[%s6555_s2 + $0x78] sm:$0xff] }
 0x171   :  { %354 = vmatpush.msrb.mxu1 %v341_v8 }
 0x173   :  { %355 = vmatpush.msrb.mxu1 %v340_v11 }
 0x175   :  { %356 = vmatpush.msrb.mxu1 %v339_v21  ;;  %v5236_v29 = vpop.permute.xlu1 %5235 }
 0x176   :  { %v5237_v34 = vunpack.i.l.bf16 %v5236_v29  ;;  %v5238_v36 = vunpack.i.h.bf16 %v5236_v29 }
 0x177   :  { %357 = vmatpush.msrb.mxu1 %v338_v24 }
 0x178   :  { %v333_v39 = vsel %vm145_vm0, %v5396_v14, %v5237_v34  ;;  %v332_v44 = vsel %vm145_vm0, %v5392_v12, %v5238_v36  ;;  %v228_v34 = vld [vmem:[%s6555_s2 + $0x40] sm:$0xff] }
 0x179   :  { %358 = vmatpush.msrb.mxu1 %v337_v27 }
 0x17b   :  { %359 = vmatpush.msrb.mxu1 %v336_v33 }
 0x17d   :  { %360 = vmatpush.msrb.mxu1 %v335_v35 }
 0x17f   :  { %361 = vmatpush.msrb.mxu1 %v334_v38 }
 0x181   :  { %362 = vmatpush.msrb.mxu1 %v333_v39 }
 0x183   :  { %363 = vmatpush.msrb.mxu1 %v332_v44 }
 0x184   :  { %364 = vmatmul.f32.vlgmr.msrb.gmra.mxu1 %v219_v43 }
 0x201   :  { %v365_v45 = vpop.f32.mrf.mxu1 }
 0x202   :  { %374 = vrot.lane.b32.xlu2 %v365_v45, %s5255_s20  ;;  %v369_v46 = vsel %vm368_vm1, %v365_v45, 0.0 }
 0x203   :  { %370 = vadd.xlane.f32.xlu0 %v369_v46 }
 0x25c   :  { %v375_v47 = vpop.permute.xlu2 %374 }
 0x25d   :  { %v377_v48 = vsel %vm368_vm1, %v375_v47, 0.0  ;;  %v247_v47 = vld [vmem:[%s6556_s3 + $0x58] sm:$0xff] }
 0x25e   :  { %378 = vadd.xlane.f32.xlu1 %v377_v48  ;;  %v244_v48 = vld [vmem:[%s6556_s3 + $0x40] sm:$0xff] }
 0x276   :  { %v371_v50 = vpop.xlane.xlu0 %370 }
 0x277   :  { %v372_v51 = vmul.f32 0.00024414063, %v371_v50  ;;  %v245_v50 = vld [vmem:[%s6556_s3 + $0x48] sm:$0xff] }
 0x279   :  { %v381_v53 = vmul.f32 %v372_v51, %v372_v51 }
 0x2d1   :  { %v379_v52 = vpop.xlane.xlu1 %378 }
 0x2d2   :  { %v380_v54 = vmul.f32 0.00024414063, %v379_v52 }
 0x2d4   :  { %v382_v55 = vsub.f32 %v380_v54, %v381_v53 }
 0x2d6   :  { %v383_v56 = vadd.f32 1e-05, %v382_v55 }
 0x2d8   :  { %5249 = vrsqrt.f32 %v383_v56  ;;  %vm390_vm3 = vweird.f32 %v383_v56 }
 0x2de   :  { %v5250_v57 = vpop.eup %5249 }
 0x2df   :  { %v385_v58 = vmul.f32 %v5250_v57, %v383_v56  ;;  %vm391_vm2 = vweird.f32 %v5250_v57 }
 0x2e0   :  { %vm392_vm5 = vmor %vm390_vm3, %vm391_vm2 }
 0x2e1   :  { %v386_v59 = vmul.f32 %v5250_v57, %v385_v58 }
 0x2e3   :  { %v387_v60 = vmul.f32 0.5, %v386_v59 }
 0x2e5   :  { %v388_v61 = vsub.f32 1.5, %v387_v60 }
 0x2e7   :  { %v389_v62 = vmul.f32 %v5250_v57, %v388_v61 }
 0x2e9   :  { %v393_v63 = vsel %vm392_vm5, %v5250_v57, %v389_v62 }
 0x2ea   :  { %v395_v0 = vsel %vm394_vm4, %v372_v51, %v393_v63 }
 0x2eb   :  { %v397_v1 = vperm.slane %v395_v0, 1  ;;  %v396_v3 = vperm.slane %v395_v0, 0 }
 0x2ed   :  { %405 = vperm.xlu2 %5239, %v397_v1  }
 0x2f5   :  { %5240 = vset.pattern.permute.xlu2 %v5257_v2 }
 0x2f6   :  { %429 = vperm.xlu2 %5240, %v397_v1  }
 0x2fe   :  { %5241 = vset.pattern.permute.xlu2 %v5256_v49 }
 0x2ff   :  { %401 = vperm.xlu2 %5241, %v396_v3  }
 0x307   :  { %5242 = vset.pattern.permute.xlu2 %v5257_v2 }
 0x308   :  { %425 = vperm.xlu2 %5242, %v396_v3  }
 0x347   :  { %v406_v4 = vpop.permute.xlu2 %405 }
 0x348   :  { %v422_v7 = vsub.f32 %v5402_v17, %v406_v4  ;;  %v423_v8 = vsub.f32 %v5408_v20, %v406_v4  ;;  %v420_v11 = vsub.f32 %v5394_v13, %v406_v4  ;;  %v421_v18 = vsub.f32 %v5398_v15, %v406_v4  ;;  %v230_v17 = vld [vmem:[%s6555_s2 + $0x50] sm:$0xff]  ;;  %v231_v20 = vld [vmem:[%s6555_s2 + $0x58] sm:$0xff] }
 0x349   :  { %v418_v23 = vsub.f32 %v5445_v41, %v406_v4  ;;  %v419_v24 = vsub.f32 %v5447_v42, %v406_v4  ;;  %v416_v13 = vsub.f32 %v5438_v37, %v406_v4  ;;  %v417_v15 = vsub.f32 %v5443_v40, %v406_v4  ;;  %v229_v41 = vld [vmem:[%s6555_s2 + $0x48] sm:$0xff]  ;;  %v248_v37 = vld [vmem:[%s6556_s3 + $0x60] sm:$0xff]  ;;  %v246_v42 = vld [vmem:[%s6556_s3 + $0x50] sm:$0xff] }
 0x34a   :  { %v249_v40 = vld [vmem:[%s6556_s3 + $0x68] sm:$0xff] }
 0x350   :  { %v430_v21 = vpop.permute.xlu2 %429 }
 0x351   :  { %v446_v27 = vmul.f32 %v430_v21, %v422_v7  ;;  %v447_v29 = vmul.f32 %v430_v21, %v423_v8  ;;  %v444_v30 = vmul.f32 %v430_v21, %v420_v11  ;;  %v445_v33 = vmul.f32 %v430_v21, %v421_v18 }
 0x352   :  { %v442_v35 = vmul.f32 %v430_v21, %v418_v23  ;;  %v443_v36 = vmul.f32 %v430_v21, %v419_v24  ;;  %v440_v38 = vmul.f32 %v430_v21, %v416_v13  ;;  %v441_v39 = vmul.f32 %v430_v21, %v417_v15 }
 0x353   :  { %v462_v43 = vmul.f32 %v446_v27, %v234_v5  ;;  %v463_v44 = vmul.f32 %v447_v29, %v235_v6  ;;  %v460_v45 = vmul.f32 %v444_v30, %v232_v9  ;;  %v461_v46 = vmul.f32 %v445_v33, %v233_v10  ;;  %v226_v27 = vld [vmem:[%s6555_s2 + $0x30] sm:$0xff]  ;;  %v227_v29 = vld [vmem:[%s6555_s2 + $0x38] sm:$0xff] }
 0x354   :  { %v458_v51 = vmul.f32 %v442_v35, %v230_v17  ;;  %v459_v52 = vmul.f32 %v443_v36, %v231_v20  ;;  %v456_v53 = vmul.f32 %v440_v38, %v228_v34  ;;  %v457_v54 = vmul.f32 %v441_v39, %v229_v41  ;;  %v242_v41 = vld [vmem:[%s6556_s3 + $0x30] sm:$0xff] }
 0x355   :  { %v478_v55 = vadd.f32 %v462_v43, %v250_v22  ;;  %v479_v56 = vadd.f32 %v463_v44, %v251_v26  ;;  %v476_v57 = vadd.f32 %v460_v45, %v248_v37  ;;  %v477_v58 = vadd.f32 %v461_v46, %v249_v40  ;;  %v224_v37 = vld [vmem:[%s6555_s2 + $0x20] sm:$0xff]  ;;  %v222_v39 = vld [vmem:[%s6555_s2 + $0x10] sm:$0xff]  ;;  %v223_v43 = vld [vmem:[%s6555_s2 + $0x18] sm:$0xff] }
 0x356   :  { %v474_v59 = vadd.f32 %v458_v51, %v246_v42  ;;  %v475_v60 = vadd.f32 %v459_v52, %v247_v47  ;;  %v472_v61 = vadd.f32 %v456_v53, %v244_v48  ;;  %v473_v62 = vadd.f32 %v457_v54, %v245_v50  ;;  %v241_v44 = vld [vmem:[%s6556_s3 + $0x28] sm:$0xff]  ;;  %v238_v53 = vld [vmem:[%s6556_s3 + $0x10] sm:$0xff]  ;;  %v239_v54 = vld [vmem:[%s6556_s3 + $0x18] sm:$0xff] }
 0x357   :  { %vm494_vm6 = vcmp.ge.f32.partialorder %v478_v55, 0.0  ;;  %vm495_vm7 = vcmp.ge.f32.partialorder %v479_v56, 0.0  ;;  %v510_v63 = vmul.f32 0.3, %v478_v55  ;;  %v511_v0 = vmul.f32 0.3, %v479_v56 }
 0x358   :  { %vm492_vm8 = vcmp.ge.f32.partialorder %v476_v57, 0.0  ;;  %vm493_vm9 = vcmp.ge.f32.partialorder %v477_v58, 0.0  ;;  %v508_v1 = vmul.f32 0.3, %v476_v57  ;;  %v509_v3 = vmul.f32 0.3, %v477_v58 }
 0x359   :  { %v5563_v4 = vpop.permute.xlu2 %401  ;;  %v526_v5 = vsel %vm494_vm6, %v478_v55, %v510_v63  ;;  %v527_v6 = vsel %vm495_vm7, %v479_v56, %v511_v0  ;;  %vm490_vm10 = vcmp.ge.f32.partialorder %v474_v59, 0.0  ;;  %v506_v8 = vmul.f32 0.3, %v474_v59  ;;  %v221_v55 = vld [vmem:[%s6555_s2 + $0x8] sm:$0xff] }
 0x35a   :  { %v595_v7 = vpack.c.bf16 %v527_v6, %v526_v5  ;;  %v524_v9 = vsel %vm492_vm8, %v476_v57, %v508_v1  ;;  %v525_v10 = vsel %vm493_vm9, %v477_v58, %v509_v3  ;;  %vm491_vm11 = vcmp.ge.f32.partialorder %v475_v60, 0.0  ;;  %v236_v3 = vld [vmem:[%s6556_s3] sm:$0xff] }
 0x35b   :  { %v507_v11 = vmul.f32 0.3, %v475_v60  ;;  %vm488_vm12 = vcmp.ge.f32.partialorder %v472_v61, 0.0  ;;  %vm489_vm13 = vcmp.ge.f32.partialorder %v473_v62, 0.0  ;;  %v504_v18 = vmul.f32 0.3, %v472_v61 }
 0x35c   :  { %776 = vmatpush.bf16.msrb.mxu0 %v595_v7  ;;  %5188 = vmatpush.bf16.msra.mxu2 %v595_v7  ;;  %v505_v21 = vmul.f32 0.3, %v473_v62  ;;  %v594_v22 = vpack.c.bf16 %v525_v10, %v524_v9  ;;  %v522_v17 = vsel %vm490_vm10, %v474_v59, %v506_v8  ;;  %v414_v13 = vsub.f32 %v5427_v31, %v5563_v4 }
 0x35d   :  { %v523_v20 = vsel %vm491_vm11, %v475_v60, %v507_v11  ;;  %v520_v23 = vsel %vm488_vm12, %v472_v61, %v504_v18  ;;  %v415_v15 = vsub.f32 %v5429_v32, %v5563_v4  ;;  %v412_v30 = vsub.f32 %v5417_v25, %v5563_v4  ;;  %v225_v25 = vld [vmem:[%s6555_s2 + $0x28] sm:$0xff] }
 0x35e   :  { %v521_v24 = vsel %vm489_vm13, %v473_v62, %v505_v21  ;;  %v593_v26 = vpack.c.bf16 %v523_v20, %v522_v17  ;;  %v413_v33 = vsub.f32 %v5422_v28, %v5563_v4  ;;  %v410_v31 = vsub.f32 %v5400_v16, %v5563_v4 }
 0x35f   :  { %v592_v32 = vpack.c.bf16 %v521_v24, %v520_v23  ;;  %v411_v28 = vsub.f32 %v5406_v19, %v5563_v4  ;;  %v408_v16 = vsub.f32 %v5392_v12, %v5563_v4  ;;  %v409_v40 = vsub.f32 %v5396_v14, %v5563_v4  ;;  %v220_v19 = vld [vmem:[%s6555_s2] sm:$0xff]  ;;  %v243_v12 = vld [vmem:[%s6556_s3 + $0x38] sm:$0xff]  ;;  %v237_v4 = vld [vmem:[%s6556_s3 + $0x8] sm:$0xff] }
 0x360   :  { %777 = vmatpush.bf16.msrb.mxu0 %v594_v22  ;;  %5189 = vmatpush.bf16.msra.mxu2 %v594_v22  ;;  %v240_v14 = vld [vmem:[%s6556_s3 + $0x20] sm:$0xff]  ;;  %vm995_vm8 = vcmask 519168   ;;  %vm1016_vm9 = vcmask 1043968   ;;  %vm1958_vm10 = vcmask 1041408  }
 0x362   :  { %v426_v34 = vpop.permute.xlu2 %425 }
 0x363   :  { %v438_v42 = vmul.f32 %v426_v34, %v414_v13  ;;  %v439_v35 = vmul.f32 %v426_v34, %v415_v15  ;;  %v436_v36 = vmul.f32 %v426_v34, %v412_v30  ;;  %v437_v38 = vmul.f32 %v426_v34, %v413_v33 }
 0x364   :  { %778 = vmatpush.bf16.msrb.mxu0 %v593_v26  ;;  %5190 = vmatpush.bf16.msra.mxu2 %v593_v26  ;;  %v434_v45 = vmul.f32 %v426_v34, %v410_v31  ;;  %v435_v46 = vmul.f32 %v426_v34, %v411_v28  ;;  %v432_v47 = vmul.f32 %v426_v34, %v408_v16  ;;  %v4847_v28 = vld [vmem:[%s6557_s5 + $0x10] sm:$0xff] }
 0x365   :  { %v454_v48 = vmul.f32 %v438_v42, %v226_v27  ;;  %v455_v50 = vmul.f32 %v439_v35, %v227_v29  ;;  %v452_v51 = vmul.f32 %v436_v36, %v224_v37  ;;  %v453_v52 = vmul.f32 %v437_v38, %v225_v25  ;;  %v4846_v37 = vld [vmem:[%s6557_s5 + $0x8] sm:$0xff]  ;;  %v4851_v16 = vld [vmem:[%s6557_s5 + $0x30] sm:$0xff]  ;;  %v4852_v42 = vld [vmem:[%s6557_s5 + $0x38] sm:$0xff] }
 0x366   :  { %v450_v56 = vmul.f32 %v434_v45, %v222_v39  ;;  %v451_v57 = vmul.f32 %v435_v46, %v223_v43  ;;  %v433_v58 = vmul.f32 %v426_v34, %v409_v40  ;;  %v448_v59 = vmul.f32 %v432_v47, %v220_v19  ;;  %v4850_v25 = vld [vmem:[%s6557_s5 + $0x28] sm:$0xff]  ;;  %v4848_v40 = vld [vmem:[%s6557_s5 + $0x18] sm:$0xff]  ;;  %v4853_v35 = vld [vmem:[%s6557_s5 + $0x40] sm:$0xff] }
 0x367   :  { %v470_v60 = vadd.f32 %v454_v48, %v242_v41  ;;  %v471_v61 = vadd.f32 %v455_v50, %v243_v12  ;;  %v468_v62 = vadd.f32 %v452_v51, %v240_v14  ;;  %v469_v63 = vadd.f32 %v453_v52, %v241_v44  ;;  %v4849_v41 = vld [vmem:[%s6557_s5 + $0x20] sm:$0xff]  ;;  %v4854_v36 = vld [vmem:[%s6557_s5 + $0x48] sm:$0xff]  ;;  %v4855_v38 = vld [vmem:[%s6557_s5 + $0x50] sm:$0xff] }
 0x368   :  { %779 = vmatpush.bf16.msrb.mxu0 %v592_v32  ;;  %5191 = vmatpush.bf16.msra.mxu2 %v592_v32  ;;  %v466_v0 = vadd.f32 %v450_v56, %v238_v53  ;;  %v467_v1 = vadd.f32 %v451_v57, %v239_v54  ;;  %v449_v5 = vmul.f32 %v433_v58, %v221_v55  ;;  %v4845_v32 = vld [vmem:[%s6557_s5] sm:$0xff]  ;;  %v4856_v39 = vld [vmem:[%s6557_s5 + $0x58] sm:$0xff]  ;;  %v4858_v50 = vld [vmem:[%s6557_s5 + $0x68] sm:$0xff] }
 0x369   :  { %vm486_vm14 = vcmp.ge.f32.partialorder %v470_v60, 0.0  ;;  %vm487_vm15 = vcmp.ge.f32.partialorder %v471_v61, 0.0  ;;  %v502_v6 = vmul.f32 0.3, %v470_v60  ;;  %v503_v7 = vmul.f32 0.3, %v471_v61 }
 0x36a   :  { %vm484_vm1 = vcmp.ge.f32.partialorder %v468_v62, 0.0  ;;  %vm485_vm2 = vcmp.ge.f32.partialorder %v469_v63, 0.0  ;;  %v500_v8 = vmul.f32 0.3, %v468_v62  ;;  %v501_v9 = vmul.f32 0.3, %v469_v63 }
 0x36b   :  { %v518_v10 = vsel %vm486_vm14, %v470_v60, %v502_v6  ;;  %v519_v11 = vsel %vm487_vm15, %v471_v61, %v503_v7  ;;  %v498_v17 = vmul.f32 0.3, %v466_v0  ;;  %v499_v20 = vmul.f32 0.3, %v467_v1  ;;  %v4857_v43 = vld [vmem:[%s6557_s5 + $0x60] sm:$0xff] }
 0x36c   :  { %v591_v18 = vpack.c.bf16 %v519_v11, %v518_v10  ;;  %v516_v21 = vsel %vm484_vm1, %v468_v62, %v500_v8  ;;  %v517_v22 = vsel %vm485_vm2, %v469_v63, %v501_v9  ;;  %v464_v23 = vadd.f32 %v448_v59, %v236_v3  ;;  %v4859_v59 = vld [vmem:[%s6557_s5 + $0x70] sm:$0xff]  ;;  %v4860_v3 = vld [vmem:[%s6557_s5 + $0x78] sm:$0xff]  ;;  %v4861_v11 = vld [vmem:[%s6557_s5 + $0x80] sm:$0xff] }
 0x36d   :  { %v465_v24 = vadd.f32 %v449_v5, %v237_v4  ;;  %vm482_vm3 = vcmp.ge.f32.partialorder %v466_v0, 0.0  ;;  %vm483_vm5 = vcmp.ge.f32.partialorder %v467_v1, 0.0  ;;  %v590_v13 = vpack.c.bf16 %v517_v22, %v516_v21 }
 0x36e   :  { %780 = vmatpush.bf16.msrb.mxu0 %v591_v18  ;;  %5192 = vmatpush.bf16.msra.mxu2 %v591_v18  ;;  %v514_v15 = vsel %vm482_vm3, %v466_v0, %v498_v17  ;;  %v515_v26 = vsel %vm483_vm5, %v467_v1, %v499_v20  ;;  %v496_v27 = vmul.f32 0.3, %v464_v23  ;;  %vm480_vm6 = vcmp.ge.f32.partialorder %v464_v23, 0.0  ;;  %v4862_v20 = vld [vmem:[%s6557_s5 + $0x88] sm:$0xff] }
 0x36f   :  { %v497_v29 = vmul.f32 0.3, %v465_v24  ;;  %vm481_vm7 = vcmp.ge.f32.partialorder %v465_v24, 0.0  ;;  %v589_v30 = vpack.c.bf16 %v515_v26, %v514_v15  ;;  %v4863_v26 = vld [vmem:[%s6557_s5 + $0x90] sm:$0xff]  ;;  %vm3594_vm3 = vcmask 130048  }
 0x370   :  { %v512_v33 = vsel %vm480_vm6, %v464_v23, %v496_v27 }
 0x371   :  { %v513_v31 = vsel %vm481_vm7, %v465_v24, %v497_v29 }
 0x372   :  { %781 = vmatpush.bf16.msrb.mxu0 %v590_v13  ;;  %5193 = vmatpush.bf16.msra.mxu2 %v590_v13  ;;  %v588_v34 = vpack.c.bf16 %v513_v31, %v512_v33  ;;  %v4864_v31 = vld [vmem:[%s6557_s5 + $0x98] sm:$0xff] }
 0x376   :  { %782 = vmatpush.bf16.msrb.mxu0 %v589_v30  ;;  %5194 = vmatpush.bf16.msra.mxu2 %v589_v30 }
 0x37a   :  { %783 = vmatpush.bf16.msrb.mxu0 %v588_v34  ;;  %5195 = vmatpush.bf16.msra.mxu2 %v588_v34 }
 0x37d   :  { %784 = vmatmul.bf16.vlgmr.msrb.gmra.mxu0 %v4845_v32  ;;  %804 = vmatmul.bf16.vlgmr.msra.gmra.mxu2 %v4849_v41 }
 0x38d   :  { %789 = vmatmul.bf16.gmra.mxu0 %v4846_v37  ;;  %809 = vmatmul.bf16.gmra.mxu2 %v4850_v25  ;;  %v4898_v37 = vld [vmem:[%s6558_s6 + $0x38] sm:$0xff]  ;;  %v4897_v25 = vld [vmem:[%s6558_s6 + $0x30] sm:$0xff] }
 0x38e   :  { %1749 = vmatpush.bf16.msra.mxu3 %v4898_v37 }
 0x392   :  { %1750 = vmatpush.bf16.msra.mxu3 %v4897_v25  ;;  %v4870_v25 = vld [vmem:[%s6557_s5 + $0xc8] sm:$0xff] }
 0x39d   :  { %794 = vmatmul.bf16.gmra.mxu0 %v4847_v28  ;;  %814 = vmatmul.bf16.gmra.mxu2 %v4851_v16 }
 0x3ad   :  { %799 = vmatmul.bf16.gmra.mxu0 %v4848_v40  ;;  %819 = vmatmul.bf16.gmra.mxu2 %v4852_v42  ;;  %v4865_v42 = vld [vmem:[%s6557_s5 + $0xa0] sm:$0xff] }
 0x3bd   :  { %824 = vmatmul.bf16.gmra.mxu2 %v4853_v35 }
 0x3cd   :  { %829 = vmatmul.bf16.gmra.mxu2 %v4854_v36  ;;  %v4896_v36 = vld [vmem:[%s6558_s6 + $0x28] sm:$0xff] }
 0x3ce   :  { %1751 = vmatpush.bf16.msra.mxu3 %v4896_v36 }
 0x3dd   :  { %834 = vmatmul.bf16.gmra.mxu2 %v4855_v38  ;;  %v4895_v38 = vld [vmem:[%s6558_s6 + $0x20] sm:$0xff] }
 0x3de   :  { %1752 = vmatpush.bf16.msra.mxu3 %v4895_v38 }
 0x3ed   :  { %839 = vmatmul.bf16.gmra.mxu2 %v4856_v39 }
 0x3fa   :  { %v785_v19 = vpop.f32.mrf.mxu0 }
 0x3fb   :  { %v935_v12 = vpack.c.bf16 %v785_v19, %v785_v19 }
 0x3fd   :  { %996 = vst.msk [vmem:[#allocation2] sm:$0xf] %vm995_vm8, %v935_v12  ;;  %844 = vmatmul.bf16.gmra.mxu2 %v4857_v43  ;;  %v4894_v12 = vld [vmem:[%s6558_s6 + $0x18] sm:$0xff] }
 0x3fe   :  { %1753 = vmatpush.bf16.msra.mxu3 %v4894_v12 }
 0x400   :  { %v805_v14 = vpop.f32.mrf.mxu2 }
 0x401   :  { %v943_v44 = vpack.c.bf16 %v805_v14, %v805_v14  ;;  %v4893_v14 = vld [vmem:[%s6558_s6 + $0x10] sm:$0xff] }
 0x402   :  { %v787_v45 = vpop.f32.mrf.mxu0  ;;  %1754 = vmatpush.bf16.msra.mxu3 %v4893_v14 }
 0x403   :  { %1021 = vst.msk [vmem:[#allocation2 + $0x4] sm:$0xf] %vm995_vm8, %v943_v44  ;;  %v936_v46 = vpack.c.bf16 %v787_v45, %v787_v45 }
 0x405   :  { %997 = vst.msk [vmem:[#allocation2 + $0x20] sm:$0xf] %vm995_vm8, %v936_v46 }
 0x408   :  { %v807_v47 = vpop.f32.mrf.mxu2 }
 0x409   :  { %v944_v48 = vpack.c.bf16 %v807_v47, %v807_v47  ;;  %v4866_v47 = vld [vmem:[%s6557_s5 + $0xa8] sm:$0xff] }
 0x40a   :  { %v790_v51 = vpop.f32.mrf.mxu0 }
 0x40b   :  { %1022 = vst.msk [vmem:[#allocation2 + $0x24] sm:$0xf] %vm995_vm8, %v944_v48  ;;  %v937_v52 = vpack.c.bf16 %v790_v51, %v790_v51  ;;  %v4892_v48 = vld [vmem:[%s6558_s6 + $0x8] sm:$0xff] }
 0x40c   :  { %1755 = vmatpush.bf16.msra.mxu3 %v4892_v48 }
 0x40d   :  { %998 = vst.msk [vmem:[#allocation2 + $0x40] sm:$0xf] %vm995_vm8, %v937_v52  ;;  %849 = vmatmul.bf16.gmra.mxu2 %v4858_v50  ;;  %v4891_v50 = vld [vmem:[%s6558_s6] sm:$0xff] }
 0x410   :  { %v810_v53 = vpop.f32.mrf.mxu2  ;;  %1756 = vmatpush.bf16.msra.mxu3 %v4891_v50 }
 0x411   :  { %v945_v54 = vpack.c.bf16 %v810_v53, %v810_v53 }
 0x412   :  { %v792_v55 = vpop.f32.mrf.mxu0 }
 0x413   :  { %1023 = vst.msk [vmem:[#allocation2 + $0x44] sm:$0xf] %vm995_vm8, %v945_v54  ;;  %v938_v56 = vpack.c.bf16 %v792_v55, %v792_v55  ;;  %v4914_v55 = vld [vmem:[%s6558_s6 + $0xb8] sm:$0xff] }
 0x414   :  { %1787 = vmatpush.bf16.msrb.mxu3 %v4914_v55 }
 0x415   :  { %999 = vst.msk [vmem:[#allocation2 + $0x60] sm:$0xf] %vm995_vm8, %v938_v56 }
 0x418   :  { %v812_v57 = vpop.f32.mrf.mxu2 }
 0x419   :  { %v946_v58 = vpack.c.bf16 %v812_v57, %v812_v57  ;;  %v4913_v57 = vld [vmem:[%s6558_s6 + $0xb0] sm:$0xff] }
 0x41a   :  { %v795_v60 = vpop.f32.mrf.mxu0  ;;  %1788 = vmatpush.bf16.msrb.mxu3 %v4913_v57 }
 0x41b   :  { %1024 = vst.msk [vmem:[#allocation2 + $0x64] sm:$0xf] %vm995_vm8, %v946_v58  ;;  %v939_v61 = vpack.c.bf16 %v795_v60, %v795_v60  ;;  %v4867_v60 = vld [vmem:[%s6557_s5 + $0xb0] sm:$0xff] }
 0x41d   :  { %854 = vmatmul.bf16.gmra.mxu2 %v4859_v59  ;;  %1004 = vrot.lane.b32.xlu2 %v939_v61, %s5255_s20  ;;  %v4906_v61 = vld [vmem:[%s6558_s6 + $0x78] sm:$0xff] }
 0x41e   :  { %1768 = vmatpush.bf16.msra.mxu1 %v4906_v61 }
 0x420   :  { %v815_v62 = vpop.f32.mrf.mxu2 }
 0x421   :  { %v947_v8 = vpack.c.bf16 %v815_v62, %v815_v62  ;;  %v4912_v62 = vld [vmem:[%s6558_s6 + $0xa8] sm:$0xff] }
 0x422   :  { %v797_v63 = vpop.f32.mrf.mxu0  ;;  %1789 = vmatpush.bf16.msrb.mxu3 %v4912_v62 }
 0x423   :  { %v940_v0 = vpack.c.bf16 %v797_v63, %v797_v63  ;;  %v4905_v63 = vld [vmem:[%s6558_s6 + $0x70] sm:$0xff] }
 0x424   :  { %1769 = vmatpush.bf16.msra.mxu1 %v4905_v63 }
 0x425   :  { %1006 = vrot.lane.b32.xlu2 %v940_v0, %s5255_s20  ;;  %v4911_v0 = vld [vmem:[%s6558_s6 + $0xa0] sm:$0xff] }
 0x426   :  { %1790 = vmatpush.bf16.msrb.mxu3 %v4911_v0 }
 0x428   :  { %v817_v1 = vpop.f32.mrf.mxu2 }
 0x429   :  { %v948_v32 = vpack.c.bf16 %v817_v1, %v817_v1 }
 0x42a   :  { %v800_v4 = vpop.f32.mrf.mxu0 }
 0x42b   :  { %v941_v5 = vpack.c.bf16 %v800_v4, %v800_v4 }
 0x42d   :  { %859 = vmatmul.bf16.gmra.mxu2 %v4860_v3  ;;  %1008 = vrot.lane.b32.xlu0 %v941_v5, %s5255_s20  ;;  %v4904_v5 = vld [vmem:[%s6558_s6 + $0x68] sm:$0xff] }
 0x42e   :  { %1770 = vmatpush.bf16.msra.mxu1 %v4904_v5 }
 0x430   :  { %v820_v6 = vpop.f32.mrf.mxu2 }
 0x431   :  { %v949_v16 = vpack.c.bf16 %v820_v6, %v820_v6  ;;  %v4910_v6 = vld [vmem:[%s6558_s6 + $0x98] sm:$0xff] }
 0x432   :  { %v802_v7 = vpop.f32.mrf.mxu0  ;;  %1791 = vmatpush.bf16.msrb.mxu3 %v4910_v6 }
 0x433   :  { %v942_v9 = vpack.c.bf16 %v802_v7, %v802_v7  ;;  %v4903_v7 = vld [vmem:[%s6558_s6 + $0x60] sm:$0xff] }
 0x434   :  { %1771 = vmatpush.bf16.msra.mxu1 %v4903_v7 }
 0x435   :  { %1029 = vrot.lane.b32.xlu0 %v947_v8, %s5255_s20  ;;  %1010 = vrot.lane.b32.xlu1 %v942_v9, %s5255_s20  ;;  %v4909_v8 = vld [vmem:[%s6558_s6 + $0x90] sm:$0xff] }
 0x436   :  { %1792 = vmatpush.bf16.msrb.mxu3 %v4909_v8 }
 0x438   :  { %v822_v10 = vpop.f32.mrf.mxu2 }
 0x439   :  { %v950_v35 = vpack.c.bf16 %v822_v10, %v822_v10 }
 0x43d   :  { %864 = vmatmul.bf16.gmra.mxu2 %v4861_v11 }
 0x440   :  { %v825_v18 = vpop.f32.mrf.mxu2 }
 0x441   :  { %v951_v21 = vpack.c.bf16 %v825_v18, %v825_v18  ;;  %v4868_v18 = vld [vmem:[%s6557_s5 + $0xb8] sm:$0xff] }
 0x443   :  { %1045 = vst.msk [vmem:[#allocation2 + $0x8] sm:$0xf] %vm995_vm8, %v951_v21  ;;  %v4902_v21 = vld [vmem:[%s6558_s6 + $0x58] sm:$0xff] }
 0x444   :  { %1772 = vmatpush.bf16.msra.mxu1 %v4902_v21 }
 0x448   :  { %v827_v22 = vpop.f32.mrf.mxu2 }
 0x449   :  { %v952_v17 = vpack.c.bf16 %v827_v22, %v827_v22  ;;  %v4908_v22 = vld [vmem:[%s6558_s6 + $0x88] sm:$0xff] }
 0x44a   :  { %1793 = vmatpush.bf16.msrb.mxu3 %v4908_v22 }
 0x44b   :  { %1046 = vst.msk [vmem:[#allocation2 + $0x28] sm:$0xf] %vm995_vm8, %v952_v17  ;;  %v4901_v17 = vld [vmem:[%s6558_s6 + $0x50] sm:$0xff] }
 0x44c   :  { %1773 = vmatpush.bf16.msra.mxu1 %v4901_v17  ;;  %v4930_v17 = vld [vmem:[%s6558_s6 + $0x138] sm:$0xff] }
 0x44d   :  { %869 = vmatmul.bf16.gmra.mxu2 %v4862_v20 }
 0x450   :  { %v830_v23 = vpop.f32.mrf.mxu2 }
 0x451   :  { %v953_v24 = vpack.c.bf16 %v830_v23, %v830_v23  ;;  %v4907_v23 = vld [vmem:[%s6558_s6 + $0x80] sm:$0xff] }
 0x452   :  { %1794 = vmatpush.bf16.msrb.mxu3 %v4907_v23 }
 0x453   :  { %1047 = vst.msk [vmem:[#allocation2 + $0x48] sm:$0xf] %vm995_vm8, %v953_v24 }
 0x458   :  { %v832_v13 = vpop.f32.mrf.mxu2 }
 0x459   :  { %v954_v15 = vpack.c.bf16 %v832_v13, %v832_v13 }
 0x45b   :  { %1048 = vst.msk [vmem:[#allocation2 + $0x68] sm:$0xf] %vm995_vm8, %v954_v15 }
 0x45d   :  { %874 = vmatmul.bf16.gmra.mxu2 %v4863_v26  ;;  %v4900_v26 = vld [vmem:[%s6558_s6 + $0x48] sm:$0xff] }
 0x45e   :  { %1774 = vmatpush.bf16.msra.mxu1 %v4900_v26 }
 0x460   :  { %v835_v27 = vpop.f32.mrf.mxu2 }
 0x461   :  { %v955_v29 = vpack.c.bf16 %v835_v27, %v835_v27  ;;  %v4899_v27 = vld [vmem:[%s6558_s6 + $0x40] sm:$0xff] }
 0x462   :  { %1775 = vmatpush.bf16.msra.mxu1 %v4899_v27  ;;  %v4921_v27 = vld [vmem:[%s6558_s6 + $0xf0] sm:$0xff] }
 0x463   :  { %1053 = vrot.lane.b32.xlu2 %v955_v29, %s5255_s20 }
 0x468   :  { %v837_v30 = vpop.f32.mrf.mxu2 }
 0x469   :  { %v956_v33 = vpack.c.bf16 %v837_v30, %v837_v30  ;;  %v4869_v30 = vld [vmem:[%s6557_s5 + $0xc0] sm:$0xff] }
 0x46b   :  { %1055 = vrot.lane.b32.xlu2 %v956_v33, %s5255_s20 }
 0x46d   :  { %879 = vmatmul.bf16.gmra.mxu2 %v4864_v31 }
 0x470   :  { %v840_v34 = vpop.f32.mrf.mxu2 }
 0x471   :  { %v957_v41 = vpack.c.bf16 %v840_v34, %v840_v34 }
 0x473   :  { %1031 = vrot.lane.b32.xlu2 %v948_v32, %s5255_s20  ;;  %1057 = vrot.lane.b32.xlu1 %v957_v41, %s5255_s20 }
 0x477   :  { %v1005_v39 = vpop.permute.xlu2 %1004 }
 0x478   :  { %v842_v28 = vpop.f32.mrf.mxu2  ;;  %1017 = vst.msk [vmem:[#allocation2] sm:$0xf] %vm1016_vm9, %v1005_v39 }
 0x479   :  { %v958_v40 = vpack.c.bf16 %v842_v28, %v842_v28 }
 0x47b   :  { %1033 = vrot.lane.b32.xlu2 %v949_v16, %s5255_s20  ;;  %1059 = vrot.lane.b32.xlu0 %v958_v40, %s5255_s20 }
 0x47c   :  { %1035 = vrot.lane.b32.xlu1 %v950_v35, %s5255_s20 }
 0x47d   :  { %884 = vmatmul.bf16.gmra.mxu2 %v4865_v42 }
 0x47f   :  { %v1007_v44 = vpop.permute.xlu2 %1006  ;;  %v3909_v53 = vld [vmem:[#allocation2] sm:$0xf] }
 0x480   :  { %v845_v43 = vpop.f32.mrf.mxu2  ;;  %1018 = vst.msk [vmem:[#allocation2 + $0x20] sm:$0xf] %vm1016_vm9, %v1007_v44  ;;  %v4871_v44 = vld [vmem:[%s6557_s5 + $0xd0] sm:$0xff] }
 0x481   :  { %v959_v19 = vpack.c.bf16 %v845_v43, %v845_v43 }
 0x483   :  { %1069 = vst.msk [vmem:[#allocation2 + $0xc] sm:$0xf] %vm995_vm8, %v959_v19 }
 0x487   :  { %v4879_v54 = vld [vmem:[#allocation2 + $0x1c] sm:$0xf0] }
 0x488   :  { %v847_v45 = vpop.f32.mrf.mxu2  ;;  %v3910_v56 = vor.u32 %v4879_v54, %v3909_v53 }
 0x489   :  { %v960_v46 = vpack.c.bf16 %v847_v45, %v847_v45 }
 0x48a   :  { %1757 = vmatmul.bf16.vlgmr.msra.gmra.mxu3 %v3910_v56 }
 0x48b   :  { %1070 = vst.msk [vmem:[#allocation2 + $0x2c] sm:$0xf] %vm995_vm8, %v960_v46  ;;  %1825 = vmatpush.bf16.msra.mxu3 %v4930_v17 }
 0x48d   :  { %889 = vmatmul.bf16.gmra.mxu2 %v4866_v47 }
 0x490   :  { %v850_v51 = vpop.f32.mrf.mxu2 }
 0x491   :  { %v961_v52 = vpack.c.bf16 %v850_v51, %v850_v51 }
 0x493   :  { %1071 = vst.msk [vmem:[#allocation2 + $0x4c] sm:$0xf] %vm995_vm8, %v961_v52  ;;  %v4872_v52 = vld [vmem:[%s6557_s5 + $0xd8] sm:$0xff] }
 0x498   :  { %v852_v58 = vpop.f32.mrf.mxu2 }
 0x499   :  { %v962_v59 = vpack.c.bf16 %v852_v58, %v852_v58 }
 0x49b   :  { %1072 = vst.msk [vmem:[#allocation2 + $0x6c] sm:$0xf] %vm995_vm8, %v962_v59 }
 0x49d   :  { %894 = vmatmul.bf16.gmra.mxu2 %v4867_v60 }
 0x49f   :  { %v1009_v1 = vpop.permute.xlu0 %1008 }
 0x4a0   :  { %1019 = vst.msk [vmem:[#allocation2 + $0x40] sm:$0xf] %vm1016_vm9, %v1009_v1  ;;  %v855_v3 = vpop.f32.mrf.mxu2 }
 0x4a1   :  { %v963_v4 = vpack.c.bf16 %v855_v3, %v855_v3 }
 0x4a3   :  { %1077 = vrot.lane.b32.xlu1 %v963_v4, %s5255_s20 }
 0x4a7   :  { %v1030_v9 = vpop.permute.xlu0 %1029  ;;  %v1011_v10 = vpop.permute.xlu1 %1010  ;;  %v3941_v20 = vld [vmem:[#allocation2 + $0x40] sm:$0xf] }
 0x4a8   :  { %1041 = vst.msk [vmem:[#allocation2 + $0x4] sm:$0xf] %vm1016_vm9, %v1030_v9  ;;  %v5785_v11 = vpop.f32.mrf.mxu2 }
 0x4a9   :  { %1020 = vst.msk [vmem:[#allocation2 + $0x60] sm:$0xf] %vm1016_vm9, %v1011_v10  ;;  %v964_v50 = vpack.c.bf16 %v5785_v11, %v5785_v11 }
 0x4ad   :  { %899 = vmatmul.bf16.gmra.mxu2 %v4868_v18 }
 0x4af   :  { %v4875_v39 = vld [vmem:[#allocation2 + $0x4] sm:$0xf] }
 0x4b0   :  { %v5803_v24 = vpop.f32.mrf.mxu2  ;;  %v4887_v13 = vld [vmem:[#allocation2 + $0x5c] sm:$0xf0] }
 0x4b1   :  { %v3942_v15 = vor.u32 %v4887_v13, %v3941_v20  ;;  %v965_v56 = vpack.c.bf16 %v5803_v24, %v5803_v24  ;;  %v4929_v20 = vld [vmem:[%s6558_s6 + $0x130] sm:$0xff]  ;;  %v4873_v24 = vld [vmem:[%s6557_s5 + $0xe0] sm:$0xff]  ;;  %v4922_v13 = vld [vmem:[%s6558_s6 + $0xf8] sm:$0xff] }
 0x4b2   :  { %1826 = vmatpush.bf16.msra.mxu3 %v4929_v20  ;;  %1806 = vmatpush.bf16.msrb.mxu1 %v4922_v13 }
 0x4b3   :  { %1762 = vmatmul.bf16.gmra.mxu3 %v3942_v15  ;;  %v4928_v15 = vld [vmem:[%s6558_s6 + $0x128] sm:$0xff] }
 0x4b6   :  { %1827 = vmatpush.bf16.msra.mxu3 %v4928_v15  ;;  %1807 = vmatpush.bf16.msrb.mxu1 %v4921_v27 }
 0x4b8   :  { %v5811_v29 = vpop.f32.mrf.mxu2 }
 0x4b9   :  { %v966_v1 = vpack.c.bf16 %v5811_v29, %v5811_v29  ;;  %v4927_v29 = vld [vmem:[%s6558_s6 + $0x120] sm:$0xff] }
 0x4ba   :  { %1828 = vmatpush.bf16.msra.mxu3 %v4927_v29 }
 0x4bd   :  { %904 = vmatmul.bf16.gmra.mxu2 %v4869_v30  ;;  %v1054_v33 = vpop.permute.xlu2 %1053 }
 0x4be   :  { %1065 = vst.msk [vmem:[#allocation2 + $0x8] sm:$0xf] %vm1016_vm9, %v1054_v33  ;;  %v4920_v33 = vld [vmem:[%s6558_s6 + $0xe8] sm:$0xff] }
 0x4bf   :  { %1808 = vmatpush.bf16.msrb.mxu1 %v4920_v33 }
 0x4c0   :  { %v865_v31 = vpop.f32.mrf.mxu2 }
 0x4c1   :  { %v967_v34 = vpack.c.bf16 %v865_v31, %v865_v31  ;;  %v4926_v31 = vld [vmem:[%s6558_s6 + $0x118] sm:$0xff] }
 0x4c2   :  { %1829 = vmatpush.bf16.msra.mxu3 %v4926_v31  ;;  %v4937_v31 = vld [vmem:[%s6558_s6 + $0x170] sm:$0xff] }
 0x4c3   :  { %1093 = vst.msk [vmem:[#allocation2 + $0x10] sm:$0xf] %vm995_vm8, %v967_v34  ;;  %v4919_v34 = vld [vmem:[%s6558_s6 + $0xe0] sm:$0xff] }
 0x4c4   :  { %1809 = vmatpush.bf16.msrb.mxu1 %v4919_v34  ;;  %v4945_v34 = vld [vmem:[%s6558_s6 + $0x1b0] sm:$0xff] }
 0x4c5   :  { %v1056_v32 = vpop.permute.xlu2 %1055  ;;  %v3917_v16 = vld [vmem:[#allocation2 + $0x8] sm:$0xf] }
 0x4c6   :  { %1066 = vst.msk [vmem:[#allocation2 + $0x28] sm:$0xf] %vm1016_vm9, %v1056_v32 }
 0x4c8   :  { %v867_v41 = vpop.f32.mrf.mxu2 }
 0x4c9   :  { %v968_v37 = vpack.c.bf16 %v867_v41, %v867_v41  ;;  %v4925_v41 = vld [vmem:[%s6558_s6 + $0x110] sm:$0xff] }
 0x4ca   :  { %1830 = vmatpush.bf16.msra.mxu3 %v4925_v41  ;;  %v4936_v41 = vld [vmem:[%s6558_s6 + $0x168] sm:$0xff] }
 0x4cb   :  { %1094 = vst.msk [vmem:[#allocation2 + $0x30] sm:$0xf] %vm995_vm8, %v968_v37 }
 0x4cd   :  { %909 = vmatmul.bf16.gmra.mxu2 %v4870_v25  ;;  %v1032_v28 = vpop.permute.xlu2 %1031  ;;  %v4880_v40 = vld [vmem:[#allocation2 + $0x24] sm:$0xf0] }
 0x4ce   :  { %1042 = vst.msk [vmem:[#allocation2 + $0x24] sm:$0xf] %vm1016_vm9, %v1032_v28  ;;  %v3918_v42 = vor.u32 %v4880_v40, %v3917_v16  ;;  %v4874_v25 = vld [vmem:[%s6557_s5 + $0xe8] sm:$0xff]  ;;  %v4918_v28 = vld [vmem:[%s6558_s6 + $0xd8] sm:$0xff]  ;;  %v4917_v40 = vld [vmem:[%s6558_s6 + $0xd0] sm:$0xff] }
 0x4cf   :  { %v4924_v16 = vld [vmem:[%s6558_s6 + $0x108] sm:$0xff]  ;;  %1810 = vmatpush.bf16.msrb.mxu1 %v4918_v28 }
 0x4d0   :  { %v870_v35 = vpop.f32.mrf.mxu2  ;;  %1795 = vmatmul.bf16.vlgmr.msrb.gmra.mxu3 %v3918_v42  ;;  %v4923_v42 = vld [vmem:[%s6558_s6 + $0x100] sm:$0xff] }
 0x4d1   :  { %v969_v36 = vpack.c.bf16 %v870_v35, %v870_v35  ;;  %1831 = vmatpush.bf16.msra.mxu3 %v4924_v16 }
 0x4d3   :  { %1095 = vst.msk [vmem:[#allocation2 + $0x50] sm:$0xf] %vm995_vm8, %v969_v36  ;;  %1811 = vmatpush.bf16.msrb.mxu1 %v4917_v40  ;;  %v4935_v40 = vld [vmem:[%s6558_s6 + $0x160] sm:$0xff] }
 0x4d5   :  { %v1034_v38 = vpop.permute.xlu2 %1033  ;;  %v3911_v43 = vld [vmem:[#allocation2 + $0x20] sm:$0xf0]  ;;  %1832 = vmatpush.bf16.msra.mxu3 %v4923_v42 }
 0x4d6   :  { %1043 = vst.msk [vmem:[#allocation2 + $0x44] sm:$0xf] %vm1016_vm9, %v1034_v38  ;;  %v3914_v19 = vor.u32 %v4875_v39, %v3911_v43  ;;  %v4916_v39 = vld [vmem:[%s6558_s6 + $0xc8] sm:$0xff]  ;;  %v4943_v42 = vld [vmem:[%s6558_s6 + $0x1a0] sm:$0xff] }
 0x4d7   :  { %1812 = vmatpush.bf16.msrb.mxu1 %v4916_v39  ;;  %v4934_v39 = vld [vmem:[%s6558_s6 + $0x158] sm:$0xff] }
 0x4d8   :  { %v872_v12 = vpop.f32.mrf.mxu2  ;;  %1776 = vmatmul.bf16.vlgmr.msra.gmra.mxu1 %v3914_v19  ;;  %v4915_v19 = vld [vmem:[%s6558_s6 + $0xc0] sm:$0xff] }
 0x4d9   :  { %v970_v14 = vpack.c.bf16 %v872_v12, %v872_v12 }
 0x4db   :  { %1096 = vst.msk [vmem:[#allocation2 + $0x70] sm:$0xf] %vm995_vm8, %v970_v14  ;;  %1813 = vmatpush.bf16.msrb.mxu1 %v4915_v19 }
 0x4dd   :  { %914 = vmatmul.bf16.gmra.mxu2 %v4871_v44  ;;  %v4883_v60 = vld [vmem:[#allocation2 + $0x44] sm:$0xf] }
 0x4e0   :  { %v875_v45 = vpop.f32.mrf.mxu2 }
 0x4e1   :  { %v971_v46 = vpack.c.bf16 %v875_v45, %v875_v45 }
 0x4e3   :  { %1101 = vrot.lane.b32.xlu0 %v971_v46, %s5255_s20 }
 0x4e5   :  { %v1058_v47 = vpop.permute.xlu1 %1057 }
 0x4e6   :  { %1067 = vst.msk [vmem:[#allocation2 + $0x48] sm:$0xf] %vm1016_vm9, %v1058_v47 }
 0x4e8   :  { %v877_v48 = vpop.f32.mrf.mxu2 }
 0x4e9   :  { %v972_v51 = vpack.c.bf16 %v877_v48, %v877_v48 }
 0x4eb   :  { %1103 = vrot.lane.b32.xlu2 %v972_v51, %s5255_s20  ;;  %1079 = vrot.lane.b32.xlu0 %v964_v50, %s5255_s20 }
 0x4ed   :  { %919 = vmatmul.bf16.gmra.mxu2 %v4872_v52  ;;  %v1060_v53 = vpop.permute.xlu0 %1059  ;;  %v3949_v58 = vld [vmem:[#allocation2 + $0x48] sm:$0xf] }
 0x4ee   :  { %1068 = vst.msk [vmem:[#allocation2 + $0x68] sm:$0xf] %vm1016_vm9, %v1060_v53  ;;  %v1036_v54 = vpop.permute.xlu1 %1035 }
 0x4ef   :  { %1044 = vst.msk [vmem:[#allocation2 + $0x64] sm:$0xf] %vm1016_vm9, %v1036_v54 }
 0x4f0   :  { %v880_v55 = vpop.f32.mrf.mxu2 }
 0x4f1   :  { %v973_v57 = vpack.c.bf16 %v880_v55, %v880_v55 }
 0x4f3   :  { %1105 = vrot.lane.b32.xlu2 %v973_v57, %s5255_s20  ;;  %1081 = vrot.lane.b32.xlu0 %v965_v56, %s5255_s20 }
 0x4f5   :  { %v4888_v59 = vld [vmem:[#allocation2 + $0x64] sm:$0xf0] }
 0x4f6   :  { %v3943_v61 = vld [vmem:[#allocation2 + $0x60] sm:$0xf0]  ;;  %v3950_v62 = vor.u32 %v4888_v59, %v3949_v58 }
 0x4f7   :  { %v3946_v63 = vor.u32 %v4883_v60, %v3943_v61 }
 0x4f8   :  { %v882_v0 = vpop.f32.mrf.mxu2  ;;  %1800 = vmatmul.bf16.gmra.mxu3 %v3950_v62 }
 0x4f9   :  { %v974_v3 = vpack.c.bf16 %v882_v0, %v882_v0  ;;  %1781 = vmatmul.bf16.gmra.mxu1 %v3946_v63 }
 0x4fb   :  { %1083 = vrot.lane.b32.xlu2 %v966_v1, %s5255_s20  ;;  %1107 = vrot.lane.b32.xlu1 %v974_v3, %s5255_s20  ;;  %v4938_v1 = vld [vmem:[%s6558_s6 + $0x178] sm:$0xff] }
 0x4fc   :  { %v4946_v3 = vld [vmem:[%s6558_s6 + $0x1b8] sm:$0xff]  ;;  %1844 = vmatpush.bf16.msra.mxu1 %v4938_v1 }
 0x4fd   :  { %924 = vmatmul.bf16.gmra.mxu2 %v4873_v24  ;;  %1863 = vmatpush.bf16.msrb.mxu3 %v4946_v3 }
 0x500   :  { %v885_v4 = vpop.f32.mrf.mxu2  ;;  %1845 = vmatpush.bf16.msra.mxu1 %v4937_v31 }
 0x501   :  { %v975_v5 = vpack.c.bf16 %v885_v4, %v885_v4  ;;  %1864 = vmatpush.bf16.msrb.mxu3 %v4945_v34 }
 0x503   :  { %1117 = vst.msk [vmem:[#allocation2 + $0x14] sm:$0xf] %vm995_vm8, %v975_v5 }
 0x504   :  { %1846 = vmatpush.bf16.msra.mxu1 %v4936_v41 }
 0x508   :  { %v887_v6 = vpop.f32.mrf.mxu2  ;;  %1847 = vmatpush.bf16.msra.mxu1 %v4935_v40 }
 0x509   :  { %v976_v7 = vpack.c.bf16 %v887_v6, %v887_v6 }
 0x50b   :  { %1118 = vst.msk [vmem:[#allocation2 + $0x34] sm:$0xf] %vm995_vm8, %v976_v7 }
 0x50c   :  { %1848 = vmatpush.bf16.msra.mxu1 %v4934_v39 }
 0x50d   :  { %v5872_v26 = vpop.f32.mrf.mxu3  ;;  %929 = vmatmul.bf16.gmra.mxu2 %v4874_v25  ;;  %v4949_v25 = vld [vmem:[%s6558_s6 + $0x1d0] sm:$0xff] }
 0x510   :  { %v890_v8 = vpop.f32.mrf.mxu2 }
 0x511   :  { %v977_v9 = vpack.c.bf16 %v890_v8, %v890_v8 }
 0x513   :  { %1119 = vst.msk [vmem:[#allocation2 + $0x54] sm:$0xf] %vm995_vm8, %v977_v9 }
 0x515   :  { %v1078_v10 = vpop.permute.xlu1 %1077  ;;  %v1760_v32 = vpop.f32.mrf.mxu3 }
 0x516   :  { %1089 = vst.msk [vmem:[#allocation2 + $0xc] sm:$0xf] %vm1016_vm9, %v1078_v10 }
 0x518   :  { %v892_v11 = vpop.f32.mrf.mxu2 }
 0x519   :  { %v978_v18 = vpack.c.bf16 %v892_v11, %v892_v11 }
 0x51b   :  { %1120 = vst.msk [vmem:[#allocation2 + $0x74] sm:$0xf] %vm995_vm8, %v978_v18 }
 0x51d   :  { %v4876_v5 = vld [vmem:[#allocation2 + $0xc] sm:$0xf] }
 0x520   :  { %v895_v21 = vpop.f32.mrf.mxu2 }
 0x521   :  { %v979_v22 = vpack.c.bf16 %v895_v21, %v895_v21 }
 0x523   :  { %1125 = vrot.lane.b32.xlu2 %v979_v22, %s5255_s20 }
 0x528   :  { %v5861_v23 = vpop.f32.mrf.mxu2 }
 0x529   :  { %v980_v9 = vpack.c.bf16 %v5861_v23, %v5861_v23 }
 0x530   :  { %v5880_v30 = vpop.f32.mrf.mxu2 }
 0x531   :  { %v981_v21 = vpack.c.bf16 %v5880_v30, %v5880_v30 }
 0x536   :  { %v5911_v36 = vpop.f32.mrf.mxu3 }
 0x538   :  { %v5894_v37 = vpop.f32.mrf.mxu2 }
 0x539   :  { %v982_v29 = vpack.c.bf16 %v5894_v37, %v5894_v37  ;;  %v4944_v37 = vld [vmem:[%s6558_s6 + $0x1a8] sm:$0xff] }
 0x53a   :  { %1865 = vmatpush.bf16.msrb.mxu3 %v4944_v37 }
 0x53e   :  { %v5921_v44 = vpop.f32.mrf.mxu3  ;;  %1866 = vmatpush.bf16.msrb.mxu3 %v4943_v42 }
 0x540   :  { %v905_v35 = vpop.f32.mrf.mxu2 }
 0x541   :  { %v983_v38 = vpack.c.bf16 %v905_v35, %v905_v35  ;;  %v4948_v35 = vld [vmem:[%s6558_s6 + $0x1c8] sm:$0xff] }
 0x543   :  { %1141 = vst.msk [vmem:[#allocation2 + $0x18] sm:$0xf] %vm995_vm8, %v983_v38 }
 0x545   :  { %v1104_v43 = vpop.permute.xlu2 %1103 }
 0x546   :  { %1114 = vst.msk [vmem:[#allocation2 + $0x30] sm:$0xf] %vm1016_vm9, %v1104_v43  ;;  %v4942_v43 = vld [vmem:[%s6558_s6 + $0x198] sm:$0xff] }
 0x547   :  { %1867 = vmatpush.bf16.msrb.mxu3 %v4942_v43 }
 0x548   :  { %v907_v12 = vpop.f32.mrf.mxu2 }
 0x549   :  { %v984_v14 = vpack.c.bf16 %v907_v12, %v907_v12  ;;  %v4947_v12 = vld [vmem:[%s6558_s6 + $0x1c0] sm:$0xff] }
 0x54b   :  { %1142 = vst.msk [vmem:[#allocation2 + $0x38] sm:$0xf] %vm995_vm8, %v984_v14  ;;  %v4933_v14 = vld [vmem:[%s6558_s6 + $0x150] sm:$0xff] }
 0x54c   :  { %1849 = vmatpush.bf16.msra.mxu1 %v4933_v14 }
 0x54d   :  { %v1106_v45 = vpop.permute.xlu2 %1105  ;;  %v4881_v59 = vld [vmem:[#allocation2 + $0x2c] sm:$0xf0] }
 0x54e   :  { %1115 = vst.msk [vmem:[#allocation2 + $0x50] sm:$0xf] %vm1016_vm9, %v1106_v45  ;;  %v4941_v45 = vld [vmem:[%s6558_s6 + $0x190] sm:$0xff] }
 0x54f   :  { %1868 = vmatpush.bf16.msrb.mxu3 %v4941_v45 }
 0x550   :  { %v910_v46 = vpop.f32.mrf.mxu2 }
 0x551   :  { %v985_v47 = vpack.c.bf16 %v910_v46, %v910_v46 }
 0x553   :  { %1143 = vst.msk [vmem:[#allocation2 + $0x58] sm:$0xf] %vm995_vm8, %v985_v47  ;;  %v5926_v48 = vpop.f32.mrf.mxu3 }
 0x555   :  { %v1084_v50 = vpop.permute.xlu2 %1083  ;;  %v5928_v51 = vpop.f32.mrf.mxu1  ;;  %v3957_v20 = vld [vmem:[#allocation2 + $0x50] sm:$0xf] }
 0x556   :  { %1092 = vst.msk [vmem:[#allocation2 + $0x6c] sm:$0xf] %vm1016_vm9, %v1084_v50  ;;  %v1102_v52 = vpop.permute.xlu0 %1101  ;;  %v4932_v50 = vld [vmem:[%s6558_s6 + $0x148] sm:$0xff] }
 0x557   :  { %1113 = vst.msk [vmem:[#allocation2 + $0x10] sm:$0xf] %vm1016_vm9, %v1102_v52  ;;  %v4940_v52 = vld [vmem:[%s6558_s6 + $0x188] sm:$0xff]  ;;  %1850 = vmatpush.bf16.msra.mxu1 %v4932_v50 }
 0x558   :  { %v912_v53 = vpop.f32.mrf.mxu2  ;;  %1869 = vmatpush.bf16.msrb.mxu3 %v4940_v52 }
 0x559   :  { %v986_v54 = vpack.c.bf16 %v912_v53, %v912_v53 }
 0x55b   :  { %1144 = vst.msk [vmem:[#allocation2 + $0x78] sm:$0xf] %vm995_vm8, %v986_v54  ;;  %v1798_v60 = vpop.f32.mrf.mxu3 }
 0x55d   :  { %v1779_v55 = vpop.f32.mrf.mxu1  ;;  %v3951_v24 = vld [vmem:[#allocation2 + $0x68] sm:$0xf0] }
 0x55e   :  { %v1780_v56 = vadd.f32 %v1779_v55, %v1760_v32  ;;  %v1080_v57 = vpop.permute.xlu0 %1079  ;;  %v3925_v58 = vld [vmem:[#allocation2 + $0x10] sm:$0xf]  ;;  %v4950_v32 = vld [vmem:[%s6558_s6 + $0x1d8] sm:$0xff] }
 0x55f   :  { %1090 = vst.msk [vmem:[#allocation2 + $0x2c] sm:$0xf] %vm1016_vm9, %v1080_v57  ;;  %v3926_v61 = vor.u32 %v4881_v59, %v3925_v58  ;;  %1886 = vmatpush.bf16.msra.mxu0 %v4950_v32  ;;  %v4939_v57 = vld [vmem:[%s6558_s6 + $0x180] sm:$0xff] }
 0x560   :  { %v915_v62 = vpop.f32.mrf.mxu2  ;;  %v5934_v63 = vadd.f32 %v1798_v60, %v1780_v56  ;;  %v4931_v56 = vld [vmem:[%s6558_s6 + $0x140] sm:$0xff]  ;;  %1870 = vmatpush.bf16.msrb.mxu3 %v4939_v57 }
 0x561   :  { %v987_v0 = vpack.c.bf16 %v915_v62, %v915_v62  ;;  %1833 = vmatmul.bf16.vlgmr.msra.gmra.mxu3 %v3926_v61  ;;  %1851 = vmatpush.bf16.msra.mxu1 %v4931_v56 }
 0x563   :  { %1149 = vrot.lane.b32.xlu1 %v987_v0, %s5255_s20  ;;  %1887 = vmatpush.bf16.msra.mxu0 %v4949_v25 }
 0x566   :  { %v1082_v4 = vpop.permute.xlu0 %1081  ;;  %v3919_v6 = vld [vmem:[#allocation2 + $0x28] sm:$0xf0] }
 0x567   :  { %1091 = vst.msk [vmem:[#allocation2 + $0x4c] sm:$0xf] %vm1016_vm9, %v1082_v4  ;;  %v3922_v7 = vor.u32 %v4876_v5, %v3919_v6  ;;  %1888 = vmatpush.bf16.msra.mxu0 %v4948_v35 }
 0x568   :  { %v917_v8 = vpop.f32.mrf.mxu2 }
 0x569   :  { %v988_v10 = vpack.c.bf16 %v917_v8, %v917_v8  ;;  %1814 = vmatmul.bf16.vlgmr.msrb.gmra.mxu1 %v3922_v7 }
 0x56b   :  { %1151 = vrot.lane.b32.xlu0 %v988_v10, %s5255_s20  ;;  %1127 = vrot.lane.b32.xlu1 %v980_v9, %s5255_s20 }
 0x56c   :  { %1889 = vmatpush.bf16.msra.mxu0 %v4947_v12 }
 0x56d   :  { %v1108_v11 = vpop.permute.xlu1 %1107 }
 0x56e   :  { %1116 = vst.msk [vmem:[#allocation2 + $0x70] sm:$0xf] %vm1016_vm9, %v1108_v11  ;;  %v4884_v17 = vld [vmem:[#allocation2 + $0x4c] sm:$0xf] }
 0x56f   :  { %v3954_v15 = vor.u32 %v4884_v17, %v3951_v24 }
 0x570   :  { %v920_v18 = vpop.f32.mrf.mxu2 }
 0x571   :  { %v989_v22 = vpack.c.bf16 %v920_v18, %v920_v18 }
 0x573   :  { %1153 = vrot.lane.b32.xlu0 %v989_v22, %s5255_s20  ;;  %1129 = vrot.lane.b32.xlu1 %v981_v21, %s5255_s20 }
 0x575   :  { %v4889_v23 = vld [vmem:[#allocation2 + $0x6c] sm:$0xf0] }
 0x576   :  { %v3958_v13 = vor.u32 %v4889_v23, %v3957_v20 }
 0x578   :  { %v922_v27 = vpop.f32.mrf.mxu2  ;;  %1838 = vmatmul.bf16.gmra.mxu3 %v3958_v13 }
 0x579   :  { %v990_v33 = vpack.c.bf16 %v922_v27, %v922_v27  ;;  %1819 = vmatmul.bf16.gmra.mxu1 %v3954_v15  ;;  %v1782_v15 = vpop.f32.mrf.mxu1 }
 0x57a   :  { %v1783_v12 = vadd.f32 %v1782_v15, %v5911_v36 }
 0x57b   :  { %1155 = vrot.lane.b32.xlu2 %v990_v33, %s5255_s20  ;;  %1131 = vrot.lane.b32.xlu0 %v982_v29, %s5255_s20  ;;  %v1801_v27 = vpop.f32.mrf.mxu3 }
 0x57c   :  { %v1802_v14 = vadd.f32 %v1801_v27, %v1783_v12 }
 0x57d   :  { %v1126_v30 = vpop.permute.xlu2 %1125 }
 0x57e   :  { %1137 = vst.msk [vmem:[#allocation2 + $0x14] sm:$0xf] %vm1016_vm9, %v1126_v30 }
 0x580   :  { %v925_v28 = vpop.f32.mrf.mxu2 }
 0x581   :  { %v991_v16 = vpack.c.bf16 %v925_v28, %v925_v28  ;;  %v1784_v29 = vpop.f32.mrf.mxu1 }
 0x582   :  { %v1785_v45 = vadd.f32 %v1784_v29, %v5921_v44 }
 0x583   :  { %1165 = vst.msk [vmem:[#allocation2 + $0x1c] sm:$0xf] %vm995_vm8, %v991_v16  ;;  %v1803_v33 = vpop.f32.mrf.mxu3 }
 0x584   :  { %v1804_v50 = vadd.f32 %v1803_v33, %v1785_v45  ;;  %v1909_v45 = vld [vmem:[%s6561_s8 + $0x18] sm:$0xff] }
 0x585   :  { %v4877_v9 = vld [vmem:[#allocation2 + $0x14] sm:$0xf] }
 0x588   :  { %v927_v38 = vpop.f32.mrf.mxu2 }
 0x589   :  { %v992_v19 = vpack.c.bf16 %v927_v38, %v927_v38 }
 0x58a   :  { %v4878_v47 = vld [vmem:[#allocation2 + $0x1c] sm:$0xf] }
 0x58b   :  { %1166 = vst.msk [vmem:[#allocation2 + $0x3c] sm:$0xf] %vm995_vm8, %v992_v19  ;;  %v1778_v19 = vadd.f32 %v5928_v51, %v5872_v26 }
 0x58d   :  { %v1797_v52 = vadd.f32 %v5926_v48, %v1778_v19 }
 0x590   :  { %v930_v46 = vpop.f32.mrf.mxu2 }
 0x591   :  { %v993_v53 = vpack.c.bf16 %v930_v46, %v930_v46 }
 0x592   :  { %v3935_v54 = vld [vmem:[#allocation2 + $0x38] sm:$0xf0] }
 0x593   :  { %1167 = vst.msk [vmem:[#allocation2 + $0x5c] sm:$0xf] %vm995_vm8, %v993_v53  ;;  %v3938_v55 = vor.u32 %v4878_v47, %v3935_v54 }
 0x595   :  { %4211 = vmatmul.msk.bf16.vlgmr.msra.gmra.mxu0 %vm145_vm0, %v3938_v55 }
 0x598   :  { %v932_v58 = vpop.f32.mrf.mxu2 }
 0x599   :  { %v994_v59 = vpack.c.bf16 %v932_v58, %v932_v58 }
 0x59a   :  { %v4886_v60 = vld [vmem:[#allocation2 + $0x5c] sm:$0xf] }
 0x59b   :  { %1168 = vst.msk [vmem:[#allocation2 + $0x7c] sm:$0xf] %vm995_vm8, %v994_v59 }
 0x5a2   :  { %v3967_v61 = vld [vmem:[#allocation2 + $0x78] sm:$0xf0] }
 0x5a3   :  { %v3970_v62 = vor.u32 %v4886_v60, %v3967_v61 }
 0x5a5   :  { %4212 = vmatmul.msk.bf16.gmra.mxu0 %vm145_vm0, %v3970_v62  ;;  %vm1914_vm0 = vcmask 261120  }
 0x5d5   :  { %v1156_v0 = vpop.permute.xlu2 %1155  ;;  %v1150_v1 = vpop.permute.xlu1 %1149 }
 0x5d6   :  { %1164 = vst.msk [vmem:[#allocation2 + $0x78] sm:$0xf] %vm1016_vm9, %v1156_v0 }
 0x5d7   :  { %1161 = vst.msk [vmem:[#allocation2 + $0x18] sm:$0xf] %vm1016_vm9, %v1150_v1 }
 0x5dd   :  { %v1152_v3 = vpop.permute.xlu0 %1151  ;;  %v1128_v4 = vpop.permute.xlu1 %1127  ;;  %v4890_v23 = vld [vmem:[#allocation2 + $0x74] sm:$0xf0] }
 0x5de   :  { %1162 = vst.msk [vmem:[#allocation2 + $0x38] sm:$0xf] %vm1016_vm9, %v1152_v3  ;;  %v3933_v7 = vld [vmem:[#allocation2 + $0x18] sm:$0xf] }
 0x5df   :  { %1138 = vst.msk [vmem:[#allocation2 + $0x34] sm:$0xf] %vm1016_vm9, %v1128_v4 }
 0x5e4   :  { %v1834_v31 = vpop.f32.mrf.mxu3 }
 0x5e5   :  { %v1154_v5 = vpop.permute.xlu0 %1153  ;;  %v1130_v6 = vpop.permute.xlu1 %1129  ;;  %v4882_v8 = vld [vmem:[#allocation2 + $0x34] sm:$0xf0] }
 0x5e6   :  { %1163 = vst.msk [vmem:[#allocation2 + $0x58] sm:$0xf] %vm1016_vm9, %v1154_v5  ;;  %v3927_v10 = vld [vmem:[#allocation2 + $0x30] sm:$0xf0]  ;;  %v3934_v11 = vor.u32 %v4882_v8, %v3933_v7  ;;  %v1815_v30 = vpop.f32.mrf.mxu1 }
 0x5e7   :  { %1139 = vst.msk [vmem:[#allocation2 + $0x54] sm:$0xf] %vm1016_vm9, %v1130_v6  ;;  %v3930_v18 = vor.u32 %v4877_v9, %v3927_v10  ;;  %v1816_v55 = vadd.f32 %v1815_v30, %v1797_v52 }
 0x5e8   :  { %1871 = vmatmul.bf16.vlgmr.msrb.gmra.mxu3 %v3934_v11 }
 0x5e9   :  { %1852 = vmatmul.bf16.vlgmr.msra.gmra.mxu1 %v3930_v18  ;;  %v1835_v51 = vadd.f32 %v1834_v31, %v1816_v55  ;;  %v1901_v18 = vld [vmem:[%s6559_s9] sm:$0x3] }
 0x5ec   :  { %v1836_v32 = vpop.f32.mrf.mxu3 }
 0x5ed   :  { %v1132_v21 = vpop.permute.xlu0 %1131  ;;  %v3965_v22 = vld [vmem:[#allocation2 + $0x58] sm:$0xf] }
 0x5ee   :  { %1140 = vst.msk [vmem:[#allocation2 + $0x74] sm:$0xf] %vm1016_vm9, %v1132_v21  ;;  %v4885_v17 = vld [vmem:[#allocation2 + $0x54] sm:$0xf]  ;;  %v3966_v13 = vor.u32 %v4890_v23, %v3965_v22  ;;  %v1817_v34 = vpop.f32.mrf.mxu1 }
 0x5ef   :  { %v1818_v53 = vadd.f32 %v1817_v34, %v5934_v63 }
 0x5f1   :  { %v1837_v60 = vadd.f32 %v1836_v32, %v1818_v53 }
 0x5f5   :  { %v3959_v20 = vld [vmem:[#allocation2 + $0x70] sm:$0xf0] }
 0x5f6   :  { %v3962_v24 = vor.u32 %v4885_v17, %v3959_v20  ;;  %v1820_v41 = vpop.f32.mrf.mxu1 }
 0x5f7   :  { %v1821_v54 = vadd.f32 %v1820_v41, %v1802_v14 }
 0x5f8   :  { %1876 = vmatmul.bf16.gmra.mxu3 %v3966_v13 }
 0x5f9   :  { %1857 = vmatmul.bf16.gmra.mxu1 %v3962_v24 }
 0x5fb   :  { %v1839_v37 = vpop.f32.mrf.mxu3 }
 0x5fc   :  { %v1840_v56 = vadd.f32 %v1839_v37, %v1821_v54 }
 0x5fe   :  { %v1822_v25 = vpop.f32.mrf.mxu1 }
 0x5ff   :  { %v1823_v57 = vadd.f32 %v1822_v25, %v1804_v50 }
 0x603   :  { %v1841_v28 = vpop.f32.mrf.mxu3 }
 0x604   :  { %v1842_v59 = vadd.f32 %v1841_v28, %v1823_v57 }
 0x612   :  { %v1891_v40 = vpop.f32.mrf.mxu0 }
 0x61a   :  { %v1893_v38 = vpop.f32.mrf.mxu0 }
 0x622   :  { %v1896_v46 = vpop.f32.mrf.mxu0 }
 0x62a   :  { %v1898_v4 = vpop.f32.mrf.mxu0 }
 0x666   :  { %v1853_v16 = vpop.f32.mrf.mxu1 }
 0x667   :  { %v1854_v0 = vadd.f32 %v1853_v16, %v1835_v51  ;;  %v1902_v51 = vld [vmem:[%s6560_s7] sm:$0xff] }
 0x66b   :  { %v1872_v42 = vpop.f32.mrf.mxu3 }
 0x66c   :  { %v1873_v48 = vadd.f32 %v1872_v42, %v1854_v0  ;;  %v1907_v0 = vld [vmem:[%s6561_s8 + $0x8] sm:$0xff] }
 0x66e   :  { %v1855_v35 = vpop.f32.mrf.mxu1  ;;  %v6040_v8 = vadd.f32 %v1891_v40, %v1873_v48 }
 0x66f   :  { %v1856_v36 = vadd.f32 %v1855_v35, %v1837_v60 }
 0x670   :  { %v1910_v11 = vmul.f32 %v6040_v8, %v6040_v8 }
 0x673   :  { %v1874_v39 = vpop.f32.mrf.mxu3 }
 0x674   :  { %v1875_v1 = vadd.f32 %v1874_v39, %v1856_v36  ;;  %v1904_v39 = vld [vmem:[%s6560_s7 + $0x10] sm:$0xff]  ;;  %v1903_v36 = vld [vmem:[%s6560_s7 + $0x8] sm:$0xff] }
 0x676   :  { %v1858_v43 = vpop.f32.mrf.mxu1  ;;  %v6035_v6 = vadd.f32 %v1893_v38, %v1875_v1 }
 0x677   :  { %v1859_v26 = vadd.f32 %v1858_v43, %v1840_v56  ;;  %v1905_v43 = vld [vmem:[%s6560_s7 + $0x18] sm:$0xff] }
 0x678   :  { %v1911_v10 = vmul.f32 %v6035_v6, %v6035_v6 }
 0x67b   :  { %v1877_v47 = vpop.f32.mrf.mxu3 }
 0x67c   :  { %v1878_v61 = vadd.f32 %v1877_v47, %v1859_v26 }
 0x67e   :  { %v1860_v58 = vpop.f32.mrf.mxu1  ;;  %v6031_v5 = vadd.f32 %v1896_v46, %v1878_v61 }
 0x67f   :  { %v1861_v62 = vadd.f32 %v1860_v58, %v1842_v59 }
 0x680   :  { %v1912_v9 = vmul.f32 %v6031_v5, %v6031_v5 }
 0x683   :  { %v1879_v44 = vpop.f32.mrf.mxu3 }
 0x684   :  { %v1880_v3 = vadd.f32 %v1879_v44, %v1861_v62  ;;  %v1906_v44 = vld [vmem:[%s6561_s8] sm:$0xff] }
 0x686   :  { %v6033_v63 = vadd.f32 %v1898_v4, %v1880_v3 }
 0x688   :  { %v1913_v7 = vmul.f32 %v6033_v63, %v6033_v63  ;;  %1930 = vmatpush.msrb.mxu1 %v6033_v63 }
 0x68a   :  { %1931 = vmatpush.msrb.mxu1 %v6031_v5  ;;  %1950 = vmatpush.msra.mxu3 %v1913_v7 }
 0x68c   :  { %1932 = vmatpush.msrb.mxu1 %v6035_v6  ;;  %1951 = vmatpush.msra.mxu3 %v1912_v9  ;;  %v4951_v9 = vld [vmem:[%s6562_s10] sm:$0xff] }
 0x68e   :  { %1933 = vmatpush.msrb.mxu1 %v6040_v8  ;;  %1952 = vmatpush.msra.mxu3 %v1911_v10  ;;  %v4952_v10 = vld [vmem:[%s6562_s10 + $0x8] sm:$0xff] }
 0x68f   :  { %4213 = vmatmul.msk.f32.vlgmr.msrb.gmra.mxu1 %vm1914_vm0, %v1901_v18 }
 0x690   :  { %1953 = vmatpush.msra.mxu3 %v1910_v11  ;;  %v4953_v11 = vld [vmem:[%s6562_s10 + $0x10] sm:$0xff] }
 0x691   :  { %4214 = vmatmul.msk.f32.vlgmr.msra.gmra.mxu3 %vm1914_vm0, %v1901_v18  ;;  %v4954_v18 = vld [vmem:[%s6562_s10 + $0x18] sm:$0xff] }
 0x70c   :  { %v1935_v21 = vpop.f32.mrf.mxu1 }
 0x70d   :  { %v1959_v22 = vsel %vm1958_vm10, %v1935_v21, 0.0  ;;  %v4955_v21 = vld [vmem:[%s6562_s10 + $0x20] sm:$0xff] }
 0x70e   :  { %1960 = vadd.xlane.f32.xlu2 %v1959_v22  ;;  %v4956_v22 = vld [vmem:[%s6562_s10 + $0x28] sm:$0xff] }
 0x714   :  { %v1955_v17 = vpop.f32.mrf.mxu3 }
 0x715   :  { %v1963_v20 = vsel %vm1958_vm10, %v1955_v17, 0.0  ;;  %v4988_v17 = vld [vmem:[%s6563_s11 + $0x38] sm:$0xff] }
 0x716   :  { %1964 = vadd.xlane.f32.xlu1 %v1963_v20  ;;  %3377 = vmatpush.bf16.msrb.mxu0 %v4988_v17  ;;  %v4957_v20 = vld [vmem:[%s6562_s10 + $0x30] sm:$0xff] }
 0x781   :  { %v1961_v23 = vpop.xlane.xlu2 %1960 }
 0x782   :  { %v1962_v24 = vmul.f32 0.00048828125, %v1961_v23  ;;  %v4987_v23 = vld [vmem:[%s6563_s11 + $0x30] sm:$0xff] }
 0x783   :  { %3378 = vmatpush.bf16.msrb.mxu0 %v4987_v23 }
 0x784   :  { %v1967_v13 = vmul.f32 %v1962_v24, %v1962_v24 }
 0x789   :  { %v1965_v15 = vpop.xlane.xlu1 %1964 }
 0x78a   :  { %v1966_v27 = vmul.f32 0.00048828125, %v1965_v15  ;;  %v4984_v15 = vld [vmem:[%s6563_s11 + $0x18] sm:$0xff] }
 0x78c   :  { %v1968_v29 = vsub.f32 %v1966_v27, %v1967_v13  ;;  %v4985_v13 = vld [vmem:[%s6563_s11 + $0x20] sm:$0xff]  ;;  %v4958_v27 = vld [vmem:[%s6562_s10 + $0x38] sm:$0xff] }
 0x78e   :  { %v1969_v33 = vadd.f32 1e-05, %v1968_v29  ;;  %v4983_v29 = vld [vmem:[%s6563_s11 + $0x10] sm:$0xff] }
 0x790   :  { %5251 = vrsqrt.f32 %v1969_v33  ;;  %vm1976_vm12 = vweird.f32 %v1969_v33 }
 0x796   :  { %v5252_v30 = vpop.eup %5251 }
 0x797   :  { %v1971_v31 = vmul.f32 %v5252_v30, %v1969_v33  ;;  %vm1977_vm11 = vweird.f32 %v5252_v30  ;;  %v4996_v33 = vld [vmem:[%s6563_s11 + $0x78] sm:$0xff] }
 0x798   :  { %vm1978_vm13 = vmor %vm1976_vm12, %vm1977_vm11  ;;  %3391 = vmatpush.bf16.msrb.mxu3 %v4996_v33  ;;  %v4963_v33 = vld [vmem:[%s6562_s10 + $0x60] sm:$0xff] }
 0x799   :  { %v1972_v34 = vmul.f32 %v5252_v30, %v1971_v31  ;;  %v4995_v31 = vld [vmem:[%s6563_s11 + $0x70] sm:$0xff] }
 0x79b   :  { %v1973_v32 = vmul.f32 0.5, %v1972_v34  ;;  %v4981_v34 = vld [vmem:[%s6563_s11] sm:$0xff] }
 0x79c   :  { %3392 = vmatpush.bf16.msrb.mxu3 %v4995_v31  ;;  %v5025_v31 = vld [vmem:[%s6563_s11 + $0x160] sm:$0xff] }
 0x79d   :  { %v1974_v41 = vsub.f32 1.5, %v1973_v32  ;;  %v4994_v32 = vld [vmem:[%s6563_s11 + $0x68] sm:$0xff] }
 0x79f   :  { %v1975_v37 = vmul.f32 %v5252_v30, %v1974_v41  ;;  %v5004_v41 = vld [vmem:[%s6563_s11 + $0xb8] sm:$0xff] }
 0x7a0   :  { %3393 = vmatpush.bf16.msrb.mxu3 %v4994_v32  ;;  %v5024_v32 = vld [vmem:[%s6563_s11 + $0x158] sm:$0xff] }
 0x7a1   :  { %v1979_v25 = vsel %vm1978_vm13, %v5252_v30, %v1975_v37  ;;  %v4982_v30 = vld [vmem:[%s6563_s11 + $0x8] sm:$0xff]  ;;  %v4959_v37 = vld [vmem:[%s6562_s10 + $0x40] sm:$0xff] }
 0x7a2   :  { %v1980_v28 = vsel %vm394_vm4, %v1962_v24, %v1979_v25  ;;  %v4986_v24 = vld [vmem:[%s6563_s11 + $0x28] sm:$0xff] }
 0x7a3   :  { %v1982_v16 = vperm.slane %v1980_v28, 1  ;;  %v1981_v40 = vperm.slane %v1980_v28, 0  ;;  %3379 = vmatpush.bf16.msrb.mxu0 %v4986_v24  ;;  %v4993_v28 = vld [vmem:[%s6563_s11 + $0x60] sm:$0xff] }
 0x7a4   :  { %3394 = vmatpush.bf16.msrb.mxu3 %v4993_v28  ;;  %v5023_v28 = vld [vmem:[%s6563_s11 + $0x150] sm:$0xff] }
 0x7a5   :  { %1990 = vperm.xlu0 %5243, %v1982_v16   ;;  %1998 = vperm.xlu2 %5242, %v1981_v40  }
 0x7a7   :  { %3380 = vmatpush.bf16.msrb.mxu0 %v4985_v13  ;;  %v5013_v13 = vld [vmem:[%s6563_s11 + $0x100] sm:$0xff] }
 0x7ab   :  { %3381 = vmatpush.bf16.msrb.mxu0 %v4984_v15 }
 0x7ad   :  { %5244 = vset.pattern.permute.xlu0 %v5257_v2 }
 0x7ae   :  { %2002 = vperm.xlu0 %5244, %v1982_v16   ;;  %v5003_v16 = vld [vmem:[%s6563_s11 + $0xb0] sm:$0xff] }
 0x7af   :  { %3382 = vmatpush.bf16.msrb.mxu0 %v4983_v29  ;;  %v5036_v29 = vld [vmem:[%s6563_s11 + $0x1b8] sm:$0xff] }
 0x7b3   :  { %3383 = vmatpush.bf16.msrb.mxu0 %v4982_v30 }
 0x7b6   :  { %5245 = vset.pattern.permute.xlu0 %v5256_v49  ;;  %v1908_v49 = vld [vmem:[%s6561_s8 + $0x10] sm:$0xff] }
 0x7b7   :  { %1986 = vperm.xlu0 %5245, %v1981_v40   ;;  %3384 = vmatpush.bf16.msrb.mxu0 %v4981_v34  ;;  %v4992_v40 = vld [vmem:[%s6563_s11 + $0x58] sm:$0xff]  ;;  %v5035_v34 = vld [vmem:[%s6563_s11 + $0x1b0] sm:$0xff] }
 0x7b8   :  { %3395 = vmatpush.bf16.msrb.mxu3 %v4992_v40  ;;  %v5022_v40 = vld [vmem:[%s6563_s11 + $0x148] sm:$0xff] }
 0x7bb   :  { %3405 = vmatpush.bf16.msra.mxu0 %v5004_v41  ;;  %v5034_v41 = vld [vmem:[%s6563_s11 + $0x1a8] sm:$0xff] }
 0x7bf   :  { %3406 = vmatpush.bf16.msra.mxu0 %v5003_v16  ;;  %v5033_v16 = vld [vmem:[%s6563_s11 + $0x1a0] sm:$0xff] }
 0x7ff   :  { %v1999_v26 = vpop.permute.xlu2 %1998 }
 0x817   :  { %v1991_v42 = vpop.permute.xlu0 %1990 }
 0x818   :  { %v1995_v35 = vsub.f32 %v6031_v5, %v1991_v42  ;;  %v1996_v38 = vsub.f32 %v6033_v63, %v1991_v42  ;;  %v5002_v42 = vld [vmem:[%s6563_s11 + $0xa8] sm:$0xff] }
 0x819   :  { %3407 = vmatpush.bf16.msra.mxu0 %v5002_v42  ;;  %v5032_v42 = vld [vmem:[%s6563_s11 + $0x198] sm:$0xff] }
 0x820   :  { %v2003_v19 = vpop.permute.xlu0 %2002 }
 0x821   :  { %v2007_v12 = vmul.f32 %v2003_v19, %v1995_v35  ;;  %v2008_v14 = vmul.f32 %v2003_v19, %v1996_v38  ;;  %v4990_v19 = vld [vmem:[%s6563_s11 + $0x48] sm:$0xff] }
 0x823   :  { %v2011_v46 = vmul.f32 %v2007_v12, %v1904_v39  ;;  %v2012_v47 = vmul.f32 %v2008_v14, %v1905_v43  ;;  %v4991_v39 = vld [vmem:[%s6563_s11 + $0x50] sm:$0xff]  ;;  %v5001_v43 = vld [vmem:[%s6563_s11 + $0xa0] sm:$0xff]  ;;  %v5000_v12 = vld [vmem:[%s6563_s11 + $0x98] sm:$0xff] }
 0x824   :  { %3396 = vmatpush.bf16.msrb.mxu3 %v4991_v39  ;;  %3408 = vmatpush.bf16.msra.mxu0 %v5001_v43  ;;  %v4960_v14 = vld [vmem:[%s6562_s10 + $0x48] sm:$0xff] }
 0x825   :  { %v2015_v50 = vadd.f32 %v2011_v46, %v1908_v49  ;;  %v2016_v52 = vadd.f32 %v2012_v47, %v1909_v45  ;;  %v4989_v46 = vld [vmem:[%s6563_s11 + $0x40] sm:$0xff]  ;;  %v4999_v47 = vld [vmem:[%s6563_s11 + $0x90] sm:$0xff] }
 0x827   :  { %vm2019_vm14 = vcmp.ge.f32.partialorder %v2015_v50, 0.0  ;;  %vm2020_vm15 = vcmp.ge.f32.partialorder %v2016_v52, 0.0  ;;  %v2023_v53 = vmul.f32 0.3, %v2015_v50  ;;  %v2024_v54 = vmul.f32 0.3, %v2016_v52 }
 0x828   :  { %3397 = vmatpush.bf16.msrb.mxu3 %v4990_v19  ;;  %3409 = vmatpush.bf16.msra.mxu0 %v5000_v12 }
 0x829   :  { %v1987_v55 = vpop.permute.xlu0 %1986  ;;  %v2027_v56 = vsel %vm2019_vm14, %v2015_v50, %v2023_v53  ;;  %v2028_v57 = vsel %vm2020_vm15, %v2016_v52, %v2024_v54  ;;  %v4998_v50 = vld [vmem:[%s6563_s11 + $0x88] sm:$0xff]  ;;  %v5012_v52 = vld [vmem:[%s6563_s11 + $0xf8] sm:$0xff]  ;;  %v5011_v54 = vld [vmem:[%s6563_s11 + $0xf0] sm:$0xff] }
 0x82a   :  { %v1993_v58 = vsub.f32 %v6040_v8, %v1987_v55  ;;  %v1994_v59 = vsub.f32 %v6035_v6, %v1987_v55  ;;  %v2060_v60 = vpack.c.bf16 %v2028_v57, %v2027_v56  ;;  %v4997_v57 = vld [vmem:[%s6563_s11 + $0x80] sm:$0xff] }
 0x82c   :  { %v2005_v61 = vmul.f32 %v1999_v26, %v1993_v58  ;;  %v2006_v62 = vmul.f32 %v1999_v26, %v1994_v59  ;;  %2187 = vmatpush.bf16.msra.mxu1 %v2060_v60  ;;  %3398 = vmatpush.bf16.msrb.mxu3 %v4989_v46  ;;  %v5010_v59 = vld [vmem:[%s6563_s11 + $0xe8] sm:$0xff]  ;;  %v5020_v60 = vld [vmem:[%s6563_s11 + $0x138] sm:$0xff]  ;;  %v4961_v26 = vld [vmem:[%s6562_s10 + $0x50] sm:$0xff] }
 0x82d   :  { %3410 = vmatpush.bf16.msra.mxu0 %v4999_v47  ;;  %v5044_v46 = vld [vmem:[%s6563_s11 + $0x1f8] sm:$0xff] }
 0x82e   :  { %v2009_v1 = vmul.f32 %v2005_v61, %v1902_v51  ;;  %v2010_v3 = vmul.f32 %v2006_v62, %v1903_v36  ;;  %v5009_v36 = vld [vmem:[%s6563_s11 + $0xe0] sm:$0xff]  ;;  %v5019_v61 = vld [vmem:[%s6563_s11 + $0x130] sm:$0xff]  ;;  %v5008_v62 = vld [vmem:[%s6563_s11 + $0xd8] sm:$0xff] }
 0x830   :  { %v2013_v4 = vadd.f32 %v2009_v1, %v1906_v44  ;;  %v2014_v48 = vadd.f32 %v2010_v3, %v1907_v0  ;;  %3419 = vmatpush.bf16.msra.mxu3 %v5012_v52  ;;  %v5018_v44 = vld [vmem:[%s6563_s11 + $0x128] sm:$0xff]  ;;  %v5007_v3 = vld [vmem:[%s6563_s11 + $0xd0] sm:$0xff] }
 0x831   :  { %3411 = vmatpush.bf16.msra.mxu0 %v4998_v50  ;;  %v5043_v50 = vld [vmem:[%s6563_s11 + $0x1f0] sm:$0xff] }
 0x832   :  { %vm2017_vm1 = vcmp.ge.f32.partialorder %v2013_v4, 0.0  ;;  %vm2018_vm2 = vcmp.ge.f32.partialorder %v2014_v48, 0.0  ;;  %v2021_v5 = vmul.f32 0.3, %v2013_v4  ;;  %v2022_v63 = vmul.f32 0.3, %v2014_v48 }
 0x834   :  { %v2025_v6 = vsel %vm2017_vm1, %v2013_v4, %v2021_v5  ;;  %v2026_v7 = vsel %vm2018_vm2, %v2014_v48, %v2022_v63  ;;  %3420 = vmatpush.bf16.msra.mxu3 %v5011_v54  ;;  %v5017_v4 = vld [vmem:[%s6563_s11 + $0x120] sm:$0xff]  ;;  %v5006_v48 = vld [vmem:[%s6563_s11 + $0xc8] sm:$0xff]  ;;  %v5016_v5 = vld [vmem:[%s6563_s11 + $0x118] sm:$0xff] }
 0x835   :  { %v2059_v8 = vpack.c.bf16 %v2026_v7, %v2025_v6  ;;  %3412 = vmatpush.bf16.msra.mxu0 %v4997_v57  ;;  %v4962_v63 = vld [vmem:[%s6562_s10 + $0x58] sm:$0xff]  ;;  %v5029_v54 = vld [vmem:[%s6563_s11 + $0x180] sm:$0xff] }
 0x836   :  { %v5052_v57 = vld [vmem:[%s6563_s11 + $0x238] sm:$0xff] }
 0x837   :  { %2188 = vmatpush.bf16.msra.mxu1 %v2059_v8 }
 0x838   :  { %3421 = vmatpush.bf16.msra.mxu3 %v5010_v59 }
 0x83a   :  { %4275 = vmatmul.msk.bf16.vlgmr.msra.gmra.mxu1 %vm1914_vm0, %v4951_v9 }
 0x83c   :  { %3422 = vmatpush.bf16.msra.mxu3 %v5009_v36  ;;  %v5050_v36 = vld [vmem:[%s6563_s11 + $0x228] sm:$0xff] }
 0x840   :  { %3423 = vmatpush.bf16.msra.mxu3 %v5008_v62 }
 0x844   :  { %3424 = vmatpush.bf16.msra.mxu3 %v5007_v3  ;;  %v5048_v3 = vld [vmem:[%s6563_s11 + $0x218] sm:$0xff] }
 0x848   :  { %3425 = vmatpush.bf16.msra.mxu3 %v5006_v48 }
 0x84a   :  { %4276 = vmatmul.msk.bf16.gmra.mxu1 %vm1914_vm0, %v4952_v10 }
 0x85a   :  { %4277 = vmatmul.msk.bf16.gmra.mxu1 %vm1914_vm0, %v4953_v11  ;;  %v5005_v11 = vld [vmem:[%s6563_s11 + $0xc0] sm:$0xff] }
 0x85b   :  { %3426 = vmatpush.bf16.msra.mxu3 %v5005_v11 }
 0x86a   :  { %4278 = vmatmul.msk.bf16.gmra.mxu1 %vm1914_vm0, %v4954_v18  ;;  %v5015_v18 = vld [vmem:[%s6563_s11 + $0x110] sm:$0xff] }
 0x87a   :  { %4279 = vmatmul.msk.bf16.gmra.mxu1 %vm1914_vm0, %v4955_v21  ;;  %v5014_v21 = vld [vmem:[%s6563_s11 + $0x108] sm:$0xff] }
 0x88a   :  { %4280 = vmatmul.msk.bf16.gmra.mxu1 %vm1914_vm0, %v4956_v22  ;;  %v5028_v22 = vld [vmem:[%s6563_s11 + $0x178] sm:$0xff] }
 0x89a   :  { %4281 = vmatmul.msk.bf16.gmra.mxu1 %vm1914_vm0, %v4957_v20  ;;  %v5027_v20 = vld [vmem:[%s6563_s11 + $0x170] sm:$0xff] }
 0x8aa   :  { %4282 = vmatmul.msk.bf16.gmra.mxu1 %vm1914_vm0, %v4958_v27  ;;  %v5026_v27 = vld [vmem:[%s6563_s11 + $0x168] sm:$0xff] }
 0x8b7   :  { %v2190_v25 = vpop.f32.mrf.mxu1 }
 0x8ba   :  { %4283 = vmatmul.msk.bf16.gmra.mxu1 %vm1914_vm0, %v4959_v37 }
 0x8bf   :  { %v2192_v35 = vpop.f32.mrf.mxu1 }
 0x8c0   :  { %v2266_v38 = vpack.c.bf16 %v2192_v35, %v2192_v35  ;;  %v4964_v35 = vld [vmem:[%s6562_s10 + $0x68] sm:$0xff] }
 0x8c2   :  { %2296 = vst [vmem:[#allocation3 + $0x3c] sm:$0xf] %v2266_v38 }
 0x8c7   :  { %v2195_v49 = vpop.f32.mrf.mxu1 }
 0x8c8   :  { %v5104_v45 = vpack.c.bf16 %v2195_v49, %v2190_v25  ;;  %v5031_v49 = vld [vmem:[%s6563_s11 + $0x190] sm:$0xff] }
 0x8c9   :  { %v4973_v56 = vld [vmem:[#allocation3 + $0x38] sm:$0xf0] }
 0x8ca   :  { %5105 = vst [vmem:[#allocation3] sm:$0xff] %v5104_v45   ;;  %4284 = vmatmul.msk.bf16.gmra.mxu1 %vm1914_vm0, %v4960_v14  ;;  %v5021_v14 = vld [vmem:[%s6563_s11 + $0x140] sm:$0xff]  ;;  %v5030_v45 = vld [vmem:[%s6563_s11 + $0x188] sm:$0xff] }
 0x8cf   :  { %v2197_v53 = vpop.f32.mrf.mxu1 }
 0x8d1   :  { %v4292_v55 = vld [vmem:[#allocation3] sm:$0xf]  ;;  %v4966_v8 = vld [vmem:[#allocation3 + $0x4] sm:$0xf] }
 0x8d2   :  { %v4293_v58 = vor.u32 %v4973_v56, %v4292_v55  ;;  %v5042_v56 = vld [vmem:[%s6563_s11 + $0x1e8] sm:$0xff] }
 0x8d4   :  { %3385 = vmatmul.bf16.vlgmr.msrb.gmra.mxu0 %v4293_v58  ;;  %v4965_v58 = vld [vmem:[%s6562_s10 + $0x70] sm:$0xff] }
 0x8d5   :  { %3433 = vmatpush.bf16.msrb.mxu0 %v5020_v60  ;;  %v5041_v60 = vld [vmem:[%s6563_s11 + $0x1e0] sm:$0xff] }
 0x8d7   :  { %v2200_v51 = vpop.f32.mrf.mxu1 }
 0x8d9   :  { %3434 = vmatpush.bf16.msrb.mxu0 %v5019_v61 }
 0x8da   :  { %4285 = vmatmul.msk.bf16.gmra.mxu1 %vm1914_vm0, %v4961_v26  ;;  %v5051_v26 = vld [vmem:[%s6563_s11 + $0x230] sm:$0xff] }
 0x8dd   :  { %3435 = vmatpush.bf16.msrb.mxu0 %v5018_v44  ;;  %v5039_v44 = vld [vmem:[%s6563_s11 + $0x1d0] sm:$0xff] }
 0x8df   :  { %v2202_v0 = vpop.f32.mrf.mxu1 }
 0x8e0   :  { %v5109_v1 = vpack.c.bf16 %v2202_v0, %v2197_v53  ;;  %v5049_v0 = vld [vmem:[%s6563_s11 + $0x220] sm:$0xff] }
 0x8e1   :  { %3436 = vmatpush.bf16.msrb.mxu0 %v5017_v4 }
 0x8e2   :  { %5171 = vst [vmem:[#allocation3 + $0x40] sm:$0xff] %v5109_v1   ;;  %v5038_v1 = vld [vmem:[%s6563_s11 + $0x1c8] sm:$0xff] }
 0x8e5   :  { %3437 = vmatpush.bf16.msrb.mxu0 %v5016_v5 }
 0x8e7   :  { %v2205_v6 = vpop.f32.mrf.mxu1 }
 0x8e8   :  { %v5114_v7 = vpack.c.bf16 %v2205_v6, %v2200_v51  ;;  %v5040_v51 = vld [vmem:[%s6563_s11 + $0x1d8] sm:$0xff] }
 0x8e9   :  { %v4294_v9 = vld [vmem:[#allocation3 + $0x3c] sm:$0xf0]  ;;  %3438 = vmatpush.bf16.msrb.mxu0 %v5015_v18  ;;  %v4974_v24 = vld [vmem:[#allocation3 + $0x40] sm:$0xf0] }
 0x8ea   :  { %5172 = vst [vmem:[#allocation3 + $0x8] sm:$0xff] %v5114_v7   ;;  %4286 = vmatmul.msk.bf16.gmra.mxu1 %vm1914_vm0, %v4962_v63  ;;  %v4297_v10 = vor.u32 %v4966_v8, %v4294_v9  ;;  %v5037_v7 = vld [vmem:[%s6563_s11 + $0x1c0] sm:$0xff]  ;;  %v5047_v8 = vld [vmem:[%s6563_s11 + $0x210] sm:$0xff]  ;;  %v5046_v9 = vld [vmem:[%s6563_s11 + $0x208] sm:$0xff] }
 0x8ec   :  { %3399 = vmatmul.bf16.vlgmr.msrb.gmra.mxu3 %v4297_v10  ;;  %v5060_v10 = vld [vmem:[%s6563_s11 + $0x278] sm:$0xff] }
 0x8ed   :  { %3447 = vmatpush.bf16.msrb.mxu3 %v5028_v22  ;;  %3439 = vmatpush.bf16.msrb.mxu0 %v5014_v21  ;;  %v5045_v22 = vld [vmem:[%s6563_s11 + $0x200] sm:$0xff] }
 0x8ef   :  { %v2207_v17 = vpop.f32.mrf.mxu1 }
 0x8f1   :  { %v4300_v23 = vld [vmem:[#allocation3 + $0x8] sm:$0xf]  ;;  %3448 = vmatpush.bf16.msrb.mxu3 %v5027_v20  ;;  %3440 = vmatpush.bf16.msrb.mxu0 %v5013_v13  ;;  %v4967_v43 = vld [vmem:[#allocation3 + $0xc] sm:$0xf]  ;;  %v5059_v20 = vld [vmem:[%s6563_s11 + $0x270] sm:$0xff] }
 0x8f2   :  { %v4301_v15 = vor.u32 %v4974_v24, %v4300_v23  ;;  %v5068_v23 = vld [vmem:[%s6563_s11 + $0x2b8] sm:$0xff]  ;;  %v5058_v24 = vld [vmem:[%s6563_s11 + $0x268] sm:$0xff] }
 0x8f4   :  { %3413 = vmatmul.bf16.vlgmr.msra.gmra.mxu0 %v4301_v15  ;;  %v5067_v15 = vld [vmem:[%s6563_s11 + $0x2b0] sm:$0xff] }
 0x8f5   :  { %3449 = vmatpush.bf16.msrb.mxu3 %v5026_v27  ;;  %3461 = vmatpush.bf16.msra.mxu0 %v5036_v29  ;;  %v5057_v27 = vld [vmem:[%s6563_s11 + $0x260] sm:$0xff]  ;;  %v5066_v29 = vld [vmem:[%s6563_s11 + $0x2a8] sm:$0xff] }
 0x8f7   :  { %v2210_v30 = vpop.f32.mrf.mxu1 }
 0x8f9   :  { %3450 = vmatpush.bf16.msrb.mxu3 %v5025_v31  ;;  %3462 = vmatpush.bf16.msra.mxu0 %v5035_v34  ;;  %v5065_v34 = vld [vmem:[%s6563_s11 + $0x2a0] sm:$0xff] }
 0x8fa   :  { %4287 = vmatmul.msk.bf16.gmra.mxu1 %vm1914_vm0, %v4963_v33  ;;  %v5056_v33 = vld [vmem:[%s6563_s11 + $0x258] sm:$0xff] }
 0x8fd   :  { %3451 = vmatpush.bf16.msrb.mxu3 %v5024_v32  ;;  %3463 = vmatpush.bf16.msra.mxu0 %v5034_v41  ;;  %v5055_v32 = vld [vmem:[%s6563_s11 + $0x250] sm:$0xff]  ;;  %v5064_v41 = vld [vmem:[%s6563_s11 + $0x298] sm:$0xff] }
 0x8ff   :  { %v2212_v37 = vpop.f32.mrf.mxu1 }
 0x900   :  { %v5119_v25 = vpack.c.bf16 %v2212_v37, %v2207_v17  ;;  %v5054_v37 = vld [vmem:[%s6563_s11 + $0x248] sm:$0xff] }
 0x901   :  { %3452 = vmatpush.bf16.msrb.mxu3 %v5023_v28  ;;  %3464 = vmatpush.bf16.msra.mxu0 %v5033_v16 }
 0x902   :  { %5173 = vst [vmem:[#allocation3 + $0x48] sm:$0xff] %v5119_v25  }
 0x905   :  { %3453 = vmatpush.bf16.msrb.mxu3 %v5022_v40  ;;  %3465 = vmatpush.bf16.msra.mxu0 %v5032_v42 }
 0x907   :  { %v2215_v38 = vpop.f32.mrf.mxu1 }
 0x908   :  { %v5124_v39 = vpack.c.bf16 %v2215_v38, %v2210_v30  ;;  %v5053_v38 = vld [vmem:[%s6563_s11 + $0x240] sm:$0xff] }
 0x909   :  { %v4302_v19 = vld [vmem:[#allocation3 + $0x44] sm:$0xf0]  ;;  %3466 = vmatpush.bf16.msra.mxu0 %v5031_v49  ;;  %3454 = vmatpush.bf16.msrb.mxu3 %v5021_v14  ;;  %v4975_v53 = vld [vmem:[#allocation3 + $0x48] sm:$0xf0]  ;;  %v5061_v49 = vld [vmem:[%s6563_s11 + $0x280] sm:$0xff] }
 0x90a   :  { %5174 = vst [vmem:[#allocation3 + $0x10] sm:$0xff] %v5124_v39   ;;  %4288 = vmatmul.msk.bf16.gmra.mxu1 %vm1914_vm0, %v4964_v35  ;;  %v4305_v12 = vor.u32 %v4967_v43, %v4302_v19  ;;  %v5063_v35 = vld [vmem:[%s6563_s11 + $0x290] sm:$0xff]  ;;  %v5062_v39 = vld [vmem:[%s6563_s11 + $0x288] sm:$0xff]  ;;  %v5076_v43 = vld [vmem:[%s6563_s11 + $0x2f8] sm:$0xff] }
 0x90c   :  { %3427 = vmatmul.bf16.vlgmr.msra.gmra.mxu3 %v4305_v12 }
 0x90d   :  { %3475 = vmatpush.bf16.msra.mxu3 %v5044_v46  ;;  %3467 = vmatpush.bf16.msra.mxu0 %v5030_v45  ;;  %v5084_v46 = vld [vmem:[%s6563_s11 + $0x338] sm:$0xff] }
 0x90f   :  { %v2217_v47 = vpop.f32.mrf.mxu1 }
 0x911   :  { %v4308_v52 = vld [vmem:[#allocation3 + $0x10] sm:$0xf]  ;;  %3476 = vmatpush.bf16.msra.mxu3 %v5043_v50  ;;  %3468 = vmatpush.bf16.msra.mxu0 %v5029_v54  ;;  %v4968_v5 = vld [vmem:[#allocation3 + $0x14] sm:$0xf]  ;;  %v5074_v50 = vld [vmem:[%s6563_s11 + $0x2e8] sm:$0xff] }
 0x912   :  { %v4309_v55 = vor.u32 %v4975_v53, %v4308_v52  ;;  %v5083_v52 = vld [vmem:[%s6563_s11 + $0x330] sm:$0xff]  ;;  %v5082_v54 = vld [vmem:[%s6563_s11 + $0x328] sm:$0xff] }
 0x914   :  { %3441 = vmatmul.bf16.vlgmr.msrb.gmra.mxu0 %v4309_v55  ;;  %v5073_v55 = vld [vmem:[%s6563_s11 + $0x2e0] sm:$0xff] }
 0x915   :  { %3477 = vmatpush.bf16.msra.mxu3 %v5042_v56  ;;  %3489 = vmatpush.bf16.msrb.mxu0 %v5052_v57  ;;  %v5072_v56 = vld [vmem:[%s6563_s11 + $0x2d8] sm:$0xff]  ;;  %v5081_v57 = vld [vmem:[%s6563_s11 + $0x320] sm:$0xff] }
 0x917   :  { %v2220_v59 = vpop.f32.mrf.mxu1 }
 0x919   :  { %3478 = vmatpush.bf16.msra.mxu3 %v5041_v60  ;;  %3490 = vmatpush.bf16.msrb.mxu0 %v5051_v26  ;;  %v5080_v26 = vld [vmem:[%s6563_s11 + $0x318] sm:$0xff] }
 0x91a   :  { %4289 = vmatmul.msk.bf16.gmra.mxu1 %vm1914_vm0, %v4965_v58 }
 0x91d   :  { %3479 = vmatpush.bf16.msra.mxu3 %v5040_v51  ;;  %3491 = vmatpush.bf16.msrb.mxu0 %v5050_v36  ;;  %v5071_v51 = vld [vmem:[%s6563_s11 + $0x2d0] sm:$0xff]  ;;  %v5070_v36 = vld [vmem:[%s6563_s11 + $0x2c8] sm:$0xff] }
 0x91f   :  { %v2222_v61 = vpop.f32.mrf.mxu1 }
 0x920   :  { %v5129_v62 = vpack.c.bf16 %v2222_v61, %v2217_v47  ;;  %v5075_v47 = vld [vmem:[%s6563_s11 + $0x2f0] sm:$0xff] }
 0x921   :  { %3480 = vmatpush.bf16.msra.mxu3 %v5039_v44  ;;  %3492 = vmatpush.bf16.msrb.mxu0 %v5049_v0  ;;  %v5079_v61 = vld [vmem:[%s6563_s11 + $0x310] sm:$0xff] }
 0x922   :  { %5175 = vst [vmem:[#allocation3 + $0x50] sm:$0xff] %v5129_v62  }
 0x925   :  { %3481 = vmatpush.bf16.msra.mxu3 %v5038_v1  ;;  %3493 = vmatpush.bf16.msrb.mxu0 %v5048_v3 }
 0x927   :  { %v2225_v4 = vpop.f32.mrf.mxu1 }
 0x928   :  { %v5134_v48 = vpack.c.bf16 %v2225_v4, %v2220_v59 }
 0x929   :  { %v4310_v63 = vld [vmem:[#allocation3 + $0x4c] sm:$0xf0]  ;;  %3494 = vmatpush.bf16.msrb.mxu0 %v5047_v8  ;;  %3482 = vmatpush.bf16.msra.mxu3 %v5037_v7  ;;  %v4976_v21 = vld [vmem:[#allocation3 + $0x50] sm:$0xf0] }
 0x92a   :  { %5176 = vst [vmem:[#allocation3 + $0x18] sm:$0xff] %v5134_v48   ;;  %v4313_v6 = vor.u32 %v4968_v5, %v4310_v63  ;;  %v5078_v48 = vld [vmem:[%s6563_s11 + $0x308] sm:$0xff]  ;;  %v5069_v5 = vld [vmem:[%s6563_s11 + $0x2c0] sm:$0xff]  ;;  %v5092_v63 = vld [vmem:[%s6563_s11 + $0x378] sm:$0xff] }
 0x92c   :  { %3455 = vmatmul.bf16.vlgmr.msrb.gmra.mxu3 %v4313_v6  ;;  %v5077_v6 = vld [vmem:[%s6563_s11 + $0x300] sm:$0xff] }
 0x92d   :  { %3503 = vmatpush.bf16.msrb.mxu3 %v5060_v10  ;;  %3495 = vmatpush.bf16.msrb.mxu0 %v5046_v9 }
 0x92f   :  { %v2227_v11 = vpop.f32.mrf.mxu1 }
 0x931   :  { %v4316_v18 = vld [vmem:[#allocation3 + $0x18] sm:$0xf]  ;;  %3504 = vmatpush.bf16.msrb.mxu3 %v5059_v20  ;;  %3496 = vmatpush.bf16.msrb.mxu0 %v5045_v22  ;;  %v4969_v16 = vld [vmem:[#allocation3 + $0x1c] sm:$0xf]  ;;  %v5091_v20 = vld [vmem:[%s6563_s11 + $0x370] sm:$0xff] }
 0x932   :  { %v4317_v17 = vor.u32 %v4976_v21, %v4316_v18  ;;  %v5100_v21 = vld [vmem:[%s6563_s11 + $0x3b8] sm:$0xff] }
 0x934   :  { %3469 = vmatmul.bf16.vlgmr.msra.gmra.mxu0 %v4317_v17 }
 0x935   :  { %3517 = vmatpush.bf16.msra.mxu0 %v5068_v23  ;;  %3505 = vmatpush.bf16.msrb.mxu3 %v5058_v24  ;;  %v5090_v23 = vld [vmem:[%s6563_s11 + $0x368] sm:$0xff]  ;;  %v5099_v24 = vld [vmem:[%s6563_s11 + $0x3b0] sm:$0xff] }
 0x937   :  { %v2230_v13 = vpop.f32.mrf.mxu1 }
 0x939   :  { %3518 = vmatpush.bf16.msra.mxu0 %v5067_v15  ;;  %3506 = vmatpush.bf16.msrb.mxu3 %v5057_v27 }
 0x93d   :  { %3519 = vmatpush.bf16.msra.mxu0 %v5066_v29  ;;  %3507 = vmatpush.bf16.msrb.mxu3 %v5056_v33  ;;  %v5098_v33 = vld [vmem:[%s6563_s11 + $0x3a8] sm:$0xff] }
 0x93f   :  { %v2232_v30 = vpop.f32.mrf.mxu1 }
 0x940   :  { %v5139_v31 = vpack.c.bf16 %v2232_v30, %v2227_v11 }
 0x941   :  { %3520 = vmatpush.bf16.msra.mxu0 %v5065_v34  ;;  %3508 = vmatpush.bf16.msrb.mxu3 %v5055_v32  ;;  %v5088_v34 = vld [vmem:[%s6563_s11 + $0x358] sm:$0xff]  ;;  %v5097_v32 = vld [vmem:[%s6563_s11 + $0x3a0] sm:$0xff] }
 0x942   :  { %5177 = vst [vmem:[#allocation3 + $0x58] sm:$0xff] %v5139_v31   ;;  %v5089_v31 = vld [vmem:[%s6563_s11 + $0x360] sm:$0xff] }
 0x945   :  { %3521 = vmatpush.bf16.msra.mxu0 %v5064_v41  ;;  %3509 = vmatpush.bf16.msrb.mxu3 %v5054_v37 }
 0x947   :  { %v2235_v25 = vpop.f32.mrf.mxu1 }
 0x948   :  { %v5144_v28 = vpack.c.bf16 %v2235_v25, %v2230_v13  ;;  %v5096_v25 = vld [vmem:[%s6563_s11 + $0x398] sm:$0xff] }
 0x949   :  { %v4318_v40 = vld [vmem:[#allocation3 + $0x54] sm:$0xf0]  ;;  %3522 = vmatpush.bf16.msra.mxu0 %v5063_v35  ;;  %3510 = vmatpush.bf16.msrb.mxu3 %v5053_v38  ;;  %v4977_v14 = vld [vmem:[#allocation3 + $0x58] sm:$0xf0] }
 0x94a   :  { %5178 = vst [vmem:[#allocation3 + $0x20] sm:$0xff] %v5144_v28   ;;  %v4321_v42 = vor.u32 %v4969_v16, %v4318_v40  ;;  %v5087_v28 = vld [vmem:[%s6563_s11 + $0x350] sm:$0xff]  ;;  %v5086_v16 = vld [vmem:[%s6563_s11 + $0x348] sm:$0xff] }
 0x94b   :  { %v5095_v40 = vld [vmem:[%s6563_s11 + $0x390] sm:$0xff] }
 0x94c   :  { %3483 = vmatmul.bf16.vlgmr.msra.gmra.mxu3 %v4321_v42 }
 0x94d   :  { %3531 = vmatpush.bf16.msra.mxu3 %v5076_v43  ;;  %3523 = vmatpush.bf16.msra.mxu0 %v5062_v39  ;;  %v5094_v43 = vld [vmem:[%s6563_s11 + $0x388] sm:$0xff] }
 0x94f   :  { %v2237_v19 = vpop.f32.mrf.mxu1 }
 0x951   :  { %v4324_v12 = vld [vmem:[#allocation3 + $0x20] sm:$0xf]  ;;  %3532 = vmatpush.bf16.msra.mxu3 %v5075_v47  ;;  %3524 = vmatpush.bf16.msra.mxu0 %v5061_v49  ;;  %v3386_v58 = vpop.f32.mrf.mxu0  ;;  %v4970_v1 = vld [vmem:[#allocation3 + $0x24] sm:$0xf] }
 0x952   :  { %v4325_v45 = vor.u32 %v4977_v14, %v4324_v12  ;;  %v5093_v14 = vld [vmem:[%s6563_s11 + $0x380] sm:$0xff] }
 0x954   :  { %3497 = vmatmul.bf16.vlgmr.msrb.gmra.mxu0 %v4325_v45 }
 0x955   :  { %3545 = vmatpush.bf16.msrb.mxu0 %v5084_v46  ;;  %3533 = vmatpush.bf16.msra.mxu3 %v5074_v50 }
 0x957   :  { %v2240_v53 = vpop.f32.mrf.mxu1 }
 0x959   :  { %3546 = vmatpush.bf16.msrb.mxu0 %v5083_v52  ;;  %3534 = vmatpush.bf16.msra.mxu3 %v5073_v55  ;;  %v3388_v0 = vpop.f32.mrf.mxu0 }
 0x95d   :  { %3547 = vmatpush.bf16.msrb.mxu0 %v5082_v54  ;;  %3535 = vmatpush.bf16.msra.mxu3 %v5072_v56 }
 0x95f   :  { %v2242_v59 = vpop.f32.mrf.mxu1 }
 0x960   :  { %v5149_v60 = vpack.c.bf16 %v2242_v59, %v2237_v19  ;;  %v5085_v19 = vld [vmem:[%s6563_s11 + $0x340] sm:$0xff] }
 0x961   :  { %3548 = vmatpush.bf16.msrb.mxu0 %v5081_v57  ;;  %3536 = vmatpush.bf16.msra.mxu3 %v5071_v51 }
 0x962   :  { %5179 = vst [vmem:[#allocation3 + $0x60] sm:$0xff] %v5149_v60  }
 0x965   :  { %3549 = vmatpush.bf16.msrb.mxu0 %v5080_v26  ;;  %3537 = vmatpush.bf16.msra.mxu3 %v5070_v36 }
 0x967   :  { %v2245_v62 = vpop.f32.mrf.mxu1 }
 0x968   :  { %v5154_v44 = vpack.c.bf16 %v2245_v62, %v2240_v53 }
 0x969   :  { %v4326_v3 = vld [vmem:[#allocation3 + $0x5c] sm:$0xf0]  ;;  %3550 = vmatpush.bf16.msrb.mxu0 %v5079_v61  ;;  %3538 = vmatpush.bf16.msra.mxu3 %v5069_v5  ;;  %v4978_v18 = vld [vmem:[#allocation3 + $0x60] sm:$0xf0] }
 0x96a   :  { %5180 = vst [vmem:[#allocation3 + $0x28] sm:$0xff] %v5154_v44   ;;  %v4329_v4 = vor.u32 %v4970_v1, %v4326_v3 }
 0x96c   :  { %3511 = vmatmul.bf16.vlgmr.msrb.gmra.mxu3 %v4329_v4 }
 0x96d   :  { %3551 = vmatpush.bf16.msrb.mxu0 %v5078_v48  ;;  %3559 = vmatpush.bf16.msrb.mxu3 %v5092_v63 }
 0x96f   :  { %v2247_v7 = vpop.f32.mrf.mxu1  ;;  %v3400_v8 = vpop.f32.mrf.mxu3 }
 0x970   :  { %v3401_v9 = vadd.f32 %v3400_v8, %v3386_v58 }
 0x971   :  { %v3414_v10 = vpop.f32.mrf.mxu0  ;;  %v4332_v11 = vld [vmem:[#allocation3 + $0x28] sm:$0xf]  ;;  %3552 = vmatpush.bf16.msrb.mxu0 %v5077_v6  ;;  %3560 = vmatpush.bf16.msrb.mxu3 %v5091_v20  ;;  %v4971_v38 = vld [vmem:[#allocation3 + $0x2c] sm:$0xf] }
 0x972   :  { %v3415_v22 = vadd.f32 %v3414_v10, %v3401_v9  ;;  %v4333_v17 = vor.u32 %v4978_v18, %v4332_v11 }
 0x974   :  { %3525 = vmatmul.bf16.vlgmr.msra.gmra.mxu0 %v4333_v17 }
 0x975   :  { %3573 = vmatpush.bf16.msra.mxu0 %v5100_v21  ;;  %3561 = vmatpush.bf16.msrb.mxu3 %v5090_v23 }
 0x977   :  { %v2250_v13 = vpop.f32.mrf.mxu1  ;;  %v3402_v15 = vpop.f32.mrf.mxu3 }
 0x978   :  { %v3403_v27 = vadd.f32 %v3402_v15, %v3388_v0 }
 0x979   :  { %v3416_v29 = vpop.f32.mrf.mxu0  ;;  %3574 = vmatpush.bf16.msra.mxu0 %v5099_v24  ;;  %3562 = vmatpush.bf16.msrb.mxu3 %v5089_v31 }
 0x97a   :  { %v6479_v30 = vadd.f32 %v3416_v29, %v3403_v27 }
 0x97d   :  { %3575 = vmatpush.bf16.msra.mxu0 %v5098_v33  ;;  %3563 = vmatpush.bf16.msrb.mxu3 %v5088_v34 }
 0x97f   :  { %v2252_v41 = vpop.f32.mrf.mxu1 }
 0x980   :  { %v5159_v37 = vpack.c.bf16 %v2252_v41, %v2247_v7 }
 0x981   :  { %3576 = vmatpush.bf16.msra.mxu0 %v5097_v32  ;;  %3564 = vmatpush.bf16.msrb.mxu3 %v5087_v28 }
 0x982   :  { %5181 = vst [vmem:[#allocation3 + $0x68] sm:$0xff] %v5159_v37  }
 0x985   :  { %3577 = vmatpush.bf16.msra.mxu0 %v5096_v25  ;;  %3565 = vmatpush.bf16.msrb.mxu3 %v5086_v16 }
 0x987   :  { %v2255_v42 = vpop.f32.mrf.mxu1 }
 0x988   :  { %v5164_v35 = vpack.c.bf16 %v2255_v42, %v2250_v13 }
 0x989   :  { %v4334_v39 = vld [vmem:[#allocation3 + $0x64] sm:$0xf0]  ;;  %3578 = vmatpush.bf16.msra.mxu0 %v5095_v40  ;;  %3566 = vmatpush.bf16.msrb.mxu3 %v5085_v19  ;;  %v4979_v52 = vld [vmem:[#allocation3 + $0x68] sm:$0xf0] }
 0x98a   :  { %5182 = vst [vmem:[#allocation3 + $0x30] sm:$0xff] %v5164_v35   ;;  %v4337_v12 = vor.u32 %v4971_v38, %v4334_v39 }
 0x98c   :  { %3539 = vmatmul.bf16.vlgmr.msra.gmra.mxu3 %v4337_v12 }
 0x98d   :  { %3579 = vmatpush.bf16.msra.mxu0 %v5094_v43 }
 0x98f   :  { %v2257_v49 = vpop.f32.mrf.mxu1  ;;  %v3428_v45 = vpop.f32.mrf.mxu3 }
 0x990   :  { %v3429_v46 = vadd.f32 %v3428_v45, %v3415_v22 }
 0x991   :  { %v3442_v47 = vpop.f32.mrf.mxu0  ;;  %v4340_v50 = vld [vmem:[#allocation3 + $0x30] sm:$0xf]  ;;  %3580 = vmatpush.bf16.msra.mxu0 %v5093_v14  ;;  %v4972_v59 = vld [vmem:[#allocation3 + $0x34] sm:$0xf] }
 0x992   :  { %v3443_v53 = vadd.f32 %v3442_v47, %v3429_v46  ;;  %v4341_v54 = vor.u32 %v4979_v52, %v4340_v50 }
 0x994   :  { %3553 = vmatmul.bf16.vlgmr.msrb.gmra.mxu0 %v4341_v54 }
 0x997   :  { %v2260_v55 = vpop.f32.mrf.mxu1  ;;  %v3430_v62 = vpop.f32.mrf.mxu3 }
 0x998   :  { %v2293_v56 = vpack.c.bf16 %v2260_v55, %v2260_v55  ;;  %v3431_v11 = vadd.f32 %v3430_v62, %v6479_v30 }
 0x999   :  { %v3444_v44 = vpop.f32.mrf.mxu0 }
 0x99a   :  { %2323 = vst [vmem:[#allocation3 + $0x38] sm:$0xf] %v2293_v56  ;;  %v3445_v22 = vadd.f32 %v3444_v44, %v3431_v11 }
 0x99f   :  { %v2262_v57 = vpop.f32.mrf.mxu1 }
 0x9a0   :  { %v5169_v58 = vpack.c.bf16 %v2262_v57, %v2257_v49  ;;  %v6515_v49 = vld [vmem:[%s6564_s14] sm:$0x3] }
 0x9a1   :  { %v4348_v26 = vld [vmem:[#allocation3 + $0x38] sm:$0xf] }
 0x9a2   :  { %5183 = vst [vmem:[#allocation3 + $0x70] sm:$0xff] %v5169_v58  }
 0x9a9   :  { %v4342_v60 = vld [vmem:[#allocation3 + $0x6c] sm:$0xf0]  ;;  %v4980_v51 = vld [vmem:[#allocation3 + $0x70] sm:$0xf0] }
 0x9aa   :  { %v4345_v36 = vor.u32 %v4972_v59, %v4342_v60  ;;  %v4349_v61 = vor.u32 %v4980_v51, %v4348_v26 }
 0x9ac   :  { %3567 = vmatmul.bf16.vlgmr.msrb.gmra.mxu3 %v4345_v36  ;;  %3581 = vmatmul.bf16.vlgmr.msra.gmra.mxu0 %v4349_v61 }
 0x9af   :  { %v3456_v0 = vpop.f32.mrf.mxu3 }
 0x9b0   :  { %v3457_v17 = vadd.f32 %v3456_v0, %v3443_v53 }
 0x9b1   :  { %v3470_v1 = vpop.f32.mrf.mxu0 }
 0x9b2   :  { %v3471_v23 = vadd.f32 %v3470_v1, %v3457_v17 }
 0x9b7   :  { %v3458_v3 = vpop.f32.mrf.mxu3 }
 0x9b8   :  { %v3459_v20 = vadd.f32 %v3458_v3, %v3445_v22  ;;  %v3591_v22 = vld [vmem:[%s6566_s13 + $0x8] sm:$0xff] }
 0x9b9   :  { %v3472_v4 = vpop.f32.mrf.mxu0 }
 0x9ba   :  { %v3473_v24 = vadd.f32 %v3472_v4, %v3459_v20 }
 0x9cf   :  { %v3484_v48 = vpop.f32.mrf.mxu3 }
 0x9d0   :  { %v3485_v13 = vadd.f32 %v3484_v48, %v3471_v23 }
 0x9d1   :  { %v3498_v5 = vpop.f32.mrf.mxu0 }
 0x9d2   :  { %v3499_v33 = vadd.f32 %v3498_v5, %v3485_v13  ;;  %v3695_v13 = vld [vmem:[%s6567_s15 + $0x8] sm:$0xff] }
 0x9d7   :  { %v3486_v63 = vpop.f32.mrf.mxu3 }
 0x9d8   :  { %v3487_v15 = vadd.f32 %v3486_v63, %v3473_v24 }
 0x9d9   :  { %v3500_v6 = vpop.f32.mrf.mxu0 }
 0x9da   :  { %v3501_v31 = vadd.f32 %v3500_v6, %v3487_v15  ;;  %v3588_v6 = vld [vmem:[%s6565_s12] sm:$0xff] }
 0x9ef   :  { %v3512_v7 = vpop.f32.mrf.mxu3 }
 0x9f0   :  { %v3513_v34 = vadd.f32 %v3512_v7, %v3499_v33 }
 0x9f1   :  { %v3526_v8 = vpop.f32.mrf.mxu0 }
 0x9f2   :  { %v3527_v41 = vadd.f32 %v3526_v8, %v3513_v34 }
 0x9f7   :  { %v3514_v9 = vpop.f32.mrf.mxu3 }
 0x9f8   :  { %v3515_v32 = vadd.f32 %v3514_v9, %v3501_v31  ;;  %v3590_v9 = vld [vmem:[%s6566_s13] sm:$0xff] }
 0x9f9   :  { %v3528_v10 = vpop.f32.mrf.mxu0 }
 0x9fa   :  { %v3529_v28 = vadd.f32 %v3528_v10, %v3515_v32 }
 0xa0f   :  { %v3540_v18 = vpop.f32.mrf.mxu3 }
 0xa10   :  { %v3541_v30 = vadd.f32 %v3540_v18, %v3527_v41  ;;  %v5248_v41 = vld [vmem:[%s6568_s16] ss:$0 sm:$0xff] }
 0xa11   :  { %v3554_v21 = vpop.f32.mrf.mxu0 }
 0xa12   :  { %v3555_v40 = vadd.f32 %v3554_v21, %v3541_v30 }
 0xa17   :  { %v3542_v27 = vpop.f32.mrf.mxu3 }
 0xa18   :  { %v3543_v16 = vadd.f32 %v3542_v27, %v3529_v28 }
 0xa19   :  { %v3556_v29 = vpop.f32.mrf.mxu0 }
 0xa1a   :  { %v3557_v42 = vadd.f32 %v3556_v29, %v3543_v16  ;;  %v3694_v29 = vld [vmem:[%s6567_s15] sm:$0xff] }
 0xa29   :  { %v3582_v37 = vpop.f32.mrf.mxu0 }
 0xa2f   :  { %v3568_v25 = vpop.f32.mrf.mxu3 }
 0xa30   :  { %v3569_v35 = vadd.f32 %v3568_v25, %v3555_v40 }
 0xa31   :  { %v3584_v43 = vpop.f32.mrf.mxu0 }
 0xa32   :  { %v3583_v19 = vadd.f32 %v3582_v37, %v3569_v35 }
 0xa34   :  { %v3592_v45 = vmul.f32 %v3583_v19, %v3583_v19 }
 0xa37   :  { %v3570_v38 = vpop.f32.mrf.mxu3 }
 0xa38   :  { %v3571_v39 = vadd.f32 %v3570_v38, %v3557_v42 }
 0xa3a   :  { %v3585_v12 = vadd.f32 %v3584_v43, %v3571_v39 }
 0xa3c   :  { %v3593_v14 = vmul.f32 %v3585_v12, %v3585_v12  ;;  %3612 = vmatpush.msra.mxu3 %v3585_v12 }
 0xa3e   :  { %3613 = vmatpush.msra.mxu3 %v3583_v19  ;;  %3632 = vmatpush.msrb.mxu1 %v3593_v14 }
 0xa3f   :  { %4830 = vmatmul.msk.f32.vlgmr.msra.gmra.mxu3 %vm3594_vm3, %v6515_v49 }
 0xa40   :  { %3633 = vmatpush.msrb.mxu1 %v3592_v45 }
 0xa41   :  { %4831 = vmatmul.msk.f32.vlgmr.msrb.gmra.mxu1 %vm3594_vm3, %v6515_v49 }
 0xabe   :  { %v3635_v50 = vpop.f32.mrf.mxu1 }
 0xabf   :  { %v3642_v52 = vsel %vm1958_vm10, %v3635_v50, 0.0 }
 0xac2   :  { %v3615_v46 = vpop.f32.mrf.mxu3 }
 0xac3   :  { %v3638_v47 = vsel %vm1958_vm10, %v3615_v46, 0.0 }
 0xac4   :  { %3639 = vadd.xlane.f32.xlu1 %v3638_v47 }
 0xacc   :  { %3643 = vadd.xlane.f32.xlu1 %v3642_v52 }
 0xb37   :  { %v3640_v53 = vpop.xlane.xlu1 %3639 }
 0xb38   :  { %v3641_v54 = vmul.f32 0.001953125, %v3640_v53 }
 0xb3a   :  { %v3646_v56 = vmul.f32 %v3641_v54, %v3641_v54 }
 0xb3f   :  { %v3644_v55 = vpop.xlane.xlu1 %3643 }
 0xb40   :  { %v3645_v57 = vmul.f32 0.001953125, %v3644_v55 }
 0xb42   :  { %v3647_v58 = vsub.f32 %v3645_v57, %v3646_v56 }
 0xb44   :  { %v3648_v59 = vadd.f32 1e-05, %v3647_v58 }
 0xb46   :  { %5253 = vrsqrt.f32 %v3648_v59  ;;  %vm3655_vm6 = vweird.f32 %v3648_v59 }
 0xb4c   :  { %v5254_v60 = vpop.eup %5253 }
 0xb4d   :  { %v3650_v26 = vmul.f32 %v5254_v60, %v3648_v59  ;;  %vm3656_vm5 = vweird.f32 %v5254_v60 }
 0xb4e   :  { %vm3657_vm7 = vmor %vm3655_vm6, %vm3656_vm5 }
 0xb4f   :  { %v3651_v51 = vmul.f32 %v5254_v60, %v3650_v26 }
 0xb51   :  { %v3652_v36 = vmul.f32 0.5, %v3651_v51 }
 0xb53   :  { %v3653_v61 = vsub.f32 1.5, %v3652_v36 }
 0xb55   :  { %v3654_v62 = vmul.f32 %v5254_v60, %v3653_v61 }
 0xb57   :  { %v3658_v44 = vsel %vm3657_vm7, %v5254_v60, %v3654_v62 }
 0xb58   :  { %v3659_v0 = vsel %vm394_vm4, %v3641_v54, %v3658_v44 }
 0xb59   :  { %v3661_v1 = vperm.slane %v3659_v0, 1  ;;  %v3660_v3 = vperm.slane %v3659_v0, 0 }
 0xb5b   :  { %3669 = vperm.xlu0 %5245, %v3661_v1   ;;  %3675 = vperm.xlu2 %5242, %v3660_v3  }
 0xb5c   :  { %3664 = vperm.xlu1 %5246, %v3660_v3  }
 0xb63   :  { %5247 = vset.pattern.permute.xlu0 %v5257_v2  ;;  %v3589_v2 = vld [vmem:[%s6565_s12 + $0x8] sm:$0xff] }
 0xb64   :  { %3679 = vperm.xlu0 %5247, %v3661_v1  }
 0xbb5   :  { %v3676_v63 = vpop.permute.xlu2 %3675 }
 0xbcd   :  { %v3670_v4 = vpop.permute.xlu0 %3669 }
 0xbce   :  { %v3665_v48 = vpop.permute.xlu1 %3664  ;;  %v3673_v10 = vsub.f32 %v3585_v12, %v3670_v4 }
 0xbcf   :  { %v3672_v5 = vsub.f32 %v3583_v19, %v3665_v48 }
 0xbd1   :  { %v3682_v7 = vmul.f32 %v3676_v63, %v3672_v5 }
 0xbd3   :  { %v3684_v8 = vmul.f32 %v3682_v7, %v3588_v6 }
 0xbd5   :  { %v3686_v18 = vadd.f32 %v3684_v8, %v3590_v9 }
 0xbd6   :  { %v3680_v11 = vpop.permute.xlu0 %3679 }
 0xbd7   :  { %v3683_v21 = vmul.f32 %v3680_v11, %v3673_v10  ;;  %v3690_v23 = vmul.f32 0.3, %v3686_v18  ;;  %vm3688_vm4 = vcmp.ge.f32.partialorder %v3686_v18, 0.0 }
 0xbd9   :  { %v3685_v17 = vmul.f32 %v3683_v21, %v3589_v2  ;;  %v3692_v27 = vsel %vm3688_vm4, %v3686_v18, %v3690_v23 }
 0xbda   :  { %v3696_v31 = vmul.f32 %v3694_v29, %v3692_v27 }
 0xbdb   :  { %v3687_v20 = vadd.f32 %v3685_v17, %v3591_v22 }
 0xbdd   :  { %vm3689_vm8 = vcmp.ge.f32.partialorder %v3687_v20, 0.0  ;;  %v3691_v24 = vmul.f32 0.3, %v3687_v20 }
 0xbdf   :  { %v3693_v15 = vsel %vm3689_vm8, %v3687_v20, %v3691_v24 }
 0xbe0   :  { %v3697_v33 = vmul.f32 %v3695_v13, %v3693_v15 }
 0xbe2   :  { %3712 = vmatpush.msrb.mxu3 %v3697_v33 }
 0xbe4   :  { %3713 = vmatpush.msrb.mxu3 %v3696_v31 }
 0xbe5   :  { %4832 = vmatmul.msk.f32.vlgmr.msrb.gmra.mxu3 %vm3594_vm3, %v6515_v49 }
 0xc68   :  { %v3715_v34 = vpop.f32.mrf.mxu3 }
 0xc69   :  { %v3718_v32 = vsel %vm1958_vm10, %v3715_v34, 0.0 }
 0xc6a   :  { %3719 = vadd.xlane.f32.xlu2 %v3718_v32 }
 0xcdd   :  { %v3720_v37 = vpop.xlane.xlu2 %3719 }
 0xcde   :  { %v3725_v25 = vadd.f32 %v5248_v41, %v3720_v37 }
 0xce0   :  { %3726 = vst [vmem:[%s6569_s17] sm:$0x3] %v3725_v25 }

</bundles_post_ra>
